<compile_context>
chip_gen: v6e
topology: v6e:2x2x1
jax: 0.10.0
libtpu: 0.0.40
codegen_flags: <defaults>
</compile_context>

<pallas_src>
import math

import jax
import jax.numpy as jnp
from jax.experimental import pallas as pl
from jax.experimental.pallas import tpu as pltpu

HIDDEN_SIZE = 64
INPUT_SIZE = 3
NUM_LAYERS = 5
FC1_OUT = 50
FC1_PAD = 64          # zero-pad 50 -> 64 for lane-friendly tiling


def _sigmoid(x):
    # Same formula in the kernel and the references (Mosaic-safe: exp + div).
    return 1.0 / (1.0 + jnp.exp(-x))


# ---------------------------------------------------------------------------
# Fused forward: 5 LSTM layers (wavefront) + (Linear -> ReLU -> Linear).
# ---------------------------------------------------------------------------
def rnn_forward(x, params):
    """x: (B, T, input_size), batch_first like the PyTorch module. -> (B, 1)."""
    B, T, Din = x.shape
    H, L = HIDDEN_SIZE, NUM_LAYERS
    # Time-major, flattened to (T*B, Din): row t*B + b == x[b, t, :].
    x_tm = (jnp.transpose(x.astype(jnp.float32), (1, 0, 2))
            .reshape(T * B, Din).astype(jnp.bfloat16))

    def kernel(x_ref, wih0_ref, whh0_ref, wf_ref, b_ref,
               w1_ref, b1_ref, w2_ref, b2_ref, o_ref):
        f32, bf16 = jnp.float32, jnp.bfloat16

        # Layer-0 input projection hoisted over all time steps (depends only
        # on the external input -> no serialization of the recurrence).
        gx0 = jnp.dot(x_ref[...], wih0_ref[...],
                      preferred_element_type=f32) + b_ref[0]

        h = [jnp.zeros((B, H), f32) for _ in range(L)]
        c = [jnp.zeros((B, H), f32) for _ in range(L)]
        below = [[None] * T for _ in range(L)]     # below[l][t] = h^{l-1}_t

        def cell(l, t):
            if l == 0:
                gates = gx0[t * B:(t + 1) * B, :] + jnp.dot(
                    h[0].astype(bf16), whh0_ref[...],
                    preferred_element_type=f32)
            else:
                # Fused [W_ih ; W_hh]: single K=2H=128 bf16 MXU matmul/cell.
                lhs = jnp.concatenate([below[l][t], h[l]],
                                      axis=-1).astype(bf16)
                gates = jnp.dot(lhs, wf_ref[l - 1],
                                preferred_element_type=f32) + b_ref[l]
            # Gate layout [i | f | o | g]: contiguous 3H sigmoid + H tanh.
            sg = _sigmoid(gates[:, 0:3 * H])
            g_g = jnp.tanh(gates[:, 3 * H:4 * H])
            i_g, f_g, o_g = sg[:, 0:H], sg[:, H:2 * H], sg[:, 2 * H:3 * H]
            c[l] = f_g * c[l] + i_g * g_g
            h[l] = o_g * jnp.tanh(c[l])
            if l + 1 < L:
                below[l + 1][t] = h[l]

        # Wavefront over (layer, time): up to min(L, T)=5 independent
        # matmul+gate chains per wave; serial depth T+L-1=12 waves.
        for w in range(T + L - 1):
            for l in range(max(0, w - T + 1), min(L - 1, w) + 1):
                cell(l, w - l)

        # MLP head: fc1 zero-padded 50->64 (lane friendly), fc2 as a VPU/XLU
        # lane reduction (avoids a degenerate 1-column MXU matmul).
        z = jnp.dot(h[L - 1].astype(bf16), w1_ref[...],
                    preferred_element_type=f32) + b1_ref[...]
        z = jnp.maximum(z, 0.0)
        o_ref[...] = (jnp.sum(z * w2_ref[...], axis=-1, keepdims=True)
                      + b2_ref[...])

    vmem = pl.BlockSpec(memory_space=pltpu.MemorySpace.VMEM)
    return pl.pallas_call(
        kernel,
        out_shape=jax.ShapeDtypeStruct((B, 1), jnp.float32),
        in_specs=[vmem] * 9,
        out_specs=vmem,
    )(x_tm, params["wih0"], params["whh0"], params["wf"], params["b"],
      params["fc1_w"], params["fc1_b"], params["fc2_w"], params["fc2_b"])


# ---------------------------------------------------------------------------
# Parameters (deterministic, PyTorch-style uniform init) in the fused layout.
# Gate-column order is [i | f | o | g] (PyTorch stores [i | f | g | o]);
# permute the last two H-column blocks when importing real PyTorch weights.
# ---------------------------------------------------------------------------
def init_params(key):
    H, Din, L = HIDDEN_SIZE, INPUT_SIZE, NUM_LAYERS
    ks = 1.0 / math.sqrt(H)

    def unif(k, shape, s):
        return jax.random.uniform(k, shape, jnp.float32, -s, s)

    keys = list(jax.random.split(key, 32))
    nk = iter(keys).__next__

    wih0 = unif(nk(), (Din, 4 * H), ks)
    whh0 = unif(nk(), (H, 4 * H), ks)
    biases = [unif(nk(), (1, 4 * H), ks) + unif(nk(), (1, 4 * H), ks)]  # b_ih+b_hh

    wf = []
    for _ in range(1, L):
        wih = unif(nk(), (H, 4 * H), ks)
        whh = unif(nk(), (H, 4 * H), ks)
        wf.append(jnp.concatenate([wih, whh], axis=0))      # (2H, 4H) fused
        biases.append(unif(nk(), (1, 4 * H), ks) + unif(nk(), (1, 4 * H), ks))

    s1 = 1.0 / math.sqrt(H)
    fc1_w = unif(nk(), (H, FC1_OUT), s1)
    fc1_b = unif(nk(), (1, FC1_OUT), s1)
    s2 = 1.0 / math.sqrt(FC1_OUT)
    fc2_w = unif(nk(), (FC1_OUT, 1), s2)
    fc2_b = unif(nk(), (1, 1), s2)

    pad = FC1_PAD - FC1_OUT
    return {
        "wih0": wih0.astype(jnp.bfloat16),              # (3, 256)
        "whh0": whh0.astype(jnp.bfloat16),              # (64, 256)
        "wf": jnp.stack(wf).astype(jnp.bfloat16),       # (4, 128, 256)
        "b": jnp.stack(biases),                         # (5, 1, 256) f32
        "fc1_w": jnp.pad(fc1_w, ((0, 0), (0, pad))).astype(jnp.bfloat16),
        "fc1_b": jnp.pad(fc1_b, ((0, 0), (0, pad))),    # (1, 64) f32
        "fc2_w": jnp.pad(fc2_w.T, ((0, 0), (0, pad))),  # (1, 64) f32 row
        "fc2_b": fc2_b,                                 # (1, 1) f32
    }


# ---------------------------------------------------------------------------
# Pure-JAX references. mxu_bf16=True mirrors the kernel's bf16 MXU operands
# exactly; False is the full-f32 PyTorch-semantics check.
# ---------------------------------------------------------------------------
def rnn_reference(x, params, *, mxu_bf16):
    B, T, _ = x.shape
    H, L = HIDDEN_SIZE, NUM_LAYERS
    f32 = jnp.float32
    md = jnp.bfloat16 if mxu_bf16 else f32

    def mm(a, w):
        return jnp.dot(a.astype(md), w.astype(md), preferred_element_type=f32)

    wih = [params["wih0"]] + [params["wf"][l - 1][:H] for l in range(1, L)]
    whh = [params["whh0"]] + [params["wf"][l - 1][H:] for l in range(1, L)]

    seq = jnp.transpose(x.astype(f32), (1, 0, 2))       # (T, B, Din)
    h = None
    for l in range(L):
        b = params["b"][l]
        h = jnp.zeros((B, H), f32)
        c = jnp.zeros((B, H), f32)
        outs = []
        for t in range(T):
            g = mm(seq[t], wih[l]) + mm(h, whh[l]) + b
            i = _sigmoid(g[:, 0:H])
            f = _sigmoid(g[:, H:2 * H])
            o = _sigmoid(g[:, 2 * H:3 * H])
            gg = jnp.tanh(g[:, 3 * H:4 * H])
            c = f * c + i * gg
            h = o * jnp.tanh(c)
            outs.append(h)
        seq = jnp.stack(outs)
    z = jnp.maximum(mm(h, params["fc1_w"]) + params["fc1_b"], 0.0)
    return (jnp.sum(z * params["fc2_w"].astype(f32), axis=-1, keepdims=True)
            + params["fc2_b"])


if __name__ == "__main__":
    key = jax.random.PRNGKey(0)
    kx, kp = jax.random.split(key)
    # B=8 fills the 8 f32 sublanes (per review: batch >= 8 amortizes the fixed
    # per-step latency). StandardScaler preprocessing sits outside the module;
    # use unit-normal inputs.
    B, T = 8, 8
    x = jax.random.normal(kx, (B, T, INPUT_SIZE), jnp.float32)
    params = init_params(kp)

    out = rnn_forward(x, params)
    jax.block_until_ready(out)
    assert out.shape == (B, 1) and out.dtype == jnp.float32

    # Tight check vs a reference that mirrors the kernel's bf16 MXU operands.
    ref_bf16 = rnn_reference(x, params, mxu_bf16=True)
    assert jnp.allclose(out, ref_bf16, rtol=1e-3, atol=1e-3), (
        float(jnp.max(jnp.abs(out - ref_bf16))))
    # Loose check vs the full-f32 PyTorch-semantics reference (bf16 MXU
    # operands perturb activations slightly over 5 layers x 8 steps).
    ref_f32 = rnn_reference(x, params, mxu_bf16=False)
    assert jnp.allclose(out, ref_f32, rtol=3e-2, atol=3e-2), (
        float(jnp.max(jnp.abs(out - ref_f32))))

    print("KERNEL_OK")
</pallas_src>

<mosaic_0001>
module attributes {stable_mosaic.version = 11 : i64} {
  func.func @kernel(%arg0: memref<64x3xbf16, #tpu.memory_space<vmem>>, %arg1: memref<3x256xbf16, #tpu.memory_space<vmem>>, %arg2: memref<64x256xbf16, #tpu.memory_space<vmem>>, %arg3: memref<4x128x256xbf16, #tpu.memory_space<vmem>>, %arg4: memref<5x1x256xf32, #tpu.memory_space<vmem>>, %arg5: memref<64x64xbf16, #tpu.memory_space<vmem>>, %arg6: memref<1x64xf32, #tpu.memory_space<vmem>>, %arg7: memref<1x64xf32, #tpu.memory_space<vmem>>, %arg8: memref<1x1xf32, #tpu.memory_space<vmem>>, %arg9: memref<8x1xf32, #tpu.memory_space<vmem>>) attributes {dimension_semantics = [], scalar_prefetch = 0 : i64, scratch_operands = 0 : i64, tpu.core_type = #tpu.core_type<tc>} {
    %c0 = arith.constant 0 : index
    %c0_0 = arith.constant 0 : index
    %0 = vector.load %arg0[%c0, %c0_0] : memref<64x3xbf16, #tpu.memory_space<vmem>>, vector<64x3xbf16>
    %c0_1 = arith.constant 0 : index
    %c0_2 = arith.constant 0 : index
    %1 = vector.load %arg1[%c0_1, %c0_2] : memref<3x256xbf16, #tpu.memory_space<vmem>>, vector<3x256xbf16>
    %cst = arith.constant dense<0.000000e+00> : vector<64x256xf32>
    %2 = tpu.matmul %0, %1, %cst {dimension_numbers = #tpu.dot_dimension_numbers<[1], [0], [0], [1], [0, 0, 1, 1], [], []>} : vector<64x3xbf16>, vector<3x256xbf16>, vector<64x256xf32> -> vector<64x256xf32>
    %c0_3 = arith.constant 0 : index
    %c0_4 = arith.constant 0 : index
    %c0_5 = arith.constant 0 : index
    %3 = vector.load %arg4[%c0_3, %c0_4, %c0_5] : memref<5x1x256xf32, #tpu.memory_space<vmem>>, vector<1x1x256xf32>
    %4 = vector.shape_cast %3 : vector<1x1x256xf32> to vector<1x256xf32>
    %5 = vector.broadcast %4 : vector<1x256xf32> to vector<64x256xf32>
    %6 = arith.addf %2, %5 : vector<64x256xf32>
    %cst_6 = arith.constant 0.000000e+00 : f32
    %7 = vector.broadcast %cst_6 : f32 to vector<8x64xf32>
    %cst_7 = arith.constant 0.000000e+00 : f32
    %8 = vector.broadcast %cst_7 : f32 to vector<8x64xf32>
    %cst_8 = arith.constant 0.000000e+00 : f32
    %9 = vector.broadcast %cst_8 : f32 to vector<8x64xf32>
    %cst_9 = arith.constant 0.000000e+00 : f32
    %10 = vector.broadcast %cst_9 : f32 to vector<8x64xf32>
    %cst_10 = arith.constant 0.000000e+00 : f32
    %11 = vector.broadcast %cst_10 : f32 to vector<8x64xf32>
    %cst_11 = arith.constant 0.000000e+00 : f32
    %12 = vector.broadcast %cst_11 : f32 to vector<8x64xf32>
    %cst_12 = arith.constant 0.000000e+00 : f32
    %13 = vector.broadcast %cst_12 : f32 to vector<8x64xf32>
    %cst_13 = arith.constant 0.000000e+00 : f32
    %14 = vector.broadcast %cst_13 : f32 to vector<8x64xf32>
    %cst_14 = arith.constant 0.000000e+00 : f32
    %15 = vector.broadcast %cst_14 : f32 to vector<8x64xf32>
    %cst_15 = arith.constant 0.000000e+00 : f32
    %16 = vector.broadcast %cst_15 : f32 to vector<8x64xf32>
    %17 = vector.extract_strided_slice %6 {offsets = [0, 0], sizes = [8, 256], strides = [1, 1]} : vector<64x256xf32> to vector<8x256xf32>
    %18 = arith.truncf %7 : vector<8x64xf32> to vector<8x64xbf16>
    %c0_16 = arith.constant 0 : index
    %c0_17 = arith.constant 0 : index
    %19 = vector.load %arg2[%c0_16, %c0_17] : memref<64x256xbf16, #tpu.memory_space<vmem>>, vector<64x256xbf16>
    %cst_18 = arith.constant dense<0.000000e+00> : vector<8x256xf32>
    %20 = tpu.matmul %18, %19, %cst_18 {dimension_numbers = #tpu.dot_dimension_numbers<[1], [0], [0], [1], [0, 0, 1, 1], [], []>} : vector<8x64xbf16>, vector<64x256xbf16>, vector<8x256xf32> -> vector<8x256xf32>
    %21 = arith.addf %17, %20 : vector<8x256xf32>
    %22 = vector.extract_strided_slice %21 {offsets = [0, 0], sizes = [8, 192], strides = [1, 1]} : vector<8x256xf32> to vector<8x192xf32>
    %cst_19 = arith.constant 0.000000e+00 : f32
    %23 = vector.broadcast %cst_19 : f32 to vector<8x192xf32>
    %24 = arith.subf %23, %22 : vector<8x192xf32>
    %25 = math.exp %24 : vector<8x192xf32>
    %cst_20 = arith.constant 1.000000e+00 : f32
    %26 = vector.broadcast %cst_20 : f32 to vector<8x192xf32>
    %27 = arith.addf %26, %25 : vector<8x192xf32>
    %cst_21 = arith.constant 1.000000e+00 : f32
    %28 = vector.broadcast %cst_21 : f32 to vector<8x192xf32>
    %29 = arith.divf %28, %27 : vector<8x192xf32>
    %30 = vector.extract_strided_slice %21 {offsets = [0, 192], sizes = [8, 64], strides = [1, 1]} : vector<8x256xf32> to vector<8x64xf32>
    %31 = math.tanh %30 : vector<8x64xf32>
    %32 = vector.extract_strided_slice %29 {offsets = [0, 0], sizes = [8, 64], strides = [1, 1]} : vector<8x192xf32> to vector<8x64xf32>
    %33 = vector.extract_strided_slice %29 {offsets = [0, 64], sizes = [8, 64], strides = [1, 1]} : vector<8x192xf32> to vector<8x64xf32>
    %34 = vector.extract_strided_slice %29 {offsets = [0, 128], sizes = [8, 64], strides = [1, 1]} : vector<8x192xf32> to vector<8x64xf32>
    %35 = arith.mulf %33, %12 : vector<8x64xf32>
    %36 = arith.mulf %32, %31 : vector<8x64xf32>
    %37 = arith.addf %35, %36 : vector<8x64xf32>
    %38 = math.tanh %37 : vector<8x64xf32>
    %39 = arith.mulf %34, %38 : vector<8x64xf32>
    %40 = vector.extract_strided_slice %6 {offsets = [8, 0], sizes = [8, 256], strides = [1, 1]} : vector<64x256xf32> to vector<8x256xf32>
    %41 = arith.truncf %39 : vector<8x64xf32> to vector<8x64xbf16>
    %c0_22 = arith.constant 0 : index
    %c0_23 = arith.constant 0 : index
    %42 = vector.load %arg2[%c0_22, %c0_23] : memref<64x256xbf16, #tpu.memory_space<vmem>>, vector<64x256xbf16>
    %cst_24 = arith.constant dense<0.000000e+00> : vector<8x256xf32>
    %43 = tpu.matmul %41, %42, %cst_24 {dimension_numbers = #tpu.dot_dimension_numbers<[1], [0], [0], [1], [0, 0, 1, 1], [], []>} : vector<8x64xbf16>, vector<64x256xbf16>, vector<8x256xf32> -> vector<8x256xf32>
    %44 = arith.addf %40, %43 : vector<8x256xf32>
    %45 = vector.extract_strided_slice %44 {offsets = [0, 0], sizes = [8, 192], strides = [1, 1]} : vector<8x256xf32> to vector<8x192xf32>
    %cst_25 = arith.constant 0.000000e+00 : f32
    %46 = vector.broadcast %cst_25 : f32 to vector<8x192xf32>
    %47 = arith.subf %46, %45 : vector<8x192xf32>
    %48 = math.exp %47 : vector<8x192xf32>
    %cst_26 = arith.constant 1.000000e+00 : f32
    %49 = vector.broadcast %cst_26 : f32 to vector<8x192xf32>
    %50 = arith.addf %49, %48 : vector<8x192xf32>
    %cst_27 = arith.constant 1.000000e+00 : f32
    %51 = vector.broadcast %cst_27 : f32 to vector<8x192xf32>
    %52 = arith.divf %51, %50 : vector<8x192xf32>
    %53 = vector.extract_strided_slice %44 {offsets = [0, 192], sizes = [8, 64], strides = [1, 1]} : vector<8x256xf32> to vector<8x64xf32>
    %54 = math.tanh %53 : vector<8x64xf32>
    %55 = vector.extract_strided_slice %52 {offsets = [0, 0], sizes = [8, 64], strides = [1, 1]} : vector<8x192xf32> to vector<8x64xf32>
    %56 = vector.extract_strided_slice %52 {offsets = [0, 64], sizes = [8, 64], strides = [1, 1]} : vector<8x192xf32> to vector<8x64xf32>
    %57 = vector.extract_strided_slice %52 {offsets = [0, 128], sizes = [8, 64], strides = [1, 1]} : vector<8x192xf32> to vector<8x64xf32>
    %58 = arith.mulf %56, %37 : vector<8x64xf32>
    %59 = arith.mulf %55, %54 : vector<8x64xf32>
    %60 = arith.addf %58, %59 : vector<8x64xf32>
    %61 = math.tanh %60 : vector<8x64xf32>
    %62 = arith.mulf %57, %61 : vector<8x64xf32>
    %63 = tpu.concatenate %39, %8 in 1 : vector<8x64xf32>, vector<8x64xf32> -> vector<8x128xf32>
    %64 = arith.truncf %63 : vector<8x128xf32> to vector<8x128xbf16>
    %c0_28 = arith.constant 0 : index
    %c0_29 = arith.constant 0 : index
    %c0_30 = arith.constant 0 : index
    %65 = vector.load %arg3[%c0_28, %c0_29, %c0_30] : memref<4x128x256xbf16, #tpu.memory_space<vmem>>, vector<1x128x256xbf16>
    %66 = vector.shape_cast %65 : vector<1x128x256xbf16> to vector<128x256xbf16>
    %cst_31 = arith.constant dense<0.000000e+00> : vector<8x256xf32>
    %67 = tpu.matmul %64, %66, %cst_31 {dimension_numbers = #tpu.dot_dimension_numbers<[1], [0], [0], [1], [0, 0, 1, 1], [], []>} : vector<8x128xbf16>, vector<128x256xbf16>, vector<8x256xf32> -> vector<8x256xf32>
    %c1 = arith.constant 1 : index
    %c0_32 = arith.constant 0 : index
    %c0_33 = arith.constant 0 : index
    %68 = vector.load %arg4[%c1, %c0_32, %c0_33] : memref<5x1x256xf32, #tpu.memory_space<vmem>>, vector<1x1x256xf32>
    %69 = vector.shape_cast %68 : vector<1x1x256xf32> to vector<1x256xf32>
    %70 = vector.broadcast %69 : vector<1x256xf32> to vector<8x256xf32>
    %71 = arith.addf %67, %70 : vector<8x256xf32>
    %72 = vector.extract_strided_slice %71 {offsets = [0, 0], sizes = [8, 192], strides = [1, 1]} : vector<8x256xf32> to vector<8x192xf32>
    %cst_34 = arith.constant 0.000000e+00 : f32
    %73 = vector.broadcast %cst_34 : f32 to vector<8x192xf32>
    %74 = arith.subf %73, %72 : vector<8x192xf32>
    %75 = math.exp %74 : vector<8x192xf32>
    %cst_35 = arith.constant 1.000000e+00 : f32
    %76 = vector.broadcast %cst_35 : f32 to vector<8x192xf32>
    %77 = arith.addf %76, %75 : vector<8x192xf32>
    %cst_36 = arith.constant 1.000000e+00 : f32
    %78 = vector.broadcast %cst_36 : f32 to vector<8x192xf32>
    %79 = arith.divf %78, %77 : vector<8x192xf32>
    %80 = vector.extract_strided_slice %71 {offsets = [0, 192], sizes = [8, 64], strides = [1, 1]} : vector<8x256xf32> to vector<8x64xf32>
    %81 = math.tanh %80 : vector<8x64xf32>
    %82 = vector.extract_strided_slice %79 {offsets = [0, 0], sizes = [8, 64], strides = [1, 1]} : vector<8x192xf32> to vector<8x64xf32>
    %83 = vector.extract_strided_slice %79 {offsets = [0, 64], sizes = [8, 64], strides = [1, 1]} : vector<8x192xf32> to vector<8x64xf32>
    %84 = vector.extract_strided_slice %79 {offsets = [0, 128], sizes = [8, 64], strides = [1, 1]} : vector<8x192xf32> to vector<8x64xf32>
    %85 = arith.mulf %83, %13 : vector<8x64xf32>
    %86 = arith.mulf %82, %81 : vector<8x64xf32>
    %87 = arith.addf %85, %86 : vector<8x64xf32>
    %88 = math.tanh %87 : vector<8x64xf32>
    %89 = arith.mulf %84, %88 : vector<8x64xf32>
    %90 = vector.extract_strided_slice %6 {offsets = [16, 0], sizes = [8, 256], strides = [1, 1]} : vector<64x256xf32> to vector<8x256xf32>
    %91 = arith.truncf %62 : vector<8x64xf32> to vector<8x64xbf16>
    %c0_37 = arith.constant 0 : index
    %c0_38 = arith.constant 0 : index
    %92 = vector.load %arg2[%c0_37, %c0_38] : memref<64x256xbf16, #tpu.memory_space<vmem>>, vector<64x256xbf16>
    %cst_39 = arith.constant dense<0.000000e+00> : vector<8x256xf32>
    %93 = tpu.matmul %91, %92, %cst_39 {dimension_numbers = #tpu.dot_dimension_numbers<[1], [0], [0], [1], [0, 0, 1, 1], [], []>} : vector<8x64xbf16>, vector<64x256xbf16>, vector<8x256xf32> -> vector<8x256xf32>
    %94 = arith.addf %90, %93 : vector<8x256xf32>
    %95 = vector.extract_strided_slice %94 {offsets = [0, 0], sizes = [8, 192], strides = [1, 1]} : vector<8x256xf32> to vector<8x192xf32>
    %cst_40 = arith.constant 0.000000e+00 : f32
    %96 = vector.broadcast %cst_40 : f32 to vector<8x192xf32>
    %97 = arith.subf %96, %95 : vector<8x192xf32>
    %98 = math.exp %97 : vector<8x192xf32>
    %cst_41 = arith.constant 1.000000e+00 : f32
    %99 = vector.broadcast %cst_41 : f32 to vector<8x192xf32>
    %100 = arith.addf %99, %98 : vector<8x192xf32>
    %cst_42 = arith.constant 1.000000e+00 : f32
    %101 = vector.broadcast %cst_42 : f32 to vector<8x192xf32>
    %102 = arith.divf %101, %100 : vector<8x192xf32>
    %103 = vector.extract_strided_slice %94 {offsets = [0, 192], sizes = [8, 64], strides = [1, 1]} : vector<8x256xf32> to vector<8x64xf32>
    %104 = math.tanh %103 : vector<8x64xf32>
    %105 = vector.extract_strided_slice %102 {offsets = [0, 0], sizes = [8, 64], strides = [1, 1]} : vector<8x192xf32> to vector<8x64xf32>
    %106 = vector.extract_strided_slice %102 {offsets = [0, 64], sizes = [8, 64], strides = [1, 1]} : vector<8x192xf32> to vector<8x64xf32>
    %107 = vector.extract_strided_slice %102 {offsets = [0, 128], sizes = [8, 64], strides = [1, 1]} : vector<8x192xf32> to vector<8x64xf32>
    %108 = arith.mulf %106, %60 : vector<8x64xf32>
    %109 = arith.mulf %105, %104 : vector<8x64xf32>
    %110 = arith.addf %108, %109 : vector<8x64xf32>
    %111 = math.tanh %110 : vector<8x64xf32>
    %112 = arith.mulf %107, %111 : vector<8x64xf32>
    %113 = tpu.concatenate %62, %89 in 1 : vector<8x64xf32>, vector<8x64xf32> -> vector<8x128xf32>
    %114 = arith.truncf %113 : vector<8x128xf32> to vector<8x128xbf16>
    %c0_43 = arith.constant 0 : index
    %c0_44 = arith.constant 0 : index
    %c0_45 = arith.constant 0 : index
    %115 = vector.load %arg3[%c0_43, %c0_44, %c0_45] : memref<4x128x256xbf16, #tpu.memory_space<vmem>>, vector<1x128x256xbf16>
    %116 = vector.shape_cast %115 : vector<1x128x256xbf16> to vector<128x256xbf16>
    %cst_46 = arith.constant dense<0.000000e+00> : vector<8x256xf32>
    %117 = tpu.matmul %114, %116, %cst_46 {dimension_numbers = #tpu.dot_dimension_numbers<[1], [0], [0], [1], [0, 0, 1, 1], [], []>} : vector<8x128xbf16>, vector<128x256xbf16>, vector<8x256xf32> -> vector<8x256xf32>
    %c1_47 = arith.constant 1 : index
    %c0_48 = arith.constant 0 : index
    %c0_49 = arith.constant 0 : index
    %118 = vector.load %arg4[%c1_47, %c0_48, %c0_49] : memref<5x1x256xf32, #tpu.memory_space<vmem>>, vector<1x1x256xf32>
    %119 = vector.shape_cast %118 : vector<1x1x256xf32> to vector<1x256xf32>
    %120 = vector.broadcast %119 : vector<1x256xf32> to vector<8x256xf32>
    %121 = arith.addf %117, %120 : vector<8x256xf32>
    %122 = vector.extract_strided_slice %121 {offsets = [0, 0], sizes = [8, 192], strides = [1, 1]} : vector<8x256xf32> to vector<8x192xf32>
    %cst_50 = arith.constant 0.000000e+00 : f32
    %123 = vector.broadcast %cst_50 : f32 to vector<8x192xf32>
    %124 = arith.subf %123, %122 : vector<8x192xf32>
    %125 = math.exp %124 : vector<8x192xf32>
    %cst_51 = arith.constant 1.000000e+00 : f32
    %126 = vector.broadcast %cst_51 : f32 to vector<8x192xf32>
    %127 = arith.addf %126, %125 : vector<8x192xf32>
    %cst_52 = arith.constant 1.000000e+00 : f32
    %128 = vector.broadcast %cst_52 : f32 to vector<8x192xf32>
    %129 = arith.divf %128, %127 : vector<8x192xf32>
    %130 = vector.extract_strided_slice %121 {offsets = [0, 192], sizes = [8, 64], strides = [1, 1]} : vector<8x256xf32> to vector<8x64xf32>
    %131 = math.tanh %130 : vector<8x64xf32>
    %132 = vector.extract_strided_slice %129 {offsets = [0, 0], sizes = [8, 64], strides = [1, 1]} : vector<8x192xf32> to vector<8x64xf32>
    %133 = vector.extract_strided_slice %129 {offsets = [0, 64], sizes = [8, 64], strides = [1, 1]} : vector<8x192xf32> to vector<8x64xf32>
    %134 = vector.extract_strided_slice %129 {offsets = [0, 128], sizes = [8, 64], strides = [1, 1]} : vector<8x192xf32> to vector<8x64xf32>
    %135 = arith.mulf %133, %87 : vector<8x64xf32>
    %136 = arith.mulf %132, %131 : vector<8x64xf32>
    %137 = arith.addf %135, %136 : vector<8x64xf32>
    %138 = math.tanh %137 : vector<8x64xf32>
    %139 = arith.mulf %134, %138 : vector<8x64xf32>
    %140 = tpu.concatenate %89, %9 in 1 : vector<8x64xf32>, vector<8x64xf32> -> vector<8x128xf32>
    %141 = arith.truncf %140 : vector<8x128xf32> to vector<8x128xbf16>
    %c1_53 = arith.constant 1 : index
    %c0_54 = arith.constant 0 : index
    %c0_55 = arith.constant 0 : index
    %142 = vector.load %arg3[%c1_53, %c0_54, %c0_55] : memref<4x128x256xbf16, #tpu.memory_space<vmem>>, vector<1x128x256xbf16>
    %143 = vector.shape_cast %142 : vector<1x128x256xbf16> to vector<128x256xbf16>
    %cst_56 = arith.constant dense<0.000000e+00> : vector<8x256xf32>
    %144 = tpu.matmul %141, %143, %cst_56 {dimension_numbers = #tpu.dot_dimension_numbers<[1], [0], [0], [1], [0, 0, 1, 1], [], []>} : vector<8x128xbf16>, vector<128x256xbf16>, vector<8x256xf32> -> vector<8x256xf32>
    %c2 = arith.constant 2 : index
    %c0_57 = arith.constant 0 : index
    %c0_58 = arith.constant 0 : index
    %145 = vector.load %arg4[%c2, %c0_57, %c0_58] : memref<5x1x256xf32, #tpu.memory_space<vmem>>, vector<1x1x256xf32>
    %146 = vector.shape_cast %145 : vector<1x1x256xf32> to vector<1x256xf32>
    %147 = vector.broadcast %146 : vector<1x256xf32> to vector<8x256xf32>
    %148 = arith.addf %144, %147 : vector<8x256xf32>
    %149 = vector.extract_strided_slice %148 {offsets = [0, 0], sizes = [8, 192], strides = [1, 1]} : vector<8x256xf32> to vector<8x192xf32>
    %cst_59 = arith.constant 0.000000e+00 : f32
    %150 = vector.broadcast %cst_59 : f32 to vector<8x192xf32>
    %151 = arith.subf %150, %149 : vector<8x192xf32>
    %152 = math.exp %151 : vector<8x192xf32>
    %cst_60 = arith.constant 1.000000e+00 : f32
    %153 = vector.broadcast %cst_60 : f32 to vector<8x192xf32>
    %154 = arith.addf %153, %152 : vector<8x192xf32>
    %cst_61 = arith.constant 1.000000e+00 : f32
    %155 = vector.broadcast %cst_61 : f32 to vector<8x192xf32>
    %156 = arith.divf %155, %154 : vector<8x192xf32>
    %157 = vector.extract_strided_slice %148 {offsets = [0, 192], sizes = [8, 64], strides = [1, 1]} : vector<8x256xf32> to vector<8x64xf32>
    %158 = math.tanh %157 : vector<8x64xf32>
    %159 = vector.extract_strided_slice %156 {offsets = [0, 0], sizes = [8, 64], strides = [1, 1]} : vector<8x192xf32> to vector<8x64xf32>
    %160 = vector.extract_strided_slice %156 {offsets = [0, 64], sizes = [8, 64], strides = [1, 1]} : vector<8x192xf32> to vector<8x64xf32>
    %161 = vector.extract_strided_slice %156 {offsets = [0, 128], sizes = [8, 64], strides = [1, 1]} : vector<8x192xf32> to vector<8x64xf32>
    %162 = arith.mulf %160, %14 : vector<8x64xf32>
    %163 = arith.mulf %159, %158 : vector<8x64xf32>
    %164 = arith.addf %162, %163 : vector<8x64xf32>
    %165 = math.tanh %164 : vector<8x64xf32>
    %166 = arith.mulf %161, %165 : vector<8x64xf32>
    %167 = vector.extract_strided_slice %6 {offsets = [24, 0], sizes = [8, 256], strides = [1, 1]} : vector<64x256xf32> to vector<8x256xf32>
    %168 = arith.truncf %112 : vector<8x64xf32> to vector<8x64xbf16>
    %c0_62 = arith.constant 0 : index
    %c0_63 = arith.constant 0 : index
    %169 = vector.load %arg2[%c0_62, %c0_63] : memref<64x256xbf16, #tpu.memory_space<vmem>>, vector<64x256xbf16>
    %cst_64 = arith.constant dense<0.000000e+00> : vector<8x256xf32>
    %170 = tpu.matmul %168, %169, %cst_64 {dimension_numbers = #tpu.dot_dimension_numbers<[1], [0], [0], [1], [0, 0, 1, 1], [], []>} : vector<8x64xbf16>, vector<64x256xbf16>, vector<8x256xf32> -> vector<8x256xf32>
    %171 = arith.addf %167, %170 : vector<8x256xf32>
    %172 = vector.extract_strided_slice %171 {offsets = [0, 0], sizes = [8, 192], strides = [1, 1]} : vector<8x256xf32> to vector<8x192xf32>
    %cst_65 = arith.constant 0.000000e+00 : f32
    %173 = vector.broadcast %cst_65 : f32 to vector<8x192xf32>
    %174 = arith.subf %173, %172 : vector<8x192xf32>
    %175 = math.exp %174 : vector<8x192xf32>
    %cst_66 = arith.constant 1.000000e+00 : f32
    %176 = vector.broadcast %cst_66 : f32 to vector<8x192xf32>
    %177 = arith.addf %176, %175 : vector<8x192xf32>
    %cst_67 = arith.constant 1.000000e+00 : f32
    %178 = vector.broadcast %cst_67 : f32 to vector<8x192xf32>
    %179 = arith.divf %178, %177 : vector<8x192xf32>
    %180 = vector.extract_strided_slice %171 {offsets = [0, 192], sizes = [8, 64], strides = [1, 1]} : vector<8x256xf32> to vector<8x64xf32>
    %181 = math.tanh %180 : vector<8x64xf32>
    %182 = vector.extract_strided_slice %179 {offsets = [0, 0], sizes = [8, 64], strides = [1, 1]} : vector<8x192xf32> to vector<8x64xf32>
    %183 = vector.extract_strided_slice %179 {offsets = [0, 64], sizes = [8, 64], strides = [1, 1]} : vector<8x192xf32> to vector<8x64xf32>
    %184 = vector.extract_strided_slice %179 {offsets = [0, 128], sizes = [8, 64], strides = [1, 1]} : vector<8x192xf32> to vector<8x64xf32>
    %185 = arith.mulf %183, %110 : vector<8x64xf32>
    %186 = arith.mulf %182, %181 : vector<8x64xf32>
    %187 = arith.addf %185, %186 : vector<8x64xf32>
    %188 = math.tanh %187 : vector<8x64xf32>
    %189 = arith.mulf %184, %188 : vector<8x64xf32>
    %190 = tpu.concatenate %112, %139 in 1 : vector<8x64xf32>, vector<8x64xf32> -> vector<8x128xf32>
    %191 = arith.truncf %190 : vector<8x128xf32> to vector<8x128xbf16>
    %c0_68 = arith.constant 0 : index
    %c0_69 = arith.constant 0 : index
    %c0_70 = arith.constant 0 : index
    %192 = vector.load %arg3[%c0_68, %c0_69, %c0_70] : memref<4x128x256xbf16, #tpu.memory_space<vmem>>, vector<1x128x256xbf16>
    %193 = vector.shape_cast %192 : vector<1x128x256xbf16> to vector<128x256xbf16>
    %cst_71 = arith.constant dense<0.000000e+00> : vector<8x256xf32>
    %194 = tpu.matmul %191, %193, %cst_71 {dimension_numbers = #tpu.dot_dimension_numbers<[1], [0], [0], [1], [0, 0, 1, 1], [], []>} : vector<8x128xbf16>, vector<128x256xbf16>, vector<8x256xf32> -> vector<8x256xf32>
    %c1_72 = arith.constant 1 : index
    %c0_73 = arith.constant 0 : index
    %c0_74 = arith.constant 0 : index
    %195 = vector.load %arg4[%c1_72, %c0_73, %c0_74] : memref<5x1x256xf32, #tpu.memory_space<vmem>>, vector<1x1x256xf32>
    %196 = vector.shape_cast %195 : vector<1x1x256xf32> to vector<1x256xf32>
    %197 = vector.broadcast %196 : vector<1x256xf32> to vector<8x256xf32>
    %198 = arith.addf %194, %197 : vector<8x256xf32>
    %199 = vector.extract_strided_slice %198 {offsets = [0, 0], sizes = [8, 192], strides = [1, 1]} : vector<8x256xf32> to vector<8x192xf32>
    %cst_75 = arith.constant 0.000000e+00 : f32
    %200 = vector.broadcast %cst_75 : f32 to vector<8x192xf32>
    %201 = arith.subf %200, %199 : vector<8x192xf32>
    %202 = math.exp %201 : vector<8x192xf32>
    %cst_76 = arith.constant 1.000000e+00 : f32
    %203 = vector.broadcast %cst_76 : f32 to vector<8x192xf32>
    %204 = arith.addf %203, %202 : vector<8x192xf32>
    %cst_77 = arith.constant 1.000000e+00 : f32
    %205 = vector.broadcast %cst_77 : f32 to vector<8x192xf32>
    %206 = arith.divf %205, %204 : vector<8x192xf32>
    %207 = vector.extract_strided_slice %198 {offsets = [0, 192], sizes = [8, 64], strides = [1, 1]} : vector<8x256xf32> to vector<8x64xf32>
    %208 = math.tanh %207 : vector<8x64xf32>
    %209 = vector.extract_strided_slice %206 {offsets = [0, 0], sizes = [8, 64], strides = [1, 1]} : vector<8x192xf32> to vector<8x64xf32>
    %210 = vector.extract_strided_slice %206 {offsets = [0, 64], sizes = [8, 64], strides = [1, 1]} : vector<8x192xf32> to vector<8x64xf32>
    %211 = vector.extract_strided_slice %206 {offsets = [0, 128], sizes = [8, 64], strides = [1, 1]} : vector<8x192xf32> to vector<8x64xf32>
    %212 = arith.mulf %210, %137 : vector<8x64xf32>
    %213 = arith.mulf %209, %208 : vector<8x64xf32>
    %214 = arith.addf %212, %213 : vector<8x64xf32>
    %215 = math.tanh %214 : vector<8x64xf32>
    %216 = arith.mulf %211, %215 : vector<8x64xf32>
    %217 = tpu.concatenate %139, %166 in 1 : vector<8x64xf32>, vector<8x64xf32> -> vector<8x128xf32>
    %218 = arith.truncf %217 : vector<8x128xf32> to vector<8x128xbf16>
    %c1_78 = arith.constant 1 : index
    %c0_79 = arith.constant 0 : index
    %c0_80 = arith.constant 0 : index
    %219 = vector.load %arg3[%c1_78, %c0_79, %c0_80] : memref<4x128x256xbf16, #tpu.memory_space<vmem>>, vector<1x128x256xbf16>
    %220 = vector.shape_cast %219 : vector<1x128x256xbf16> to vector<128x256xbf16>
    %cst_81 = arith.constant dense<0.000000e+00> : vector<8x256xf32>
    %221 = tpu.matmul %218, %220, %cst_81 {dimension_numbers = #tpu.dot_dimension_numbers<[1], [0], [0], [1], [0, 0, 1, 1], [], []>} : vector<8x128xbf16>, vector<128x256xbf16>, vector<8x256xf32> -> vector<8x256xf32>
    %c2_82 = arith.constant 2 : index
    %c0_83 = arith.constant 0 : index
    %c0_84 = arith.constant 0 : index
    %222 = vector.load %arg4[%c2_82, %c0_83, %c0_84] : memref<5x1x256xf32, #tpu.memory_space<vmem>>, vector<1x1x256xf32>
    %223 = vector.shape_cast %222 : vector<1x1x256xf32> to vector<1x256xf32>
    %224 = vector.broadcast %223 : vector<1x256xf32> to vector<8x256xf32>
    %225 = arith.addf %221, %224 : vector<8x256xf32>
    %226 = vector.extract_strided_slice %225 {offsets = [0, 0], sizes = [8, 192], strides = [1, 1]} : vector<8x256xf32> to vector<8x192xf32>
    %cst_85 = arith.constant 0.000000e+00 : f32
    %227 = vector.broadcast %cst_85 : f32 to vector<8x192xf32>
    %228 = arith.subf %227, %226 : vector<8x192xf32>
    %229 = math.exp %228 : vector<8x192xf32>
    %cst_86 = arith.constant 1.000000e+00 : f32
    %230 = vector.broadcast %cst_86 : f32 to vector<8x192xf32>
    %231 = arith.addf %230, %229 : vector<8x192xf32>
    %cst_87 = arith.constant 1.000000e+00 : f32
    %232 = vector.broadcast %cst_87 : f32 to vector<8x192xf32>
    %233 = arith.divf %232, %231 : vector<8x192xf32>
    %234 = vector.extract_strided_slice %225 {offsets = [0, 192], sizes = [8, 64], strides = [1, 1]} : vector<8x256xf32> to vector<8x64xf32>
    %235 = math.tanh %234 : vector<8x64xf32>
    %236 = vector.extract_strided_slice %233 {offsets = [0, 0], sizes = [8, 64], strides = [1, 1]} : vector<8x192xf32> to vector<8x64xf32>
    %237 = vector.extract_strided_slice %233 {offsets = [0, 64], sizes = [8, 64], strides = [1, 1]} : vector<8x192xf32> to vector<8x64xf32>
    %238 = vector.extract_strided_slice %233 {offsets = [0, 128], sizes = [8, 64], strides = [1, 1]} : vector<8x192xf32> to vector<8x64xf32>
    %239 = arith.mulf %237, %164 : vector<8x64xf32>
    %240 = arith.mulf %236, %235 : vector<8x64xf32>
    %241 = arith.addf %239, %240 : vector<8x64xf32>
    %242 = math.tanh %241 : vector<8x64xf32>
    %243 = arith.mulf %238, %242 : vector<8x64xf32>
    %244 = tpu.concatenate %166, %10 in 1 : vector<8x64xf32>, vector<8x64xf32> -> vector<8x128xf32>
    %245 = arith.truncf %244 : vector<8x128xf32> to vector<8x128xbf16>
    %c2_88 = arith.constant 2 : index
    %c0_89 = arith.constant 0 : index
    %c0_90 = arith.constant 0 : index
    %246 = vector.load %arg3[%c2_88, %c0_89, %c0_90] : memref<4x128x256xbf16, #tpu.memory_space<vmem>>, vector<1x128x256xbf16>
    %247 = vector.shape_cast %246 : vector<1x128x256xbf16> to vector<128x256xbf16>
    %cst_91 = arith.constant dense<0.000000e+00> : vector<8x256xf32>
    %248 = tpu.matmul %245, %247, %cst_91 {dimension_numbers = #tpu.dot_dimension_numbers<[1], [0], [0], [1], [0, 0, 1, 1], [], []>} : vector<8x128xbf16>, vector<128x256xbf16>, vector<8x256xf32> -> vector<8x256xf32>
    %c3 = arith.constant 3 : index
    %c0_92 = arith.constant 0 : index
    %c0_93 = arith.constant 0 : index
    %249 = vector.load %arg4[%c3, %c0_92, %c0_93] : memref<5x1x256xf32, #tpu.memory_space<vmem>>, vector<1x1x256xf32>
    %250 = vector.shape_cast %249 : vector<1x1x256xf32> to vector<1x256xf32>
    %251 = vector.broadcast %250 : vector<1x256xf32> to vector<8x256xf32>
    %252 = arith.addf %248, %251 : vector<8x256xf32>
    %253 = vector.extract_strided_slice %252 {offsets = [0, 0], sizes = [8, 192], strides = [1, 1]} : vector<8x256xf32> to vector<8x192xf32>
    %cst_94 = arith.constant 0.000000e+00 : f32
    %254 = vector.broadcast %cst_94 : f32 to vector<8x192xf32>
    %255 = arith.subf %254, %253 : vector<8x192xf32>
    %256 = math.exp %255 : vector<8x192xf32>
    %cst_95 = arith.constant 1.000000e+00 : f32
    %257 = vector.broadcast %cst_95 : f32 to vector<8x192xf32>
    %258 = arith.addf %257, %256 : vector<8x192xf32>
    %cst_96 = arith.constant 1.000000e+00 : f32
    %259 = vector.broadcast %cst_96 : f32 to vector<8x192xf32>
    %260 = arith.divf %259, %258 : vector<8x192xf32>
    %261 = vector.extract_strided_slice %252 {offsets = [0, 192], sizes = [8, 64], strides = [1, 1]} : vector<8x256xf32> to vector<8x64xf32>
    %262 = math.tanh %261 : vector<8x64xf32>
    %263 = vector.extract_strided_slice %260 {offsets = [0, 0], sizes = [8, 64], strides = [1, 1]} : vector<8x192xf32> to vector<8x64xf32>
    %264 = vector.extract_strided_slice %260 {offsets = [0, 64], sizes = [8, 64], strides = [1, 1]} : vector<8x192xf32> to vector<8x64xf32>
    %265 = vector.extract_strided_slice %260 {offsets = [0, 128], sizes = [8, 64], strides = [1, 1]} : vector<8x192xf32> to vector<8x64xf32>
    %266 = arith.mulf %264, %15 : vector<8x64xf32>
    %267 = arith.mulf %263, %262 : vector<8x64xf32>
    %268 = arith.addf %266, %267 : vector<8x64xf32>
    %269 = math.tanh %268 : vector<8x64xf32>
    %270 = arith.mulf %265, %269 : vector<8x64xf32>
    %271 = vector.extract_strided_slice %6 {offsets = [32, 0], sizes = [8, 256], strides = [1, 1]} : vector<64x256xf32> to vector<8x256xf32>
    %272 = arith.truncf %189 : vector<8x64xf32> to vector<8x64xbf16>
    %c0_97 = arith.constant 0 : index
    %c0_98 = arith.constant 0 : index
    %273 = vector.load %arg2[%c0_97, %c0_98] : memref<64x256xbf16, #tpu.memory_space<vmem>>, vector<64x256xbf16>
    %cst_99 = arith.constant dense<0.000000e+00> : vector<8x256xf32>
    %274 = tpu.matmul %272, %273, %cst_99 {dimension_numbers = #tpu.dot_dimension_numbers<[1], [0], [0], [1], [0, 0, 1, 1], [], []>} : vector<8x64xbf16>, vector<64x256xbf16>, vector<8x256xf32> -> vector<8x256xf32>
    %275 = arith.addf %271, %274 : vector<8x256xf32>
    %276 = vector.extract_strided_slice %275 {offsets = [0, 0], sizes = [8, 192], strides = [1, 1]} : vector<8x256xf32> to vector<8x192xf32>
    %cst_100 = arith.constant 0.000000e+00 : f32
    %277 = vector.broadcast %cst_100 : f32 to vector<8x192xf32>
    %278 = arith.subf %277, %276 : vector<8x192xf32>
    %279 = math.exp %278 : vector<8x192xf32>
    %cst_101 = arith.constant 1.000000e+00 : f32
    %280 = vector.broadcast %cst_101 : f32 to vector<8x192xf32>
    %281 = arith.addf %280, %279 : vector<8x192xf32>
    %cst_102 = arith.constant 1.000000e+00 : f32
    %282 = vector.broadcast %cst_102 : f32 to vector<8x192xf32>
    %283 = arith.divf %282, %281 : vector<8x192xf32>
    %284 = vector.extract_strided_slice %275 {offsets = [0, 192], sizes = [8, 64], strides = [1, 1]} : vector<8x256xf32> to vector<8x64xf32>
    %285 = math.tanh %284 : vector<8x64xf32>
    %286 = vector.extract_strided_slice %283 {offsets = [0, 0], sizes = [8, 64], strides = [1, 1]} : vector<8x192xf32> to vector<8x64xf32>
    %287 = vector.extract_strided_slice %283 {offsets = [0, 64], sizes = [8, 64], strides = [1, 1]} : vector<8x192xf32> to vector<8x64xf32>
    %288 = vector.extract_strided_slice %283 {offsets = [0, 128], sizes = [8, 64], strides = [1, 1]} : vector<8x192xf32> to vector<8x64xf32>
    %289 = arith.mulf %287, %187 : vector<8x64xf32>
    %290 = arith.mulf %286, %285 : vector<8x64xf32>
    %291 = arith.addf %289, %290 : vector<8x64xf32>
    %292 = math.tanh %291 : vector<8x64xf32>
    %293 = arith.mulf %288, %292 : vector<8x64xf32>
    %294 = tpu.concatenate %189, %216 in 1 : vector<8x64xf32>, vector<8x64xf32> -> vector<8x128xf32>
    %295 = arith.truncf %294 : vector<8x128xf32> to vector<8x128xbf16>
    %c0_103 = arith.constant 0 : index
    %c0_104 = arith.constant 0 : index
    %c0_105 = arith.constant 0 : index
    %296 = vector.load %arg3[%c0_103, %c0_104, %c0_105] : memref<4x128x256xbf16, #tpu.memory_space<vmem>>, vector<1x128x256xbf16>
    %297 = vector.shape_cast %296 : vector<1x128x256xbf16> to vector<128x256xbf16>
    %cst_106 = arith.constant dense<0.000000e+00> : vector<8x256xf32>
    %298 = tpu.matmul %295, %297, %cst_106 {dimension_numbers = #tpu.dot_dimension_numbers<[1], [0], [0], [1], [0, 0, 1, 1], [], []>} : vector<8x128xbf16>, vector<128x256xbf16>, vector<8x256xf32> -> vector<8x256xf32>
    %c1_107 = arith.constant 1 : index
    %c0_108 = arith.constant 0 : index
    %c0_109 = arith.constant 0 : index
    %299 = vector.load %arg4[%c1_107, %c0_108, %c0_109] : memref<5x1x256xf32, #tpu.memory_space<vmem>>, vector<1x1x256xf32>
    %300 = vector.shape_cast %299 : vector<1x1x256xf32> to vector<1x256xf32>
    %301 = vector.broadcast %300 : vector<1x256xf32> to vector<8x256xf32>
    %302 = arith.addf %298, %301 : vector<8x256xf32>
    %303 = vector.extract_strided_slice %302 {offsets = [0, 0], sizes = [8, 192], strides = [1, 1]} : vector<8x256xf32> to vector<8x192xf32>
    %cst_110 = arith.constant 0.000000e+00 : f32
    %304 = vector.broadcast %cst_110 : f32 to vector<8x192xf32>
    %305 = arith.subf %304, %303 : vector<8x192xf32>
    %306 = math.exp %305 : vector<8x192xf32>
    %cst_111 = arith.constant 1.000000e+00 : f32
    %307 = vector.broadcast %cst_111 : f32 to vector<8x192xf32>
    %308 = arith.addf %307, %306 : vector<8x192xf32>
    %cst_112 = arith.constant 1.000000e+00 : f32
    %309 = vector.broadcast %cst_112 : f32 to vector<8x192xf32>
    %310 = arith.divf %309, %308 : vector<8x192xf32>
    %311 = vector.extract_strided_slice %302 {offsets = [0, 192], sizes = [8, 64], strides = [1, 1]} : vector<8x256xf32> to vector<8x64xf32>
    %312 = math.tanh %311 : vector<8x64xf32>
    %313 = vector.extract_strided_slice %310 {offsets = [0, 0], sizes = [8, 64], strides = [1, 1]} : vector<8x192xf32> to vector<8x64xf32>
    %314 = vector.extract_strided_slice %310 {offsets = [0, 64], sizes = [8, 64], strides = [1, 1]} : vector<8x192xf32> to vector<8x64xf32>
    %315 = vector.extract_strided_slice %310 {offsets = [0, 128], sizes = [8, 64], strides = [1, 1]} : vector<8x192xf32> to vector<8x64xf32>
    %316 = arith.mulf %314, %214 : vector<8x64xf32>
    %317 = arith.mulf %313, %312 : vector<8x64xf32>
    %318 = arith.addf %316, %317 : vector<8x64xf32>
    %319 = math.tanh %318 : vector<8x64xf32>
    %320 = arith.mulf %315, %319 : vector<8x64xf32>
    %321 = tpu.concatenate %216, %243 in 1 : vector<8x64xf32>, vector<8x64xf32> -> vector<8x128xf32>
    %322 = arith.truncf %321 : vector<8x128xf32> to vector<8x128xbf16>
    %c1_113 = arith.constant 1 : index
    %c0_114 = arith.constant 0 : index
    %c0_115 = arith.constant 0 : index
    %323 = vector.load %arg3[%c1_113, %c0_114, %c0_115] : memref<4x128x256xbf16, #tpu.memory_space<vmem>>, vector<1x128x256xbf16>
    %324 = vector.shape_cast %323 : vector<1x128x256xbf16> to vector<128x256xbf16>
    %cst_116 = arith.constant dense<0.000000e+00> : vector<8x256xf32>
    %325 = tpu.matmul %322, %324, %cst_116 {dimension_numbers = #tpu.dot_dimension_numbers<[1], [0], [0], [1], [0, 0, 1, 1], [], []>} : vector<8x128xbf16>, vector<128x256xbf16>, vector<8x256xf32> -> vector<8x256xf32>
    %c2_117 = arith.constant 2 : index
    %c0_118 = arith.constant 0 : index
    %c0_119 = arith.constant 0 : index
    %326 = vector.load %arg4[%c2_117, %c0_118, %c0_119] : memref<5x1x256xf32, #tpu.memory_space<vmem>>, vector<1x1x256xf32>
    %327 = vector.shape_cast %326 : vector<1x1x256xf32> to vector<1x256xf32>
    %328 = vector.broadcast %327 : vector<1x256xf32> to vector<8x256xf32>
    %329 = arith.addf %325, %328 : vector<8x256xf32>
    %330 = vector.extract_strided_slice %329 {offsets = [0, 0], sizes = [8, 192], strides = [1, 1]} : vector<8x256xf32> to vector<8x192xf32>
    %cst_120 = arith.constant 0.000000e+00 : f32
    %331 = vector.broadcast %cst_120 : f32 to vector<8x192xf32>
    %332 = arith.subf %331, %330 : vector<8x192xf32>
    %333 = math.exp %332 : vector<8x192xf32>
    %cst_121 = arith.constant 1.000000e+00 : f32
    %334 = vector.broadcast %cst_121 : f32 to vector<8x192xf32>
    %335 = arith.addf %334, %333 : vector<8x192xf32>
    %cst_122 = arith.constant 1.000000e+00 : f32
    %336 = vector.broadcast %cst_122 : f32 to vector<8x192xf32>
    %337 = arith.divf %336, %335 : vector<8x192xf32>
    %338 = vector.extract_strided_slice %329 {offsets = [0, 192], sizes = [8, 64], strides = [1, 1]} : vector<8x256xf32> to vector<8x64xf32>
    %339 = math.tanh %338 : vector<8x64xf32>
    %340 = vector.extract_strided_slice %337 {offsets = [0, 0], sizes = [8, 64], strides = [1, 1]} : vector<8x192xf32> to vector<8x64xf32>
    %341 = vector.extract_strided_slice %337 {offsets = [0, 64], sizes = [8, 64], strides = [1, 1]} : vector<8x192xf32> to vector<8x64xf32>
    %342 = vector.extract_strided_slice %337 {offsets = [0, 128], sizes = [8, 64], strides = [1, 1]} : vector<8x192xf32> to vector<8x64xf32>
    %343 = arith.mulf %341, %241 : vector<8x64xf32>
    %344 = arith.mulf %340, %339 : vector<8x64xf32>
    %345 = arith.addf %343, %344 : vector<8x64xf32>
    %346 = math.tanh %345 : vector<8x64xf32>
    %347 = arith.mulf %342, %346 : vector<8x64xf32>
    %348 = tpu.concatenate %243, %270 in 1 : vector<8x64xf32>, vector<8x64xf32> -> vector<8x128xf32>
    %349 = arith.truncf %348 : vector<8x128xf32> to vector<8x128xbf16>
    %c2_123 = arith.constant 2 : index
    %c0_124 = arith.constant 0 : index
    %c0_125 = arith.constant 0 : index
    %350 = vector.load %arg3[%c2_123, %c0_124, %c0_125] : memref<4x128x256xbf16, #tpu.memory_space<vmem>>, vector<1x128x256xbf16>
    %351 = vector.shape_cast %350 : vector<1x128x256xbf16> to vector<128x256xbf16>
    %cst_126 = arith.constant dense<0.000000e+00> : vector<8x256xf32>
    %352 = tpu.matmul %349, %351, %cst_126 {dimension_numbers = #tpu.dot_dimension_numbers<[1], [0], [0], [1], [0, 0, 1, 1], [], []>} : vector<8x128xbf16>, vector<128x256xbf16>, vector<8x256xf32> -> vector<8x256xf32>
    %c3_127 = arith.constant 3 : index
    %c0_128 = arith.constant 0 : index
    %c0_129 = arith.constant 0 : index
    %353 = vector.load %arg4[%c3_127, %c0_128, %c0_129] : memref<5x1x256xf32, #tpu.memory_space<vmem>>, vector<1x1x256xf32>
    %354 = vector.shape_cast %353 : vector<1x1x256xf32> to vector<1x256xf32>
    %355 = vector.broadcast %354 : vector<1x256xf32> to vector<8x256xf32>
    %356 = arith.addf %352, %355 : vector<8x256xf32>
    %357 = vector.extract_strided_slice %356 {offsets = [0, 0], sizes = [8, 192], strides = [1, 1]} : vector<8x256xf32> to vector<8x192xf32>
    %cst_130 = arith.constant 0.000000e+00 : f32
    %358 = vector.broadcast %cst_130 : f32 to vector<8x192xf32>
    %359 = arith.subf %358, %357 : vector<8x192xf32>
    %360 = math.exp %359 : vector<8x192xf32>
    %cst_131 = arith.constant 1.000000e+00 : f32
    %361 = vector.broadcast %cst_131 : f32 to vector<8x192xf32>
    %362 = arith.addf %361, %360 : vector<8x192xf32>
    %cst_132 = arith.constant 1.000000e+00 : f32
    %363 = vector.broadcast %cst_132 : f32 to vector<8x192xf32>
    %364 = arith.divf %363, %362 : vector<8x192xf32>
    %365 = vector.extract_strided_slice %356 {offsets = [0, 192], sizes = [8, 64], strides = [1, 1]} : vector<8x256xf32> to vector<8x64xf32>
    %366 = math.tanh %365 : vector<8x64xf32>
    %367 = vector.extract_strided_slice %364 {offsets = [0, 0], sizes = [8, 64], strides = [1, 1]} : vector<8x192xf32> to vector<8x64xf32>
    %368 = vector.extract_strided_slice %364 {offsets = [0, 64], sizes = [8, 64], strides = [1, 1]} : vector<8x192xf32> to vector<8x64xf32>
    %369 = vector.extract_strided_slice %364 {offsets = [0, 128], sizes = [8, 64], strides = [1, 1]} : vector<8x192xf32> to vector<8x64xf32>
    %370 = arith.mulf %368, %268 : vector<8x64xf32>
    %371 = arith.mulf %367, %366 : vector<8x64xf32>
    %372 = arith.addf %370, %371 : vector<8x64xf32>
    %373 = math.tanh %372 : vector<8x64xf32>
    %374 = arith.mulf %369, %373 : vector<8x64xf32>
    %375 = tpu.concatenate %270, %11 in 1 : vector<8x64xf32>, vector<8x64xf32> -> vector<8x128xf32>
    %376 = arith.truncf %375 : vector<8x128xf32> to vector<8x128xbf16>
    %c3_133 = arith.constant 3 : index
    %c0_134 = arith.constant 0 : index
    %c0_135 = arith.constant 0 : index
    %377 = vector.load %arg3[%c3_133, %c0_134, %c0_135] : memref<4x128x256xbf16, #tpu.memory_space<vmem>>, vector<1x128x256xbf16>
    %378 = vector.shape_cast %377 : vector<1x128x256xbf16> to vector<128x256xbf16>
    %cst_136 = arith.constant dense<0.000000e+00> : vector<8x256xf32>
    %379 = tpu.matmul %376, %378, %cst_136 {dimension_numbers = #tpu.dot_dimension_numbers<[1], [0], [0], [1], [0, 0, 1, 1], [], []>} : vector<8x128xbf16>, vector<128x256xbf16>, vector<8x256xf32> -> vector<8x256xf32>
    %c4 = arith.constant 4 : index
    %c0_137 = arith.constant 0 : index
    %c0_138 = arith.constant 0 : index
    %380 = vector.load %arg4[%c4, %c0_137, %c0_138] : memref<5x1x256xf32, #tpu.memory_space<vmem>>, vector<1x1x256xf32>
    %381 = vector.shape_cast %380 : vector<1x1x256xf32> to vector<1x256xf32>
    %382 = vector.broadcast %381 : vector<1x256xf32> to vector<8x256xf32>
    %383 = arith.addf %379, %382 : vector<8x256xf32>
    %384 = vector.extract_strided_slice %383 {offsets = [0, 0], sizes = [8, 192], strides = [1, 1]} : vector<8x256xf32> to vector<8x192xf32>
    %cst_139 = arith.constant 0.000000e+00 : f32
    %385 = vector.broadcast %cst_139 : f32 to vector<8x192xf32>
    %386 = arith.subf %385, %384 : vector<8x192xf32>
    %387 = math.exp %386 : vector<8x192xf32>
    %cst_140 = arith.constant 1.000000e+00 : f32
    %388 = vector.broadcast %cst_140 : f32 to vector<8x192xf32>
    %389 = arith.addf %388, %387 : vector<8x192xf32>
    %cst_141 = arith.constant 1.000000e+00 : f32
    %390 = vector.broadcast %cst_141 : f32 to vector<8x192xf32>
    %391 = arith.divf %390, %389 : vector<8x192xf32>
    %392 = vector.extract_strided_slice %383 {offsets = [0, 192], sizes = [8, 64], strides = [1, 1]} : vector<8x256xf32> to vector<8x64xf32>
    %393 = math.tanh %392 : vector<8x64xf32>
    %394 = vector.extract_strided_slice %391 {offsets = [0, 0], sizes = [8, 64], strides = [1, 1]} : vector<8x192xf32> to vector<8x64xf32>
    %395 = vector.extract_strided_slice %391 {offsets = [0, 64], sizes = [8, 64], strides = [1, 1]} : vector<8x192xf32> to vector<8x64xf32>
    %396 = vector.extract_strided_slice %391 {offsets = [0, 128], sizes = [8, 64], strides = [1, 1]} : vector<8x192xf32> to vector<8x64xf32>
    %397 = arith.mulf %395, %16 : vector<8x64xf32>
    %398 = arith.mulf %394, %393 : vector<8x64xf32>
    %399 = arith.addf %397, %398 : vector<8x64xf32>
    %400 = math.tanh %399 : vector<8x64xf32>
    %401 = arith.mulf %396, %400 : vector<8x64xf32>
    %402 = vector.extract_strided_slice %6 {offsets = [40, 0], sizes = [8, 256], strides = [1, 1]} : vector<64x256xf32> to vector<8x256xf32>
    %403 = arith.truncf %293 : vector<8x64xf32> to vector<8x64xbf16>
    %c0_142 = arith.constant 0 : index
    %c0_143 = arith.constant 0 : index
    %404 = vector.load %arg2[%c0_142, %c0_143] : memref<64x256xbf16, #tpu.memory_space<vmem>>, vector<64x256xbf16>
    %cst_144 = arith.constant dense<0.000000e+00> : vector<8x256xf32>
    %405 = tpu.matmul %403, %404, %cst_144 {dimension_numbers = #tpu.dot_dimension_numbers<[1], [0], [0], [1], [0, 0, 1, 1], [], []>} : vector<8x64xbf16>, vector<64x256xbf16>, vector<8x256xf32> -> vector<8x256xf32>
    %406 = arith.addf %402, %405 : vector<8x256xf32>
    %407 = vector.extract_strided_slice %406 {offsets = [0, 0], sizes = [8, 192], strides = [1, 1]} : vector<8x256xf32> to vector<8x192xf32>
    %cst_145 = arith.constant 0.000000e+00 : f32
    %408 = vector.broadcast %cst_145 : f32 to vector<8x192xf32>
    %409 = arith.subf %408, %407 : vector<8x192xf32>
    %410 = math.exp %409 : vector<8x192xf32>
    %cst_146 = arith.constant 1.000000e+00 : f32
    %411 = vector.broadcast %cst_146 : f32 to vector<8x192xf32>
    %412 = arith.addf %411, %410 : vector<8x192xf32>
    %cst_147 = arith.constant 1.000000e+00 : f32
    %413 = vector.broadcast %cst_147 : f32 to vector<8x192xf32>
    %414 = arith.divf %413, %412 : vector<8x192xf32>
    %415 = vector.extract_strided_slice %406 {offsets = [0, 192], sizes = [8, 64], strides = [1, 1]} : vector<8x256xf32> to vector<8x64xf32>
    %416 = math.tanh %415 : vector<8x64xf32>
    %417 = vector.extract_strided_slice %414 {offsets = [0, 0], sizes = [8, 64], strides = [1, 1]} : vector<8x192xf32> to vector<8x64xf32>
    %418 = vector.extract_strided_slice %414 {offsets = [0, 64], sizes = [8, 64], strides = [1, 1]} : vector<8x192xf32> to vector<8x64xf32>
    %419 = vector.extract_strided_slice %414 {offsets = [0, 128], sizes = [8, 64], strides = [1, 1]} : vector<8x192xf32> to vector<8x64xf32>
    %420 = arith.mulf %418, %291 : vector<8x64xf32>
    %421 = arith.mulf %417, %416 : vector<8x64xf32>
    %422 = arith.addf %420, %421 : vector<8x64xf32>
    %423 = math.tanh %422 : vector<8x64xf32>
    %424 = arith.mulf %419, %423 : vector<8x64xf32>
    %425 = tpu.concatenate %293, %320 in 1 : vector<8x64xf32>, vector<8x64xf32> -> vector<8x128xf32>
    %426 = arith.truncf %425 : vector<8x128xf32> to vector<8x128xbf16>
    %c0_148 = arith.constant 0 : index
    %c0_149 = arith.constant 0 : index
    %c0_150 = arith.constant 0 : index
    %427 = vector.load %arg3[%c0_148, %c0_149, %c0_150] : memref<4x128x256xbf16, #tpu.memory_space<vmem>>, vector<1x128x256xbf16>
    %428 = vector.shape_cast %427 : vector<1x128x256xbf16> to vector<128x256xbf16>
    %cst_151 = arith.constant dense<0.000000e+00> : vector<8x256xf32>
    %429 = tpu.matmul %426, %428, %cst_151 {dimension_numbers = #tpu.dot_dimension_numbers<[1], [0], [0], [1], [0, 0, 1, 1], [], []>} : vector<8x128xbf16>, vector<128x256xbf16>, vector<8x256xf32> -> vector<8x256xf32>
    %c1_152 = arith.constant 1 : index
    %c0_153 = arith.constant 0 : index
    %c0_154 = arith.constant 0 : index
    %430 = vector.load %arg4[%c1_152, %c0_153, %c0_154] : memref<5x1x256xf32, #tpu.memory_space<vmem>>, vector<1x1x256xf32>
    %431 = vector.shape_cast %430 : vector<1x1x256xf32> to vector<1x256xf32>
    %432 = vector.broadcast %431 : vector<1x256xf32> to vector<8x256xf32>
    %433 = arith.addf %429, %432 : vector<8x256xf32>
    %434 = vector.extract_strided_slice %433 {offsets = [0, 0], sizes = [8, 192], strides = [1, 1]} : vector<8x256xf32> to vector<8x192xf32>
    %cst_155 = arith.constant 0.000000e+00 : f32
    %435 = vector.broadcast %cst_155 : f32 to vector<8x192xf32>
    %436 = arith.subf %435, %434 : vector<8x192xf32>
    %437 = math.exp %436 : vector<8x192xf32>
    %cst_156 = arith.constant 1.000000e+00 : f32
    %438 = vector.broadcast %cst_156 : f32 to vector<8x192xf32>
    %439 = arith.addf %438, %437 : vector<8x192xf32>
    %cst_157 = arith.constant 1.000000e+00 : f32
    %440 = vector.broadcast %cst_157 : f32 to vector<8x192xf32>
    %441 = arith.divf %440, %439 : vector<8x192xf32>
    %442 = vector.extract_strided_slice %433 {offsets = [0, 192], sizes = [8, 64], strides = [1, 1]} : vector<8x256xf32> to vector<8x64xf32>
    %443 = math.tanh %442 : vector<8x64xf32>
    %444 = vector.extract_strided_slice %441 {offsets = [0, 0], sizes = [8, 64], strides = [1, 1]} : vector<8x192xf32> to vector<8x64xf32>
    %445 = vector.extract_strided_slice %441 {offsets = [0, 64], sizes = [8, 64], strides = [1, 1]} : vector<8x192xf32> to vector<8x64xf32>
    %446 = vector.extract_strided_slice %441 {offsets = [0, 128], sizes = [8, 64], strides = [1, 1]} : vector<8x192xf32> to vector<8x64xf32>
    %447 = arith.mulf %445, %318 : vector<8x64xf32>
    %448 = arith.mulf %444, %443 : vector<8x64xf32>
    %449 = arith.addf %447, %448 : vector<8x64xf32>
    %450 = math.tanh %449 : vector<8x64xf32>
    %451 = arith.mulf %446, %450 : vector<8x64xf32>
    %452 = tpu.concatenate %320, %347 in 1 : vector<8x64xf32>, vector<8x64xf32> -> vector<8x128xf32>
    %453 = arith.truncf %452 : vector<8x128xf32> to vector<8x128xbf16>
    %c1_158 = arith.constant 1 : index
    %c0_159 = arith.constant 0 : index
    %c0_160 = arith.constant 0 : index
    %454 = vector.load %arg3[%c1_158, %c0_159, %c0_160] : memref<4x128x256xbf16, #tpu.memory_space<vmem>>, vector<1x128x256xbf16>
    %455 = vector.shape_cast %454 : vector<1x128x256xbf16> to vector<128x256xbf16>
    %cst_161 = arith.constant dense<0.000000e+00> : vector<8x256xf32>
    %456 = tpu.matmul %453, %455, %cst_161 {dimension_numbers = #tpu.dot_dimension_numbers<[1], [0], [0], [1], [0, 0, 1, 1], [], []>} : vector<8x128xbf16>, vector<128x256xbf16>, vector<8x256xf32> -> vector<8x256xf32>
    %c2_162 = arith.constant 2 : index
    %c0_163 = arith.constant 0 : index
    %c0_164 = arith.constant 0 : index
    %457 = vector.load %arg4[%c2_162, %c0_163, %c0_164] : memref<5x1x256xf32, #tpu.memory_space<vmem>>, vector<1x1x256xf32>
    %458 = vector.shape_cast %457 : vector<1x1x256xf32> to vector<1x256xf32>
    %459 = vector.broadcast %458 : vector<1x256xf32> to vector<8x256xf32>
    %460 = arith.addf %456, %459 : vector<8x256xf32>
    %461 = vector.extract_strided_slice %460 {offsets = [0, 0], sizes = [8, 192], strides = [1, 1]} : vector<8x256xf32> to vector<8x192xf32>
    %cst_165 = arith.constant 0.000000e+00 : f32
    %462 = vector.broadcast %cst_165 : f32 to vector<8x192xf32>
    %463 = arith.subf %462, %461 : vector<8x192xf32>
    %464 = math.exp %463 : vector<8x192xf32>
    %cst_166 = arith.constant 1.000000e+00 : f32
    %465 = vector.broadcast %cst_166 : f32 to vector<8x192xf32>
    %466 = arith.addf %465, %464 : vector<8x192xf32>
    %cst_167 = arith.constant 1.000000e+00 : f32
    %467 = vector.broadcast %cst_167 : f32 to vector<8x192xf32>
    %468 = arith.divf %467, %466 : vector<8x192xf32>
    %469 = vector.extract_strided_slice %460 {offsets = [0, 192], sizes = [8, 64], strides = [1, 1]} : vector<8x256xf32> to vector<8x64xf32>
    %470 = math.tanh %469 : vector<8x64xf32>
    %471 = vector.extract_strided_slice %468 {offsets = [0, 0], sizes = [8, 64], strides = [1, 1]} : vector<8x192xf32> to vector<8x64xf32>
    %472 = vector.extract_strided_slice %468 {offsets = [0, 64], sizes = [8, 64], strides = [1, 1]} : vector<8x192xf32> to vector<8x64xf32>
    %473 = vector.extract_strided_slice %468 {offsets = [0, 128], sizes = [8, 64], strides = [1, 1]} : vector<8x192xf32> to vector<8x64xf32>
    %474 = arith.mulf %472, %345 : vector<8x64xf32>
    %475 = arith.mulf %471, %470 : vector<8x64xf32>
    %476 = arith.addf %474, %475 : vector<8x64xf32>
    %477 = math.tanh %476 : vector<8x64xf32>
    %478 = arith.mulf %473, %477 : vector<8x64xf32>
    %479 = tpu.concatenate %347, %374 in 1 : vector<8x64xf32>, vector<8x64xf32> -> vector<8x128xf32>
    %480 = arith.truncf %479 : vector<8x128xf32> to vector<8x128xbf16>
    %c2_168 = arith.constant 2 : index
    %c0_169 = arith.constant 0 : index
    %c0_170 = arith.constant 0 : index
    %481 = vector.load %arg3[%c2_168, %c0_169, %c0_170] : memref<4x128x256xbf16, #tpu.memory_space<vmem>>, vector<1x128x256xbf16>
    %482 = vector.shape_cast %481 : vector<1x128x256xbf16> to vector<128x256xbf16>
    %cst_171 = arith.constant dense<0.000000e+00> : vector<8x256xf32>
    %483 = tpu.matmul %480, %482, %cst_171 {dimension_numbers = #tpu.dot_dimension_numbers<[1], [0], [0], [1], [0, 0, 1, 1], [], []>} : vector<8x128xbf16>, vector<128x256xbf16>, vector<8x256xf32> -> vector<8x256xf32>
    %c3_172 = arith.constant 3 : index
    %c0_173 = arith.constant 0 : index
    %c0_174 = arith.constant 0 : index
    %484 = vector.load %arg4[%c3_172, %c0_173, %c0_174] : memref<5x1x256xf32, #tpu.memory_space<vmem>>, vector<1x1x256xf32>
    %485 = vector.shape_cast %484 : vector<1x1x256xf32> to vector<1x256xf32>
    %486 = vector.broadcast %485 : vector<1x256xf32> to vector<8x256xf32>
    %487 = arith.addf %483, %486 : vector<8x256xf32>
    %488 = vector.extract_strided_slice %487 {offsets = [0, 0], sizes = [8, 192], strides = [1, 1]} : vector<8x256xf32> to vector<8x192xf32>
    %cst_175 = arith.constant 0.000000e+00 : f32
    %489 = vector.broadcast %cst_175 : f32 to vector<8x192xf32>
    %490 = arith.subf %489, %488 : vector<8x192xf32>
    %491 = math.exp %490 : vector<8x192xf32>
    %cst_176 = arith.constant 1.000000e+00 : f32
    %492 = vector.broadcast %cst_176 : f32 to vector<8x192xf32>
    %493 = arith.addf %492, %491 : vector<8x192xf32>
    %cst_177 = arith.constant 1.000000e+00 : f32
    %494 = vector.broadcast %cst_177 : f32 to vector<8x192xf32>
    %495 = arith.divf %494, %493 : vector<8x192xf32>
    %496 = vector.extract_strided_slice %487 {offsets = [0, 192], sizes = [8, 64], strides = [1, 1]} : vector<8x256xf32> to vector<8x64xf32>
    %497 = math.tanh %496 : vector<8x64xf32>
    %498 = vector.extract_strided_slice %495 {offsets = [0, 0], sizes = [8, 64], strides = [1, 1]} : vector<8x192xf32> to vector<8x64xf32>
    %499 = vector.extract_strided_slice %495 {offsets = [0, 64], sizes = [8, 64], strides = [1, 1]} : vector<8x192xf32> to vector<8x64xf32>
    %500 = vector.extract_strided_slice %495 {offsets = [0, 128], sizes = [8, 64], strides = [1, 1]} : vector<8x192xf32> to vector<8x64xf32>
    %501 = arith.mulf %499, %372 : vector<8x64xf32>
    %502 = arith.mulf %498, %497 : vector<8x64xf32>
    %503 = arith.addf %501, %502 : vector<8x64xf32>
    %504 = math.tanh %503 : vector<8x64xf32>
    %505 = arith.mulf %500, %504 : vector<8x64xf32>
    %506 = tpu.concatenate %374, %401 in 1 : vector<8x64xf32>, vector<8x64xf32> -> vector<8x128xf32>
    %507 = arith.truncf %506 : vector<8x128xf32> to vector<8x128xbf16>
    %c3_178 = arith.constant 3 : index
    %c0_179 = arith.constant 0 : index
    %c0_180 = arith.constant 0 : index
    %508 = vector.load %arg3[%c3_178, %c0_179, %c0_180] : memref<4x128x256xbf16, #tpu.memory_space<vmem>>, vector<1x128x256xbf16>
    %509 = vector.shape_cast %508 : vector<1x128x256xbf16> to vector<128x256xbf16>
    %cst_181 = arith.constant dense<0.000000e+00> : vector<8x256xf32>
    %510 = tpu.matmul %507, %509, %cst_181 {dimension_numbers = #tpu.dot_dimension_numbers<[1], [0], [0], [1], [0, 0, 1, 1], [], []>} : vector<8x128xbf16>, vector<128x256xbf16>, vector<8x256xf32> -> vector<8x256xf32>
    %c4_182 = arith.constant 4 : index
    %c0_183 = arith.constant 0 : index
    %c0_184 = arith.constant 0 : index
    %511 = vector.load %arg4[%c4_182, %c0_183, %c0_184] : memref<5x1x256xf32, #tpu.memory_space<vmem>>, vector<1x1x256xf32>
    %512 = vector.shape_cast %511 : vector<1x1x256xf32> to vector<1x256xf32>
    %513 = vector.broadcast %512 : vector<1x256xf32> to vector<8x256xf32>
    %514 = arith.addf %510, %513 : vector<8x256xf32>
    %515 = vector.extract_strided_slice %514 {offsets = [0, 0], sizes = [8, 192], strides = [1, 1]} : vector<8x256xf32> to vector<8x192xf32>
    %cst_185 = arith.constant 0.000000e+00 : f32
    %516 = vector.broadcast %cst_185 : f32 to vector<8x192xf32>
    %517 = arith.subf %516, %515 : vector<8x192xf32>
    %518 = math.exp %517 : vector<8x192xf32>
    %cst_186 = arith.constant 1.000000e+00 : f32
    %519 = vector.broadcast %cst_186 : f32 to vector<8x192xf32>
    %520 = arith.addf %519, %518 : vector<8x192xf32>
    %cst_187 = arith.constant 1.000000e+00 : f32
    %521 = vector.broadcast %cst_187 : f32 to vector<8x192xf32>
    %522 = arith.divf %521, %520 : vector<8x192xf32>
    %523 = vector.extract_strided_slice %514 {offsets = [0, 192], sizes = [8, 64], strides = [1, 1]} : vector<8x256xf32> to vector<8x64xf32>
    %524 = math.tanh %523 : vector<8x64xf32>
    %525 = vector.extract_strided_slice %522 {offsets = [0, 0], sizes = [8, 64], strides = [1, 1]} : vector<8x192xf32> to vector<8x64xf32>
    %526 = vector.extract_strided_slice %522 {offsets = [0, 64], sizes = [8, 64], strides = [1, 1]} : vector<8x192xf32> to vector<8x64xf32>
    %527 = vector.extract_strided_slice %522 {offsets = [0, 128], sizes = [8, 64], strides = [1, 1]} : vector<8x192xf32> to vector<8x64xf32>
    %528 = arith.mulf %526, %399 : vector<8x64xf32>
    %529 = arith.mulf %525, %524 : vector<8x64xf32>
    %530 = arith.addf %528, %529 : vector<8x64xf32>
    %531 = math.tanh %530 : vector<8x64xf32>
    %532 = arith.mulf %527, %531 : vector<8x64xf32>
    %533 = vector.extract_strided_slice %6 {offsets = [48, 0], sizes = [8, 256], strides = [1, 1]} : vector<64x256xf32> to vector<8x256xf32>
    %534 = arith.truncf %424 : vector<8x64xf32> to vector<8x64xbf16>
    %c0_188 = arith.constant 0 : index
    %c0_189 = arith.constant 0 : index
    %535 = vector.load %arg2[%c0_188, %c0_189] : memref<64x256xbf16, #tpu.memory_space<vmem>>, vector<64x256xbf16>
    %cst_190 = arith.constant dense<0.000000e+00> : vector<8x256xf32>
    %536 = tpu.matmul %534, %535, %cst_190 {dimension_numbers = #tpu.dot_dimension_numbers<[1], [0], [0], [1], [0, 0, 1, 1], [], []>} : vector<8x64xbf16>, vector<64x256xbf16>, vector<8x256xf32> -> vector<8x256xf32>
    %537 = arith.addf %533, %536 : vector<8x256xf32>
    %538 = vector.extract_strided_slice %537 {offsets = [0, 0], sizes = [8, 192], strides = [1, 1]} : vector<8x256xf32> to vector<8x192xf32>
    %cst_191 = arith.constant 0.000000e+00 : f32
    %539 = vector.broadcast %cst_191 : f32 to vector<8x192xf32>
    %540 = arith.subf %539, %538 : vector<8x192xf32>
    %541 = math.exp %540 : vector<8x192xf32>
    %cst_192 = arith.constant 1.000000e+00 : f32
    %542 = vector.broadcast %cst_192 : f32 to vector<8x192xf32>
    %543 = arith.addf %542, %541 : vector<8x192xf32>
    %cst_193 = arith.constant 1.000000e+00 : f32
    %544 = vector.broadcast %cst_193 : f32 to vector<8x192xf32>
    %545 = arith.divf %544, %543 : vector<8x192xf32>
    %546 = vector.extract_strided_slice %537 {offsets = [0, 192], sizes = [8, 64], strides = [1, 1]} : vector<8x256xf32> to vector<8x64xf32>
    %547 = math.tanh %546 : vector<8x64xf32>
    %548 = vector.extract_strided_slice %545 {offsets = [0, 0], sizes = [8, 64], strides = [1, 1]} : vector<8x192xf32> to vector<8x64xf32>
    %549 = vector.extract_strided_slice %545 {offsets = [0, 64], sizes = [8, 64], strides = [1, 1]} : vector<8x192xf32> to vector<8x64xf32>
    %550 = vector.extract_strided_slice %545 {offsets = [0, 128], sizes = [8, 64], strides = [1, 1]} : vector<8x192xf32> to vector<8x64xf32>
    %551 = arith.mulf %549, %422 : vector<8x64xf32>
    %552 = arith.mulf %548, %547 : vector<8x64xf32>
    %553 = arith.addf %551, %552 : vector<8x64xf32>
    %554 = math.tanh %553 : vector<8x64xf32>
    %555 = arith.mulf %550, %554 : vector<8x64xf32>
    %556 = tpu.concatenate %424, %451 in 1 : vector<8x64xf32>, vector<8x64xf32> -> vector<8x128xf32>
    %557 = arith.truncf %556 : vector<8x128xf32> to vector<8x128xbf16>
    %c0_194 = arith.constant 0 : index
    %c0_195 = arith.constant 0 : index
    %c0_196 = arith.constant 0 : index
    %558 = vector.load %arg3[%c0_194, %c0_195, %c0_196] : memref<4x128x256xbf16, #tpu.memory_space<vmem>>, vector<1x128x256xbf16>
    %559 = vector.shape_cast %558 : vector<1x128x256xbf16> to vector<128x256xbf16>
    %cst_197 = arith.constant dense<0.000000e+00> : vector<8x256xf32>
    %560 = tpu.matmul %557, %559, %cst_197 {dimension_numbers = #tpu.dot_dimension_numbers<[1], [0], [0], [1], [0, 0, 1, 1], [], []>} : vector<8x128xbf16>, vector<128x256xbf16>, vector<8x256xf32> -> vector<8x256xf32>
    %c1_198 = arith.constant 1 : index
    %c0_199 = arith.constant 0 : index
    %c0_200 = arith.constant 0 : index
    %561 = vector.load %arg4[%c1_198, %c0_199, %c0_200] : memref<5x1x256xf32, #tpu.memory_space<vmem>>, vector<1x1x256xf32>
    %562 = vector.shape_cast %561 : vector<1x1x256xf32> to vector<1x256xf32>
    %563 = vector.broadcast %562 : vector<1x256xf32> to vector<8x256xf32>
    %564 = arith.addf %560, %563 : vector<8x256xf32>
    %565 = vector.extract_strided_slice %564 {offsets = [0, 0], sizes = [8, 192], strides = [1, 1]} : vector<8x256xf32> to vector<8x192xf32>
    %cst_201 = arith.constant 0.000000e+00 : f32
    %566 = vector.broadcast %cst_201 : f32 to vector<8x192xf32>
    %567 = arith.subf %566, %565 : vector<8x192xf32>
    %568 = math.exp %567 : vector<8x192xf32>
    %cst_202 = arith.constant 1.000000e+00 : f32
    %569 = vector.broadcast %cst_202 : f32 to vector<8x192xf32>
    %570 = arith.addf %569, %568 : vector<8x192xf32>
    %cst_203 = arith.constant 1.000000e+00 : f32
    %571 = vector.broadcast %cst_203 : f32 to vector<8x192xf32>
    %572 = arith.divf %571, %570 : vector<8x192xf32>
    %573 = vector.extract_strided_slice %564 {offsets = [0, 192], sizes = [8, 64], strides = [1, 1]} : vector<8x256xf32> to vector<8x64xf32>
    %574 = math.tanh %573 : vector<8x64xf32>
    %575 = vector.extract_strided_slice %572 {offsets = [0, 0], sizes = [8, 64], strides = [1, 1]} : vector<8x192xf32> to vector<8x64xf32>
    %576 = vector.extract_strided_slice %572 {offsets = [0, 64], sizes = [8, 64], strides = [1, 1]} : vector<8x192xf32> to vector<8x64xf32>
    %577 = vector.extract_strided_slice %572 {offsets = [0, 128], sizes = [8, 64], strides = [1, 1]} : vector<8x192xf32> to vector<8x64xf32>
    %578 = arith.mulf %576, %449 : vector<8x64xf32>
    %579 = arith.mulf %575, %574 : vector<8x64xf32>
    %580 = arith.addf %578, %579 : vector<8x64xf32>
    %581 = math.tanh %580 : vector<8x64xf32>
    %582 = arith.mulf %577, %581 : vector<8x64xf32>
    %583 = tpu.concatenate %451, %478 in 1 : vector<8x64xf32>, vector<8x64xf32> -> vector<8x128xf32>
    %584 = arith.truncf %583 : vector<8x128xf32> to vector<8x128xbf16>
    %c1_204 = arith.constant 1 : index
    %c0_205 = arith.constant 0 : index
    %c0_206 = arith.constant 0 : index
    %585 = vector.load %arg3[%c1_204, %c0_205, %c0_206] : memref<4x128x256xbf16, #tpu.memory_space<vmem>>, vector<1x128x256xbf16>
    %586 = vector.shape_cast %585 : vector<1x128x256xbf16> to vector<128x256xbf16>
    %cst_207 = arith.constant dense<0.000000e+00> : vector<8x256xf32>
    %587 = tpu.matmul %584, %586, %cst_207 {dimension_numbers = #tpu.dot_dimension_numbers<[1], [0], [0], [1], [0, 0, 1, 1], [], []>} : vector<8x128xbf16>, vector<128x256xbf16>, vector<8x256xf32> -> vector<8x256xf32>
    %c2_208 = arith.constant 2 : index
    %c0_209 = arith.constant 0 : index
    %c0_210 = arith.constant 0 : index
    %588 = vector.load %arg4[%c2_208, %c0_209, %c0_210] : memref<5x1x256xf32, #tpu.memory_space<vmem>>, vector<1x1x256xf32>
    %589 = vector.shape_cast %588 : vector<1x1x256xf32> to vector<1x256xf32>
    %590 = vector.broadcast %589 : vector<1x256xf32> to vector<8x256xf32>
    %591 = arith.addf %587, %590 : vector<8x256xf32>
    %592 = vector.extract_strided_slice %591 {offsets = [0, 0], sizes = [8, 192], strides = [1, 1]} : vector<8x256xf32> to vector<8x192xf32>
    %cst_211 = arith.constant 0.000000e+00 : f32
    %593 = vector.broadcast %cst_211 : f32 to vector<8x192xf32>
    %594 = arith.subf %593, %592 : vector<8x192xf32>
    %595 = math.exp %594 : vector<8x192xf32>
    %cst_212 = arith.constant 1.000000e+00 : f32
    %596 = vector.broadcast %cst_212 : f32 to vector<8x192xf32>
    %597 = arith.addf %596, %595 : vector<8x192xf32>
    %cst_213 = arith.constant 1.000000e+00 : f32
    %598 = vector.broadcast %cst_213 : f32 to vector<8x192xf32>
    %599 = arith.divf %598, %597 : vector<8x192xf32>
    %600 = vector.extract_strided_slice %591 {offsets = [0, 192], sizes = [8, 64], strides = [1, 1]} : vector<8x256xf32> to vector<8x64xf32>
    %601 = math.tanh %600 : vector<8x64xf32>
    %602 = vector.extract_strided_slice %599 {offsets = [0, 0], sizes = [8, 64], strides = [1, 1]} : vector<8x192xf32> to vector<8x64xf32>
    %603 = vector.extract_strided_slice %599 {offsets = [0, 64], sizes = [8, 64], strides = [1, 1]} : vector<8x192xf32> to vector<8x64xf32>
    %604 = vector.extract_strided_slice %599 {offsets = [0, 128], sizes = [8, 64], strides = [1, 1]} : vector<8x192xf32> to vector<8x64xf32>
    %605 = arith.mulf %603, %476 : vector<8x64xf32>
    %606 = arith.mulf %602, %601 : vector<8x64xf32>
    %607 = arith.addf %605, %606 : vector<8x64xf32>
    %608 = math.tanh %607 : vector<8x64xf32>
    %609 = arith.mulf %604, %608 : vector<8x64xf32>
    %610 = tpu.concatenate %478, %505 in 1 : vector<8x64xf32>, vector<8x64xf32> -> vector<8x128xf32>
    %611 = arith.truncf %610 : vector<8x128xf32> to vector<8x128xbf16>
    %c2_214 = arith.constant 2 : index
    %c0_215 = arith.constant 0 : index
    %c0_216 = arith.constant 0 : index
    %612 = vector.load %arg3[%c2_214, %c0_215, %c0_216] : memref<4x128x256xbf16, #tpu.memory_space<vmem>>, vector<1x128x256xbf16>
    %613 = vector.shape_cast %612 : vector<1x128x256xbf16> to vector<128x256xbf16>
    %cst_217 = arith.constant dense<0.000000e+00> : vector<8x256xf32>
    %614 = tpu.matmul %611, %613, %cst_217 {dimension_numbers = #tpu.dot_dimension_numbers<[1], [0], [0], [1], [0, 0, 1, 1], [], []>} : vector<8x128xbf16>, vector<128x256xbf16>, vector<8x256xf32> -> vector<8x256xf32>
    %c3_218 = arith.constant 3 : index
    %c0_219 = arith.constant 0 : index
    %c0_220 = arith.constant 0 : index
    %615 = vector.load %arg4[%c3_218, %c0_219, %c0_220] : memref<5x1x256xf32, #tpu.memory_space<vmem>>, vector<1x1x256xf32>
    %616 = vector.shape_cast %615 : vector<1x1x256xf32> to vector<1x256xf32>
    %617 = vector.broadcast %616 : vector<1x256xf32> to vector<8x256xf32>
    %618 = arith.addf %614, %617 : vector<8x256xf32>
    %619 = vector.extract_strided_slice %618 {offsets = [0, 0], sizes = [8, 192], strides = [1, 1]} : vector<8x256xf32> to vector<8x192xf32>
    %cst_221 = arith.constant 0.000000e+00 : f32
    %620 = vector.broadcast %cst_221 : f32 to vector<8x192xf32>
    %621 = arith.subf %620, %619 : vector<8x192xf32>
    %622 = math.exp %621 : vector<8x192xf32>
    %cst_222 = arith.constant 1.000000e+00 : f32
    %623 = vector.broadcast %cst_222 : f32 to vector<8x192xf32>
    %624 = arith.addf %623, %622 : vector<8x192xf32>
    %cst_223 = arith.constant 1.000000e+00 : f32
    %625 = vector.broadcast %cst_223 : f32 to vector<8x192xf32>
    %626 = arith.divf %625, %624 : vector<8x192xf32>
    %627 = vector.extract_strided_slice %618 {offsets = [0, 192], sizes = [8, 64], strides = [1, 1]} : vector<8x256xf32> to vector<8x64xf32>
    %628 = math.tanh %627 : vector<8x64xf32>
    %629 = vector.extract_strided_slice %626 {offsets = [0, 0], sizes = [8, 64], strides = [1, 1]} : vector<8x192xf32> to vector<8x64xf32>
    %630 = vector.extract_strided_slice %626 {offsets = [0, 64], sizes = [8, 64], strides = [1, 1]} : vector<8x192xf32> to vector<8x64xf32>
    %631 = vector.extract_strided_slice %626 {offsets = [0, 128], sizes = [8, 64], strides = [1, 1]} : vector<8x192xf32> to vector<8x64xf32>
    %632 = arith.mulf %630, %503 : vector<8x64xf32>
    %633 = arith.mulf %629, %628 : vector<8x64xf32>
    %634 = arith.addf %632, %633 : vector<8x64xf32>
    %635 = math.tanh %634 : vector<8x64xf32>
    %636 = arith.mulf %631, %635 : vector<8x64xf32>
    %637 = tpu.concatenate %505, %532 in 1 : vector<8x64xf32>, vector<8x64xf32> -> vector<8x128xf32>
    %638 = arith.truncf %637 : vector<8x128xf32> to vector<8x128xbf16>
    %c3_224 = arith.constant 3 : index
    %c0_225 = arith.constant 0 : index
    %c0_226 = arith.constant 0 : index
    %639 = vector.load %arg3[%c3_224, %c0_225, %c0_226] : memref<4x128x256xbf16, #tpu.memory_space<vmem>>, vector<1x128x256xbf16>
    %640 = vector.shape_cast %639 : vector<1x128x256xbf16> to vector<128x256xbf16>
    %cst_227 = arith.constant dense<0.000000e+00> : vector<8x256xf32>
    %641 = tpu.matmul %638, %640, %cst_227 {dimension_numbers = #tpu.dot_dimension_numbers<[1], [0], [0], [1], [0, 0, 1, 1], [], []>} : vector<8x128xbf16>, vector<128x256xbf16>, vector<8x256xf32> -> vector<8x256xf32>
    %c4_228 = arith.constant 4 : index
    %c0_229 = arith.constant 0 : index
    %c0_230 = arith.constant 0 : index
    %642 = vector.load %arg4[%c4_228, %c0_229, %c0_230] : memref<5x1x256xf32, #tpu.memory_space<vmem>>, vector<1x1x256xf32>
    %643 = vector.shape_cast %642 : vector<1x1x256xf32> to vector<1x256xf32>
    %644 = vector.broadcast %643 : vector<1x256xf32> to vector<8x256xf32>
    %645 = arith.addf %641, %644 : vector<8x256xf32>
    %646 = vector.extract_strided_slice %645 {offsets = [0, 0], sizes = [8, 192], strides = [1, 1]} : vector<8x256xf32> to vector<8x192xf32>
    %cst_231 = arith.constant 0.000000e+00 : f32
    %647 = vector.broadcast %cst_231 : f32 to vector<8x192xf32>
    %648 = arith.subf %647, %646 : vector<8x192xf32>
    %649 = math.exp %648 : vector<8x192xf32>
    %cst_232 = arith.constant 1.000000e+00 : f32
    %650 = vector.broadcast %cst_232 : f32 to vector<8x192xf32>
    %651 = arith.addf %650, %649 : vector<8x192xf32>
    %cst_233 = arith.constant 1.000000e+00 : f32
    %652 = vector.broadcast %cst_233 : f32 to vector<8x192xf32>
    %653 = arith.divf %652, %651 : vector<8x192xf32>
    %654 = vector.extract_strided_slice %645 {offsets = [0, 192], sizes = [8, 64], strides = [1, 1]} : vector<8x256xf32> to vector<8x64xf32>
    %655 = math.tanh %654 : vector<8x64xf32>
    %656 = vector.extract_strided_slice %653 {offsets = [0, 0], sizes = [8, 64], strides = [1, 1]} : vector<8x192xf32> to vector<8x64xf32>
    %657 = vector.extract_strided_slice %653 {offsets = [0, 64], sizes = [8, 64], strides = [1, 1]} : vector<8x192xf32> to vector<8x64xf32>
    %658 = vector.extract_strided_slice %653 {offsets = [0, 128], sizes = [8, 64], strides = [1, 1]} : vector<8x192xf32> to vector<8x64xf32>
    %659 = arith.mulf %657, %530 : vector<8x64xf32>
    %660 = arith.mulf %656, %655 : vector<8x64xf32>
    %661 = arith.addf %659, %660 : vector<8x64xf32>
    %662 = math.tanh %661 : vector<8x64xf32>
    %663 = arith.mulf %658, %662 : vector<8x64xf32>
    %664 = vector.extract_strided_slice %6 {offsets = [56, 0], sizes = [8, 256], strides = [1, 1]} : vector<64x256xf32> to vector<8x256xf32>
    %665 = arith.truncf %555 : vector<8x64xf32> to vector<8x64xbf16>
    %c0_234 = arith.constant 0 : index
    %c0_235 = arith.constant 0 : index
    %666 = vector.load %arg2[%c0_234, %c0_235] : memref<64x256xbf16, #tpu.memory_space<vmem>>, vector<64x256xbf16>
    %cst_236 = arith.constant dense<0.000000e+00> : vector<8x256xf32>
    %667 = tpu.matmul %665, %666, %cst_236 {dimension_numbers = #tpu.dot_dimension_numbers<[1], [0], [0], [1], [0, 0, 1, 1], [], []>} : vector<8x64xbf16>, vector<64x256xbf16>, vector<8x256xf32> -> vector<8x256xf32>
    %668 = arith.addf %664, %667 : vector<8x256xf32>
    %669 = vector.extract_strided_slice %668 {offsets = [0, 0], sizes = [8, 192], strides = [1, 1]} : vector<8x256xf32> to vector<8x192xf32>
    %cst_237 = arith.constant 0.000000e+00 : f32
    %670 = vector.broadcast %cst_237 : f32 to vector<8x192xf32>
    %671 = arith.subf %670, %669 : vector<8x192xf32>
    %672 = math.exp %671 : vector<8x192xf32>
    %cst_238 = arith.constant 1.000000e+00 : f32
    %673 = vector.broadcast %cst_238 : f32 to vector<8x192xf32>
    %674 = arith.addf %673, %672 : vector<8x192xf32>
    %cst_239 = arith.constant 1.000000e+00 : f32
    %675 = vector.broadcast %cst_239 : f32 to vector<8x192xf32>
    %676 = arith.divf %675, %674 : vector<8x192xf32>
    %677 = vector.extract_strided_slice %668 {offsets = [0, 192], sizes = [8, 64], strides = [1, 1]} : vector<8x256xf32> to vector<8x64xf32>
    %678 = math.tanh %677 : vector<8x64xf32>
    %679 = vector.extract_strided_slice %676 {offsets = [0, 0], sizes = [8, 64], strides = [1, 1]} : vector<8x192xf32> to vector<8x64xf32>
    %680 = vector.extract_strided_slice %676 {offsets = [0, 64], sizes = [8, 64], strides = [1, 1]} : vector<8x192xf32> to vector<8x64xf32>
    %681 = vector.extract_strided_slice %676 {offsets = [0, 128], sizes = [8, 64], strides = [1, 1]} : vector<8x192xf32> to vector<8x64xf32>
    %682 = arith.mulf %680, %553 : vector<8x64xf32>
    %683 = arith.mulf %679, %678 : vector<8x64xf32>
    %684 = arith.addf %682, %683 : vector<8x64xf32>
    %685 = math.tanh %684 : vector<8x64xf32>
    %686 = arith.mulf %681, %685 : vector<8x64xf32>
    %687 = tpu.concatenate %555, %582 in 1 : vector<8x64xf32>, vector<8x64xf32> -> vector<8x128xf32>
    %688 = arith.truncf %687 : vector<8x128xf32> to vector<8x128xbf16>
    %c0_240 = arith.constant 0 : index
    %c0_241 = arith.constant 0 : index
    %c0_242 = arith.constant 0 : index
    %689 = vector.load %arg3[%c0_240, %c0_241, %c0_242] : memref<4x128x256xbf16, #tpu.memory_space<vmem>>, vector<1x128x256xbf16>
    %690 = vector.shape_cast %689 : vector<1x128x256xbf16> to vector<128x256xbf16>
    %cst_243 = arith.constant dense<0.000000e+00> : vector<8x256xf32>
    %691 = tpu.matmul %688, %690, %cst_243 {dimension_numbers = #tpu.dot_dimension_numbers<[1], [0], [0], [1], [0, 0, 1, 1], [], []>} : vector<8x128xbf16>, vector<128x256xbf16>, vector<8x256xf32> -> vector<8x256xf32>
    %c1_244 = arith.constant 1 : index
    %c0_245 = arith.constant 0 : index
    %c0_246 = arith.constant 0 : index
    %692 = vector.load %arg4[%c1_244, %c0_245, %c0_246] : memref<5x1x256xf32, #tpu.memory_space<vmem>>, vector<1x1x256xf32>
    %693 = vector.shape_cast %692 : vector<1x1x256xf32> to vector<1x256xf32>
    %694 = vector.broadcast %693 : vector<1x256xf32> to vector<8x256xf32>
    %695 = arith.addf %691, %694 : vector<8x256xf32>
    %696 = vector.extract_strided_slice %695 {offsets = [0, 0], sizes = [8, 192], strides = [1, 1]} : vector<8x256xf32> to vector<8x192xf32>
    %cst_247 = arith.constant 0.000000e+00 : f32
    %697 = vector.broadcast %cst_247 : f32 to vector<8x192xf32>
    %698 = arith.subf %697, %696 : vector<8x192xf32>
    %699 = math.exp %698 : vector<8x192xf32>
    %cst_248 = arith.constant 1.000000e+00 : f32
    %700 = vector.broadcast %cst_248 : f32 to vector<8x192xf32>
    %701 = arith.addf %700, %699 : vector<8x192xf32>
    %cst_249 = arith.constant 1.000000e+00 : f32
    %702 = vector.broadcast %cst_249 : f32 to vector<8x192xf32>
    %703 = arith.divf %702, %701 : vector<8x192xf32>
    %704 = vector.extract_strided_slice %695 {offsets = [0, 192], sizes = [8, 64], strides = [1, 1]} : vector<8x256xf32> to vector<8x64xf32>
    %705 = math.tanh %704 : vector<8x64xf32>
    %706 = vector.extract_strided_slice %703 {offsets = [0, 0], sizes = [8, 64], strides = [1, 1]} : vector<8x192xf32> to vector<8x64xf32>
    %707 = vector.extract_strided_slice %703 {offsets = [0, 64], sizes = [8, 64], strides = [1, 1]} : vector<8x192xf32> to vector<8x64xf32>
    %708 = vector.extract_strided_slice %703 {offsets = [0, 128], sizes = [8, 64], strides = [1, 1]} : vector<8x192xf32> to vector<8x64xf32>
    %709 = arith.mulf %707, %580 : vector<8x64xf32>
    %710 = arith.mulf %706, %705 : vector<8x64xf32>
    %711 = arith.addf %709, %710 : vector<8x64xf32>
    %712 = math.tanh %711 : vector<8x64xf32>
    %713 = arith.mulf %708, %712 : vector<8x64xf32>
    %714 = tpu.concatenate %582, %609 in 1 : vector<8x64xf32>, vector<8x64xf32> -> vector<8x128xf32>
    %715 = arith.truncf %714 : vector<8x128xf32> to vector<8x128xbf16>
    %c1_250 = arith.constant 1 : index
    %c0_251 = arith.constant 0 : index
    %c0_252 = arith.constant 0 : index
    %716 = vector.load %arg3[%c1_250, %c0_251, %c0_252] : memref<4x128x256xbf16, #tpu.memory_space<vmem>>, vector<1x128x256xbf16>
    %717 = vector.shape_cast %716 : vector<1x128x256xbf16> to vector<128x256xbf16>
    %cst_253 = arith.constant dense<0.000000e+00> : vector<8x256xf32>
    %718 = tpu.matmul %715, %717, %cst_253 {dimension_numbers = #tpu.dot_dimension_numbers<[1], [0], [0], [1], [0, 0, 1, 1], [], []>} : vector<8x128xbf16>, vector<128x256xbf16>, vector<8x256xf32> -> vector<8x256xf32>
    %c2_254 = arith.constant 2 : index
    %c0_255 = arith.constant 0 : index
    %c0_256 = arith.constant 0 : index
    %719 = vector.load %arg4[%c2_254, %c0_255, %c0_256] : memref<5x1x256xf32, #tpu.memory_space<vmem>>, vector<1x1x256xf32>
    %720 = vector.shape_cast %719 : vector<1x1x256xf32> to vector<1x256xf32>
    %721 = vector.broadcast %720 : vector<1x256xf32> to vector<8x256xf32>
    %722 = arith.addf %718, %721 : vector<8x256xf32>
    %723 = vector.extract_strided_slice %722 {offsets = [0, 0], sizes = [8, 192], strides = [1, 1]} : vector<8x256xf32> to vector<8x192xf32>
    %cst_257 = arith.constant 0.000000e+00 : f32
    %724 = vector.broadcast %cst_257 : f32 to vector<8x192xf32>
    %725 = arith.subf %724, %723 : vector<8x192xf32>
    %726 = math.exp %725 : vector<8x192xf32>
    %cst_258 = arith.constant 1.000000e+00 : f32
    %727 = vector.broadcast %cst_258 : f32 to vector<8x192xf32>
    %728 = arith.addf %727, %726 : vector<8x192xf32>
    %cst_259 = arith.constant 1.000000e+00 : f32
    %729 = vector.broadcast %cst_259 : f32 to vector<8x192xf32>
    %730 = arith.divf %729, %728 : vector<8x192xf32>
    %731 = vector.extract_strided_slice %722 {offsets = [0, 192], sizes = [8, 64], strides = [1, 1]} : vector<8x256xf32> to vector<8x64xf32>
    %732 = math.tanh %731 : vector<8x64xf32>
    %733 = vector.extract_strided_slice %730 {offsets = [0, 0], sizes = [8, 64], strides = [1, 1]} : vector<8x192xf32> to vector<8x64xf32>
    %734 = vector.extract_strided_slice %730 {offsets = [0, 64], sizes = [8, 64], strides = [1, 1]} : vector<8x192xf32> to vector<8x64xf32>
    %735 = vector.extract_strided_slice %730 {offsets = [0, 128], sizes = [8, 64], strides = [1, 1]} : vector<8x192xf32> to vector<8x64xf32>
    %736 = arith.mulf %734, %607 : vector<8x64xf32>
    %737 = arith.mulf %733, %732 : vector<8x64xf32>
    %738 = arith.addf %736, %737 : vector<8x64xf32>
    %739 = math.tanh %738 : vector<8x64xf32>
    %740 = arith.mulf %735, %739 : vector<8x64xf32>
    %741 = tpu.concatenate %609, %636 in 1 : vector<8x64xf32>, vector<8x64xf32> -> vector<8x128xf32>
    %742 = arith.truncf %741 : vector<8x128xf32> to vector<8x128xbf16>
    %c2_260 = arith.constant 2 : index
    %c0_261 = arith.constant 0 : index
    %c0_262 = arith.constant 0 : index
    %743 = vector.load %arg3[%c2_260, %c0_261, %c0_262] : memref<4x128x256xbf16, #tpu.memory_space<vmem>>, vector<1x128x256xbf16>
    %744 = vector.shape_cast %743 : vector<1x128x256xbf16> to vector<128x256xbf16>
    %cst_263 = arith.constant dense<0.000000e+00> : vector<8x256xf32>
    %745 = tpu.matmul %742, %744, %cst_263 {dimension_numbers = #tpu.dot_dimension_numbers<[1], [0], [0], [1], [0, 0, 1, 1], [], []>} : vector<8x128xbf16>, vector<128x256xbf16>, vector<8x256xf32> -> vector<8x256xf32>
    %c3_264 = arith.constant 3 : index
    %c0_265 = arith.constant 0 : index
    %c0_266 = arith.constant 0 : index
    %746 = vector.load %arg4[%c3_264, %c0_265, %c0_266] : memref<5x1x256xf32, #tpu.memory_space<vmem>>, vector<1x1x256xf32>
    %747 = vector.shape_cast %746 : vector<1x1x256xf32> to vector<1x256xf32>
    %748 = vector.broadcast %747 : vector<1x256xf32> to vector<8x256xf32>
    %749 = arith.addf %745, %748 : vector<8x256xf32>
    %750 = vector.extract_strided_slice %749 {offsets = [0, 0], sizes = [8, 192], strides = [1, 1]} : vector<8x256xf32> to vector<8x192xf32>
    %cst_267 = arith.constant 0.000000e+00 : f32
    %751 = vector.broadcast %cst_267 : f32 to vector<8x192xf32>
    %752 = arith.subf %751, %750 : vector<8x192xf32>
    %753 = math.exp %752 : vector<8x192xf32>
    %cst_268 = arith.constant 1.000000e+00 : f32
    %754 = vector.broadcast %cst_268 : f32 to vector<8x192xf32>
    %755 = arith.addf %754, %753 : vector<8x192xf32>
    %cst_269 = arith.constant 1.000000e+00 : f32
    %756 = vector.broadcast %cst_269 : f32 to vector<8x192xf32>
    %757 = arith.divf %756, %755 : vector<8x192xf32>
    %758 = vector.extract_strided_slice %749 {offsets = [0, 192], sizes = [8, 64], strides = [1, 1]} : vector<8x256xf32> to vector<8x64xf32>
    %759 = math.tanh %758 : vector<8x64xf32>
    %760 = vector.extract_strided_slice %757 {offsets = [0, 0], sizes = [8, 64], strides = [1, 1]} : vector<8x192xf32> to vector<8x64xf32>
    %761 = vector.extract_strided_slice %757 {offsets = [0, 64], sizes = [8, 64], strides = [1, 1]} : vector<8x192xf32> to vector<8x64xf32>
    %762 = vector.extract_strided_slice %757 {offsets = [0, 128], sizes = [8, 64], strides = [1, 1]} : vector<8x192xf32> to vector<8x64xf32>
    %763 = arith.mulf %761, %634 : vector<8x64xf32>
    %764 = arith.mulf %760, %759 : vector<8x64xf32>
    %765 = arith.addf %763, %764 : vector<8x64xf32>
    %766 = math.tanh %765 : vector<8x64xf32>
    %767 = arith.mulf %762, %766 : vector<8x64xf32>
    %768 = tpu.concatenate %636, %663 in 1 : vector<8x64xf32>, vector<8x64xf32> -> vector<8x128xf32>
    %769 = arith.truncf %768 : vector<8x128xf32> to vector<8x128xbf16>
    %c3_270 = arith.constant 3 : index
    %c0_271 = arith.constant 0 : index
    %c0_272 = arith.constant 0 : index
    %770 = vector.load %arg3[%c3_270, %c0_271, %c0_272] : memref<4x128x256xbf16, #tpu.memory_space<vmem>>, vector<1x128x256xbf16>
    %771 = vector.shape_cast %770 : vector<1x128x256xbf16> to vector<128x256xbf16>
    %cst_273 = arith.constant dense<0.000000e+00> : vector<8x256xf32>
    %772 = tpu.matmul %769, %771, %cst_273 {dimension_numbers = #tpu.dot_dimension_numbers<[1], [0], [0], [1], [0, 0, 1, 1], [], []>} : vector<8x128xbf16>, vector<128x256xbf16>, vector<8x256xf32> -> vector<8x256xf32>
    %c4_274 = arith.constant 4 : index
    %c0_275 = arith.constant 0 : index
    %c0_276 = arith.constant 0 : index
    %773 = vector.load %arg4[%c4_274, %c0_275, %c0_276] : memref<5x1x256xf32, #tpu.memory_space<vmem>>, vector<1x1x256xf32>
    %774 = vector.shape_cast %773 : vector<1x1x256xf32> to vector<1x256xf32>
    %775 = vector.broadcast %774 : vector<1x256xf32> to vector<8x256xf32>
    %776 = arith.addf %772, %775 : vector<8x256xf32>
    %777 = vector.extract_strided_slice %776 {offsets = [0, 0], sizes = [8, 192], strides = [1, 1]} : vector<8x256xf32> to vector<8x192xf32>
    %cst_277 = arith.constant 0.000000e+00 : f32
    %778 = vector.broadcast %cst_277 : f32 to vector<8x192xf32>
    %779 = arith.subf %778, %777 : vector<8x192xf32>
    %780 = math.exp %779 : vector<8x192xf32>
    %cst_278 = arith.constant 1.000000e+00 : f32
    %781 = vector.broadcast %cst_278 : f32 to vector<8x192xf32>
    %782 = arith.addf %781, %780 : vector<8x192xf32>
    %cst_279 = arith.constant 1.000000e+00 : f32
    %783 = vector.broadcast %cst_279 : f32 to vector<8x192xf32>
    %784 = arith.divf %783, %782 : vector<8x192xf32>
    %785 = vector.extract_strided_slice %776 {offsets = [0, 192], sizes = [8, 64], strides = [1, 1]} : vector<8x256xf32> to vector<8x64xf32>
    %786 = math.tanh %785 : vector<8x64xf32>
    %787 = vector.extract_strided_slice %784 {offsets = [0, 0], sizes = [8, 64], strides = [1, 1]} : vector<8x192xf32> to vector<8x64xf32>
    %788 = vector.extract_strided_slice %784 {offsets = [0, 64], sizes = [8, 64], strides = [1, 1]} : vector<8x192xf32> to vector<8x64xf32>
    %789 = vector.extract_strided_slice %784 {offsets = [0, 128], sizes = [8, 64], strides = [1, 1]} : vector<8x192xf32> to vector<8x64xf32>
    %790 = arith.mulf %788, %661 : vector<8x64xf32>
    %791 = arith.mulf %787, %786 : vector<8x64xf32>
    %792 = arith.addf %790, %791 : vector<8x64xf32>
    %793 = math.tanh %792 : vector<8x64xf32>
    %794 = arith.mulf %789, %793 : vector<8x64xf32>
    %795 = tpu.concatenate %686, %713 in 1 : vector<8x64xf32>, vector<8x64xf32> -> vector<8x128xf32>
    %796 = arith.truncf %795 : vector<8x128xf32> to vector<8x128xbf16>
    %c0_280 = arith.constant 0 : index
    %c0_281 = arith.constant 0 : index
    %c0_282 = arith.constant 0 : index
    %797 = vector.load %arg3[%c0_280, %c0_281, %c0_282] : memref<4x128x256xbf16, #tpu.memory_space<vmem>>, vector<1x128x256xbf16>
    %798 = vector.shape_cast %797 : vector<1x128x256xbf16> to vector<128x256xbf16>
    %cst_283 = arith.constant dense<0.000000e+00> : vector<8x256xf32>
    %799 = tpu.matmul %796, %798, %cst_283 {dimension_numbers = #tpu.dot_dimension_numbers<[1], [0], [0], [1], [0, 0, 1, 1], [], []>} : vector<8x128xbf16>, vector<128x256xbf16>, vector<8x256xf32> -> vector<8x256xf32>
    %c1_284 = arith.constant 1 : index
    %c0_285 = arith.constant 0 : index
    %c0_286 = arith.constant 0 : index
    %800 = vector.load %arg4[%c1_284, %c0_285, %c0_286] : memref<5x1x256xf32, #tpu.memory_space<vmem>>, vector<1x1x256xf32>
    %801 = vector.shape_cast %800 : vector<1x1x256xf32> to vector<1x256xf32>
    %802 = vector.broadcast %801 : vector<1x256xf32> to vector<8x256xf32>
    %803 = arith.addf %799, %802 : vector<8x256xf32>
    %804 = vector.extract_strided_slice %803 {offsets = [0, 0], sizes = [8, 192], strides = [1, 1]} : vector<8x256xf32> to vector<8x192xf32>
    %cst_287 = arith.constant 0.000000e+00 : f32
    %805 = vector.broadcast %cst_287 : f32 to vector<8x192xf32>
    %806 = arith.subf %805, %804 : vector<8x192xf32>
    %807 = math.exp %806 : vector<8x192xf32>
    %cst_288 = arith.constant 1.000000e+00 : f32
    %808 = vector.broadcast %cst_288 : f32 to vector<8x192xf32>
    %809 = arith.addf %808, %807 : vector<8x192xf32>
    %cst_289 = arith.constant 1.000000e+00 : f32
    %810 = vector.broadcast %cst_289 : f32 to vector<8x192xf32>
    %811 = arith.divf %810, %809 : vector<8x192xf32>
    %812 = vector.extract_strided_slice %803 {offsets = [0, 192], sizes = [8, 64], strides = [1, 1]} : vector<8x256xf32> to vector<8x64xf32>
    %813 = math.tanh %812 : vector<8x64xf32>
    %814 = vector.extract_strided_slice %811 {offsets = [0, 0], sizes = [8, 64], strides = [1, 1]} : vector<8x192xf32> to vector<8x64xf32>
    %815 = vector.extract_strided_slice %811 {offsets = [0, 64], sizes = [8, 64], strides = [1, 1]} : vector<8x192xf32> to vector<8x64xf32>
    %816 = vector.extract_strided_slice %811 {offsets = [0, 128], sizes = [8, 64], strides = [1, 1]} : vector<8x192xf32> to vector<8x64xf32>
    %817 = arith.mulf %815, %711 : vector<8x64xf32>
    %818 = arith.mulf %814, %813 : vector<8x64xf32>
    %819 = arith.addf %817, %818 : vector<8x64xf32>
    %820 = math.tanh %819 : vector<8x64xf32>
    %821 = arith.mulf %816, %820 : vector<8x64xf32>
    %822 = tpu.concatenate %713, %740 in 1 : vector<8x64xf32>, vector<8x64xf32> -> vector<8x128xf32>
    %823 = arith.truncf %822 : vector<8x128xf32> to vector<8x128xbf16>
    %c1_290 = arith.constant 1 : index
    %c0_291 = arith.constant 0 : index
    %c0_292 = arith.constant 0 : index
    %824 = vector.load %arg3[%c1_290, %c0_291, %c0_292] : memref<4x128x256xbf16, #tpu.memory_space<vmem>>, vector<1x128x256xbf16>
    %825 = vector.shape_cast %824 : vector<1x128x256xbf16> to vector<128x256xbf16>
    %cst_293 = arith.constant dense<0.000000e+00> : vector<8x256xf32>
    %826 = tpu.matmul %823, %825, %cst_293 {dimension_numbers = #tpu.dot_dimension_numbers<[1], [0], [0], [1], [0, 0, 1, 1], [], []>} : vector<8x128xbf16>, vector<128x256xbf16>, vector<8x256xf32> -> vector<8x256xf32>
    %c2_294 = arith.constant 2 : index
    %c0_295 = arith.constant 0 : index
    %c0_296 = arith.constant 0 : index
    %827 = vector.load %arg4[%c2_294, %c0_295, %c0_296] : memref<5x1x256xf32, #tpu.memory_space<vmem>>, vector<1x1x256xf32>
    %828 = vector.shape_cast %827 : vector<1x1x256xf32> to vector<1x256xf32>
    %829 = vector.broadcast %828 : vector<1x256xf32> to vector<8x256xf32>
    %830 = arith.addf %826, %829 : vector<8x256xf32>
    %831 = vector.extract_strided_slice %830 {offsets = [0, 0], sizes = [8, 192], strides = [1, 1]} : vector<8x256xf32> to vector<8x192xf32>
    %cst_297 = arith.constant 0.000000e+00 : f32
    %832 = vector.broadcast %cst_297 : f32 to vector<8x192xf32>
    %833 = arith.subf %832, %831 : vector<8x192xf32>
    %834 = math.exp %833 : vector<8x192xf32>
    %cst_298 = arith.constant 1.000000e+00 : f32
    %835 = vector.broadcast %cst_298 : f32 to vector<8x192xf32>
    %836 = arith.addf %835, %834 : vector<8x192xf32>
    %cst_299 = arith.constant 1.000000e+00 : f32
    %837 = vector.broadcast %cst_299 : f32 to vector<8x192xf32>
    %838 = arith.divf %837, %836 : vector<8x192xf32>
    %839 = vector.extract_strided_slice %830 {offsets = [0, 192], sizes = [8, 64], strides = [1, 1]} : vector<8x256xf32> to vector<8x64xf32>
    %840 = math.tanh %839 : vector<8x64xf32>
    %841 = vector.extract_strided_slice %838 {offsets = [0, 0], sizes = [8, 64], strides = [1, 1]} : vector<8x192xf32> to vector<8x64xf32>
    %842 = vector.extract_strided_slice %838 {offsets = [0, 64], sizes = [8, 64], strides = [1, 1]} : vector<8x192xf32> to vector<8x64xf32>
    %843 = vector.extract_strided_slice %838 {offsets = [0, 128], sizes = [8, 64], strides = [1, 1]} : vector<8x192xf32> to vector<8x64xf32>
    %844 = arith.mulf %842, %738 : vector<8x64xf32>
    %845 = arith.mulf %841, %840 : vector<8x64xf32>
    %846 = arith.addf %844, %845 : vector<8x64xf32>
    %847 = math.tanh %846 : vector<8x64xf32>
    %848 = arith.mulf %843, %847 : vector<8x64xf32>
    %849 = tpu.concatenate %740, %767 in 1 : vector<8x64xf32>, vector<8x64xf32> -> vector<8x128xf32>
    %850 = arith.truncf %849 : vector<8x128xf32> to vector<8x128xbf16>
    %c2_300 = arith.constant 2 : index
    %c0_301 = arith.constant 0 : index
    %c0_302 = arith.constant 0 : index
    %851 = vector.load %arg3[%c2_300, %c0_301, %c0_302] : memref<4x128x256xbf16, #tpu.memory_space<vmem>>, vector<1x128x256xbf16>
    %852 = vector.shape_cast %851 : vector<1x128x256xbf16> to vector<128x256xbf16>
    %cst_303 = arith.constant dense<0.000000e+00> : vector<8x256xf32>
    %853 = tpu.matmul %850, %852, %cst_303 {dimension_numbers = #tpu.dot_dimension_numbers<[1], [0], [0], [1], [0, 0, 1, 1], [], []>} : vector<8x128xbf16>, vector<128x256xbf16>, vector<8x256xf32> -> vector<8x256xf32>
    %c3_304 = arith.constant 3 : index
    %c0_305 = arith.constant 0 : index
    %c0_306 = arith.constant 0 : index
    %854 = vector.load %arg4[%c3_304, %c0_305, %c0_306] : memref<5x1x256xf32, #tpu.memory_space<vmem>>, vector<1x1x256xf32>
    %855 = vector.shape_cast %854 : vector<1x1x256xf32> to vector<1x256xf32>
    %856 = vector.broadcast %855 : vector<1x256xf32> to vector<8x256xf32>
    %857 = arith.addf %853, %856 : vector<8x256xf32>
    %858 = vector.extract_strided_slice %857 {offsets = [0, 0], sizes = [8, 192], strides = [1, 1]} : vector<8x256xf32> to vector<8x192xf32>
    %cst_307 = arith.constant 0.000000e+00 : f32
    %859 = vector.broadcast %cst_307 : f32 to vector<8x192xf32>
    %860 = arith.subf %859, %858 : vector<8x192xf32>
    %861 = math.exp %860 : vector<8x192xf32>
    %cst_308 = arith.constant 1.000000e+00 : f32
    %862 = vector.broadcast %cst_308 : f32 to vector<8x192xf32>
    %863 = arith.addf %862, %861 : vector<8x192xf32>
    %cst_309 = arith.constant 1.000000e+00 : f32
    %864 = vector.broadcast %cst_309 : f32 to vector<8x192xf32>
    %865 = arith.divf %864, %863 : vector<8x192xf32>
    %866 = vector.extract_strided_slice %857 {offsets = [0, 192], sizes = [8, 64], strides = [1, 1]} : vector<8x256xf32> to vector<8x64xf32>
    %867 = math.tanh %866 : vector<8x64xf32>
    %868 = vector.extract_strided_slice %865 {offsets = [0, 0], sizes = [8, 64], strides = [1, 1]} : vector<8x192xf32> to vector<8x64xf32>
    %869 = vector.extract_strided_slice %865 {offsets = [0, 64], sizes = [8, 64], strides = [1, 1]} : vector<8x192xf32> to vector<8x64xf32>
    %870 = vector.extract_strided_slice %865 {offsets = [0, 128], sizes = [8, 64], strides = [1, 1]} : vector<8x192xf32> to vector<8x64xf32>
    %871 = arith.mulf %869, %765 : vector<8x64xf32>
    %872 = arith.mulf %868, %867 : vector<8x64xf32>
    %873 = arith.addf %871, %872 : vector<8x64xf32>
    %874 = math.tanh %873 : vector<8x64xf32>
    %875 = arith.mulf %870, %874 : vector<8x64xf32>
    %876 = tpu.concatenate %767, %794 in 1 : vector<8x64xf32>, vector<8x64xf32> -> vector<8x128xf32>
    %877 = arith.truncf %876 : vector<8x128xf32> to vector<8x128xbf16>
    %c3_310 = arith.constant 3 : index
    %c0_311 = arith.constant 0 : index
    %c0_312 = arith.constant 0 : index
    %878 = vector.load %arg3[%c3_310, %c0_311, %c0_312] : memref<4x128x256xbf16, #tpu.memory_space<vmem>>, vector<1x128x256xbf16>
    %879 = vector.shape_cast %878 : vector<1x128x256xbf16> to vector<128x256xbf16>
    %cst_313 = arith.constant dense<0.000000e+00> : vector<8x256xf32>
    %880 = tpu.matmul %877, %879, %cst_313 {dimension_numbers = #tpu.dot_dimension_numbers<[1], [0], [0], [1], [0, 0, 1, 1], [], []>} : vector<8x128xbf16>, vector<128x256xbf16>, vector<8x256xf32> -> vector<8x256xf32>
    %c4_314 = arith.constant 4 : index
    %c0_315 = arith.constant 0 : index
    %c0_316 = arith.constant 0 : index
    %881 = vector.load %arg4[%c4_314, %c0_315, %c0_316] : memref<5x1x256xf32, #tpu.memory_space<vmem>>, vector<1x1x256xf32>
    %882 = vector.shape_cast %881 : vector<1x1x256xf32> to vector<1x256xf32>
    %883 = vector.broadcast %882 : vector<1x256xf32> to vector<8x256xf32>
    %884 = arith.addf %880, %883 : vector<8x256xf32>
    %885 = vector.extract_strided_slice %884 {offsets = [0, 0], sizes = [8, 192], strides = [1, 1]} : vector<8x256xf32> to vector<8x192xf32>
    %cst_317 = arith.constant 0.000000e+00 : f32
    %886 = vector.broadcast %cst_317 : f32 to vector<8x192xf32>
    %887 = arith.subf %886, %885 : vector<8x192xf32>
    %888 = math.exp %887 : vector<8x192xf32>
    %cst_318 = arith.constant 1.000000e+00 : f32
    %889 = vector.broadcast %cst_318 : f32 to vector<8x192xf32>
    %890 = arith.addf %889, %888 : vector<8x192xf32>
    %cst_319 = arith.constant 1.000000e+00 : f32
    %891 = vector.broadcast %cst_319 : f32 to vector<8x192xf32>
    %892 = arith.divf %891, %890 : vector<8x192xf32>
    %893 = vector.extract_strided_slice %884 {offsets = [0, 192], sizes = [8, 64], strides = [1, 1]} : vector<8x256xf32> to vector<8x64xf32>
    %894 = math.tanh %893 : vector<8x64xf32>
    %895 = vector.extract_strided_slice %892 {offsets = [0, 0], sizes = [8, 64], strides = [1, 1]} : vector<8x192xf32> to vector<8x64xf32>
    %896 = vector.extract_strided_slice %892 {offsets = [0, 64], sizes = [8, 64], strides = [1, 1]} : vector<8x192xf32> to vector<8x64xf32>
    %897 = vector.extract_strided_slice %892 {offsets = [0, 128], sizes = [8, 64], strides = [1, 1]} : vector<8x192xf32> to vector<8x64xf32>
    %898 = arith.mulf %896, %792 : vector<8x64xf32>
    %899 = arith.mulf %895, %894 : vector<8x64xf32>
    %900 = arith.addf %898, %899 : vector<8x64xf32>
    %901 = math.tanh %900 : vector<8x64xf32>
    %902 = arith.mulf %897, %901 : vector<8x64xf32>
    %903 = tpu.concatenate %821, %848 in 1 : vector<8x64xf32>, vector<8x64xf32> -> vector<8x128xf32>
    %904 = arith.truncf %903 : vector<8x128xf32> to vector<8x128xbf16>
    %c1_320 = arith.constant 1 : index
    %c0_321 = arith.constant 0 : index
    %c0_322 = arith.constant 0 : index
    %905 = vector.load %arg3[%c1_320, %c0_321, %c0_322] : memref<4x128x256xbf16, #tpu.memory_space<vmem>>, vector<1x128x256xbf16>
    %906 = vector.shape_cast %905 : vector<1x128x256xbf16> to vector<128x256xbf16>
    %cst_323 = arith.constant dense<0.000000e+00> : vector<8x256xf32>
    %907 = tpu.matmul %904, %906, %cst_323 {dimension_numbers = #tpu.dot_dimension_numbers<[1], [0], [0], [1], [0, 0, 1, 1], [], []>} : vector<8x128xbf16>, vector<128x256xbf16>, vector<8x256xf32> -> vector<8x256xf32>
    %c2_324 = arith.constant 2 : index
    %c0_325 = arith.constant 0 : index
    %c0_326 = arith.constant 0 : index
    %908 = vector.load %arg4[%c2_324, %c0_325, %c0_326] : memref<5x1x256xf32, #tpu.memory_space<vmem>>, vector<1x1x256xf32>
    %909 = vector.shape_cast %908 : vector<1x1x256xf32> to vector<1x256xf32>
    %910 = vector.broadcast %909 : vector<1x256xf32> to vector<8x256xf32>
    %911 = arith.addf %907, %910 : vector<8x256xf32>
    %912 = vector.extract_strided_slice %911 {offsets = [0, 0], sizes = [8, 192], strides = [1, 1]} : vector<8x256xf32> to vector<8x192xf32>
    %cst_327 = arith.constant 0.000000e+00 : f32
    %913 = vector.broadcast %cst_327 : f32 to vector<8x192xf32>
    %914 = arith.subf %913, %912 : vector<8x192xf32>
    %915 = math.exp %914 : vector<8x192xf32>
    %cst_328 = arith.constant 1.000000e+00 : f32
    %916 = vector.broadcast %cst_328 : f32 to vector<8x192xf32>
    %917 = arith.addf %916, %915 : vector<8x192xf32>
    %cst_329 = arith.constant 1.000000e+00 : f32
    %918 = vector.broadcast %cst_329 : f32 to vector<8x192xf32>
    %919 = arith.divf %918, %917 : vector<8x192xf32>
    %920 = vector.extract_strided_slice %911 {offsets = [0, 192], sizes = [8, 64], strides = [1, 1]} : vector<8x256xf32> to vector<8x64xf32>
    %921 = math.tanh %920 : vector<8x64xf32>
    %922 = vector.extract_strided_slice %919 {offsets = [0, 0], sizes = [8, 64], strides = [1, 1]} : vector<8x192xf32> to vector<8x64xf32>
    %923 = vector.extract_strided_slice %919 {offsets = [0, 64], sizes = [8, 64], strides = [1, 1]} : vector<8x192xf32> to vector<8x64xf32>
    %924 = vector.extract_strided_slice %919 {offsets = [0, 128], sizes = [8, 64], strides = [1, 1]} : vector<8x192xf32> to vector<8x64xf32>
    %925 = arith.mulf %923, %846 : vector<8x64xf32>
    %926 = arith.mulf %922, %921 : vector<8x64xf32>
    %927 = arith.addf %925, %926 : vector<8x64xf32>
    %928 = math.tanh %927 : vector<8x64xf32>
    %929 = arith.mulf %924, %928 : vector<8x64xf32>
    %930 = tpu.concatenate %848, %875 in 1 : vector<8x64xf32>, vector<8x64xf32> -> vector<8x128xf32>
    %931 = arith.truncf %930 : vector<8x128xf32> to vector<8x128xbf16>
    %c2_330 = arith.constant 2 : index
    %c0_331 = arith.constant 0 : index
    %c0_332 = arith.constant 0 : index
    %932 = vector.load %arg3[%c2_330, %c0_331, %c0_332] : memref<4x128x256xbf16, #tpu.memory_space<vmem>>, vector<1x128x256xbf16>
    %933 = vector.shape_cast %932 : vector<1x128x256xbf16> to vector<128x256xbf16>
    %cst_333 = arith.constant dense<0.000000e+00> : vector<8x256xf32>
    %934 = tpu.matmul %931, %933, %cst_333 {dimension_numbers = #tpu.dot_dimension_numbers<[1], [0], [0], [1], [0, 0, 1, 1], [], []>} : vector<8x128xbf16>, vector<128x256xbf16>, vector<8x256xf32> -> vector<8x256xf32>
    %c3_334 = arith.constant 3 : index
    %c0_335 = arith.constant 0 : index
    %c0_336 = arith.constant 0 : index
    %935 = vector.load %arg4[%c3_334, %c0_335, %c0_336] : memref<5x1x256xf32, #tpu.memory_space<vmem>>, vector<1x1x256xf32>
    %936 = vector.shape_cast %935 : vector<1x1x256xf32> to vector<1x256xf32>
    %937 = vector.broadcast %936 : vector<1x256xf32> to vector<8x256xf32>
    %938 = arith.addf %934, %937 : vector<8x256xf32>
    %939 = vector.extract_strided_slice %938 {offsets = [0, 0], sizes = [8, 192], strides = [1, 1]} : vector<8x256xf32> to vector<8x192xf32>
    %cst_337 = arith.constant 0.000000e+00 : f32
    %940 = vector.broadcast %cst_337 : f32 to vector<8x192xf32>
    %941 = arith.subf %940, %939 : vector<8x192xf32>
    %942 = math.exp %941 : vector<8x192xf32>
    %cst_338 = arith.constant 1.000000e+00 : f32
    %943 = vector.broadcast %cst_338 : f32 to vector<8x192xf32>
    %944 = arith.addf %943, %942 : vector<8x192xf32>
    %cst_339 = arith.constant 1.000000e+00 : f32
    %945 = vector.broadcast %cst_339 : f32 to vector<8x192xf32>
    %946 = arith.divf %945, %944 : vector<8x192xf32>
    %947 = vector.extract_strided_slice %938 {offsets = [0, 192], sizes = [8, 64], strides = [1, 1]} : vector<8x256xf32> to vector<8x64xf32>
    %948 = math.tanh %947 : vector<8x64xf32>
    %949 = vector.extract_strided_slice %946 {offsets = [0, 0], sizes = [8, 64], strides = [1, 1]} : vector<8x192xf32> to vector<8x64xf32>
    %950 = vector.extract_strided_slice %946 {offsets = [0, 64], sizes = [8, 64], strides = [1, 1]} : vector<8x192xf32> to vector<8x64xf32>
    %951 = vector.extract_strided_slice %946 {offsets = [0, 128], sizes = [8, 64], strides = [1, 1]} : vector<8x192xf32> to vector<8x64xf32>
    %952 = arith.mulf %950, %873 : vector<8x64xf32>
    %953 = arith.mulf %949, %948 : vector<8x64xf32>
    %954 = arith.addf %952, %953 : vector<8x64xf32>
    %955 = math.tanh %954 : vector<8x64xf32>
    %956 = arith.mulf %951, %955 : vector<8x64xf32>
    %957 = tpu.concatenate %875, %902 in 1 : vector<8x64xf32>, vector<8x64xf32> -> vector<8x128xf32>
    %958 = arith.truncf %957 : vector<8x128xf32> to vector<8x128xbf16>
    %c3_340 = arith.constant 3 : index
    %c0_341 = arith.constant 0 : index
    %c0_342 = arith.constant 0 : index
    %959 = vector.load %arg3[%c3_340, %c0_341, %c0_342] : memref<4x128x256xbf16, #tpu.memory_space<vmem>>, vector<1x128x256xbf16>
    %960 = vector.shape_cast %959 : vector<1x128x256xbf16> to vector<128x256xbf16>
    %cst_343 = arith.constant dense<0.000000e+00> : vector<8x256xf32>
    %961 = tpu.matmul %958, %960, %cst_343 {dimension_numbers = #tpu.dot_dimension_numbers<[1], [0], [0], [1], [0, 0, 1, 1], [], []>} : vector<8x128xbf16>, vector<128x256xbf16>, vector<8x256xf32> -> vector<8x256xf32>
    %c4_344 = arith.constant 4 : index
    %c0_345 = arith.constant 0 : index
    %c0_346 = arith.constant 0 : index
    %962 = vector.load %arg4[%c4_344, %c0_345, %c0_346] : memref<5x1x256xf32, #tpu.memory_space<vmem>>, vector<1x1x256xf32>
    %963 = vector.shape_cast %962 : vector<1x1x256xf32> to vector<1x256xf32>
    %964 = vector.broadcast %963 : vector<1x256xf32> to vector<8x256xf32>
    %965 = arith.addf %961, %964 : vector<8x256xf32>
    %966 = vector.extract_strided_slice %965 {offsets = [0, 0], sizes = [8, 192], strides = [1, 1]} : vector<8x256xf32> to vector<8x192xf32>
    %cst_347 = arith.constant 0.000000e+00 : f32
    %967 = vector.broadcast %cst_347 : f32 to vector<8x192xf32>
    %968 = arith.subf %967, %966 : vector<8x192xf32>
    %969 = math.exp %968 : vector<8x192xf32>
    %cst_348 = arith.constant 1.000000e+00 : f32
    %970 = vector.broadcast %cst_348 : f32 to vector<8x192xf32>
    %971 = arith.addf %970, %969 : vector<8x192xf32>
    %cst_349 = arith.constant 1.000000e+00 : f32
    %972 = vector.broadcast %cst_349 : f32 to vector<8x192xf32>
    %973 = arith.divf %972, %971 : vector<8x192xf32>
    %974 = vector.extract_strided_slice %965 {offsets = [0, 192], sizes = [8, 64], strides = [1, 1]} : vector<8x256xf32> to vector<8x64xf32>
    %975 = math.tanh %974 : vector<8x64xf32>
    %976 = vector.extract_strided_slice %973 {offsets = [0, 0], sizes = [8, 64], strides = [1, 1]} : vector<8x192xf32> to vector<8x64xf32>
    %977 = vector.extract_strided_slice %973 {offsets = [0, 64], sizes = [8, 64], strides = [1, 1]} : vector<8x192xf32> to vector<8x64xf32>
    %978 = vector.extract_strided_slice %973 {offsets = [0, 128], sizes = [8, 64], strides = [1, 1]} : vector<8x192xf32> to vector<8x64xf32>
    %979 = arith.mulf %977, %900 : vector<8x64xf32>
    %980 = arith.mulf %976, %975 : vector<8x64xf32>
    %981 = arith.addf %979, %980 : vector<8x64xf32>
    %982 = math.tanh %981 : vector<8x64xf32>
    %983 = arith.mulf %978, %982 : vector<8x64xf32>
    %984 = tpu.concatenate %929, %956 in 1 : vector<8x64xf32>, vector<8x64xf32> -> vector<8x128xf32>
    %985 = arith.truncf %984 : vector<8x128xf32> to vector<8x128xbf16>
    %c2_350 = arith.constant 2 : index
    %c0_351 = arith.constant 0 : index
    %c0_352 = arith.constant 0 : index
    %986 = vector.load %arg3[%c2_350, %c0_351, %c0_352] : memref<4x128x256xbf16, #tpu.memory_space<vmem>>, vector<1x128x256xbf16>
    %987 = vector.shape_cast %986 : vector<1x128x256xbf16> to vector<128x256xbf16>
    %cst_353 = arith.constant dense<0.000000e+00> : vector<8x256xf32>
    %988 = tpu.matmul %985, %987, %cst_353 {dimension_numbers = #tpu.dot_dimension_numbers<[1], [0], [0], [1], [0, 0, 1, 1], [], []>} : vector<8x128xbf16>, vector<128x256xbf16>, vector<8x256xf32> -> vector<8x256xf32>
    %c3_354 = arith.constant 3 : index
    %c0_355 = arith.constant 0 : index
    %c0_356 = arith.constant 0 : index
    %989 = vector.load %arg4[%c3_354, %c0_355, %c0_356] : memref<5x1x256xf32, #tpu.memory_space<vmem>>, vector<1x1x256xf32>
    %990 = vector.shape_cast %989 : vector<1x1x256xf32> to vector<1x256xf32>
    %991 = vector.broadcast %990 : vector<1x256xf32> to vector<8x256xf32>
    %992 = arith.addf %988, %991 : vector<8x256xf32>
    %993 = vector.extract_strided_slice %992 {offsets = [0, 0], sizes = [8, 192], strides = [1, 1]} : vector<8x256xf32> to vector<8x192xf32>
    %cst_357 = arith.constant 0.000000e+00 : f32
    %994 = vector.broadcast %cst_357 : f32 to vector<8x192xf32>
    %995 = arith.subf %994, %993 : vector<8x192xf32>
    %996 = math.exp %995 : vector<8x192xf32>
    %cst_358 = arith.constant 1.000000e+00 : f32
    %997 = vector.broadcast %cst_358 : f32 to vector<8x192xf32>
    %998 = arith.addf %997, %996 : vector<8x192xf32>
    %cst_359 = arith.constant 1.000000e+00 : f32
    %999 = vector.broadcast %cst_359 : f32 to vector<8x192xf32>
    %1000 = arith.divf %999, %998 : vector<8x192xf32>
    %1001 = vector.extract_strided_slice %992 {offsets = [0, 192], sizes = [8, 64], strides = [1, 1]} : vector<8x256xf32> to vector<8x64xf32>
    %1002 = math.tanh %1001 : vector<8x64xf32>
    %1003 = vector.extract_strided_slice %1000 {offsets = [0, 0], sizes = [8, 64], strides = [1, 1]} : vector<8x192xf32> to vector<8x64xf32>
    %1004 = vector.extract_strided_slice %1000 {offsets = [0, 64], sizes = [8, 64], strides = [1, 1]} : vector<8x192xf32> to vector<8x64xf32>
    %1005 = vector.extract_strided_slice %1000 {offsets = [0, 128], sizes = [8, 64], strides = [1, 1]} : vector<8x192xf32> to vector<8x64xf32>
    %1006 = arith.mulf %1004, %954 : vector<8x64xf32>
    %1007 = arith.mulf %1003, %1002 : vector<8x64xf32>
    %1008 = arith.addf %1006, %1007 : vector<8x64xf32>
    %1009 = math.tanh %1008 : vector<8x64xf32>
    %1010 = arith.mulf %1005, %1009 : vector<8x64xf32>
    %1011 = tpu.concatenate %956, %983 in 1 : vector<8x64xf32>, vector<8x64xf32> -> vector<8x128xf32>
    %1012 = arith.truncf %1011 : vector<8x128xf32> to vector<8x128xbf16>
    %c3_360 = arith.constant 3 : index
    %c0_361 = arith.constant 0 : index
    %c0_362 = arith.constant 0 : index
    %1013 = vector.load %arg3[%c3_360, %c0_361, %c0_362] : memref<4x128x256xbf16, #tpu.memory_space<vmem>>, vector<1x128x256xbf16>
    %1014 = vector.shape_cast %1013 : vector<1x128x256xbf16> to vector<128x256xbf16>
    %cst_363 = arith.constant dense<0.000000e+00> : vector<8x256xf32>
    %1015 = tpu.matmul %1012, %1014, %cst_363 {dimension_numbers = #tpu.dot_dimension_numbers<[1], [0], [0], [1], [0, 0, 1, 1], [], []>} : vector<8x128xbf16>, vector<128x256xbf16>, vector<8x256xf32> -> vector<8x256xf32>
    %c4_364 = arith.constant 4 : index
    %c0_365 = arith.constant 0 : index
    %c0_366 = arith.constant 0 : index
    %1016 = vector.load %arg4[%c4_364, %c0_365, %c0_366] : memref<5x1x256xf32, #tpu.memory_space<vmem>>, vector<1x1x256xf32>
    %1017 = vector.shape_cast %1016 : vector<1x1x256xf32> to vector<1x256xf32>
    %1018 = vector.broadcast %1017 : vector<1x256xf32> to vector<8x256xf32>
    %1019 = arith.addf %1015, %1018 : vector<8x256xf32>
    %1020 = vector.extract_strided_slice %1019 {offsets = [0, 0], sizes = [8, 192], strides = [1, 1]} : vector<8x256xf32> to vector<8x192xf32>
    %cst_367 = arith.constant 0.000000e+00 : f32
    %1021 = vector.broadcast %cst_367 : f32 to vector<8x192xf32>
    %1022 = arith.subf %1021, %1020 : vector<8x192xf32>
    %1023 = math.exp %1022 : vector<8x192xf32>
    %cst_368 = arith.constant 1.000000e+00 : f32
    %1024 = vector.broadcast %cst_368 : f32 to vector<8x192xf32>
    %1025 = arith.addf %1024, %1023 : vector<8x192xf32>
    %cst_369 = arith.constant 1.000000e+00 : f32
    %1026 = vector.broadcast %cst_369 : f32 to vector<8x192xf32>
    %1027 = arith.divf %1026, %1025 : vector<8x192xf32>
    %1028 = vector.extract_strided_slice %1019 {offsets = [0, 192], sizes = [8, 64], strides = [1, 1]} : vector<8x256xf32> to vector<8x64xf32>
    %1029 = math.tanh %1028 : vector<8x64xf32>
    %1030 = vector.extract_strided_slice %1027 {offsets = [0, 0], sizes = [8, 64], strides = [1, 1]} : vector<8x192xf32> to vector<8x64xf32>
    %1031 = vector.extract_strided_slice %1027 {offsets = [0, 64], sizes = [8, 64], strides = [1, 1]} : vector<8x192xf32> to vector<8x64xf32>
    %1032 = vector.extract_strided_slice %1027 {offsets = [0, 128], sizes = [8, 64], strides = [1, 1]} : vector<8x192xf32> to vector<8x64xf32>
    %1033 = arith.mulf %1031, %981 : vector<8x64xf32>
    %1034 = arith.mulf %1030, %1029 : vector<8x64xf32>
    %1035 = arith.addf %1033, %1034 : vector<8x64xf32>
    %1036 = math.tanh %1035 : vector<8x64xf32>
    %1037 = arith.mulf %1032, %1036 : vector<8x64xf32>
    %1038 = tpu.concatenate %1010, %1037 in 1 : vector<8x64xf32>, vector<8x64xf32> -> vector<8x128xf32>
    %1039 = arith.truncf %1038 : vector<8x128xf32> to vector<8x128xbf16>
    %c3_370 = arith.constant 3 : index
    %c0_371 = arith.constant 0 : index
    %c0_372 = arith.constant 0 : index
    %1040 = vector.load %arg3[%c3_370, %c0_371, %c0_372] : memref<4x128x256xbf16, #tpu.memory_space<vmem>>, vector<1x128x256xbf16>
    %1041 = vector.shape_cast %1040 : vector<1x128x256xbf16> to vector<128x256xbf16>
    %cst_373 = arith.constant dense<0.000000e+00> : vector<8x256xf32>
    %1042 = tpu.matmul %1039, %1041, %cst_373 {dimension_numbers = #tpu.dot_dimension_numbers<[1], [0], [0], [1], [0, 0, 1, 1], [], []>} : vector<8x128xbf16>, vector<128x256xbf16>, vector<8x256xf32> -> vector<8x256xf32>
    %c4_374 = arith.constant 4 : index
    %c0_375 = arith.constant 0 : index
    %c0_376 = arith.constant 0 : index
    %1043 = vector.load %arg4[%c4_374, %c0_375, %c0_376] : memref<5x1x256xf32, #tpu.memory_space<vmem>>, vector<1x1x256xf32>
    %1044 = vector.shape_cast %1043 : vector<1x1x256xf32> to vector<1x256xf32>
    %1045 = vector.broadcast %1044 : vector<1x256xf32> to vector<8x256xf32>
    %1046 = arith.addf %1042, %1045 : vector<8x256xf32>
    %1047 = vector.extract_strided_slice %1046 {offsets = [0, 0], sizes = [8, 192], strides = [1, 1]} : vector<8x256xf32> to vector<8x192xf32>
    %cst_377 = arith.constant 0.000000e+00 : f32
    %1048 = vector.broadcast %cst_377 : f32 to vector<8x192xf32>
    %1049 = arith.subf %1048, %1047 : vector<8x192xf32>
    %1050 = math.exp %1049 : vector<8x192xf32>
    %cst_378 = arith.constant 1.000000e+00 : f32
    %1051 = vector.broadcast %cst_378 : f32 to vector<8x192xf32>
    %1052 = arith.addf %1051, %1050 : vector<8x192xf32>
    %cst_379 = arith.constant 1.000000e+00 : f32
    %1053 = vector.broadcast %cst_379 : f32 to vector<8x192xf32>
    %1054 = arith.divf %1053, %1052 : vector<8x192xf32>
    %1055 = vector.extract_strided_slice %1046 {offsets = [0, 192], sizes = [8, 64], strides = [1, 1]} : vector<8x256xf32> to vector<8x64xf32>
    %1056 = math.tanh %1055 : vector<8x64xf32>
    %1057 = vector.extract_strided_slice %1054 {offsets = [0, 0], sizes = [8, 64], strides = [1, 1]} : vector<8x192xf32> to vector<8x64xf32>
    %1058 = vector.extract_strided_slice %1054 {offsets = [0, 64], sizes = [8, 64], strides = [1, 1]} : vector<8x192xf32> to vector<8x64xf32>
    %1059 = vector.extract_strided_slice %1054 {offsets = [0, 128], sizes = [8, 64], strides = [1, 1]} : vector<8x192xf32> to vector<8x64xf32>
    %1060 = arith.mulf %1058, %1035 : vector<8x64xf32>
    %1061 = arith.mulf %1057, %1056 : vector<8x64xf32>
    %1062 = arith.addf %1060, %1061 : vector<8x64xf32>
    %1063 = math.tanh %1062 : vector<8x64xf32>
    %1064 = arith.mulf %1059, %1063 : vector<8x64xf32>
    %1065 = arith.truncf %1064 : vector<8x64xf32> to vector<8x64xbf16>
    %c0_380 = arith.constant 0 : index
    %c0_381 = arith.constant 0 : index
    %1066 = vector.load %arg5[%c0_380, %c0_381] : memref<64x64xbf16, #tpu.memory_space<vmem>>, vector<64x64xbf16>
    %cst_382 = arith.constant dense<0.000000e+00> : vector<8x64xf32>
    %1067 = tpu.matmul %1065, %1066, %cst_382 {dimension_numbers = #tpu.dot_dimension_numbers<[1], [0], [0], [1], [0, 0, 1, 1], [], []>} : vector<8x64xbf16>, vector<64x64xbf16>, vector<8x64xf32> -> vector<8x64xf32>
    %c0_383 = arith.constant 0 : index
    %c0_384 = arith.constant 0 : index
    %1068 = vector.load %arg6[%c0_383, %c0_384] : memref<1x64xf32, #tpu.memory_space<vmem>>, vector<1x64xf32>
    %1069 = vector.broadcast %1068 : vector<1x64xf32> to vector<8x64xf32>
    %1070 = arith.addf %1067, %1069 : vector<8x64xf32>
    %cst_385 = arith.constant 0.000000e+00 : f32
    %1071 = vector.broadcast %cst_385 : f32 to vector<8x64xf32>
    %1072 = arith.maximumf %1070, %1071 : vector<8x64xf32>
    %c0_386 = arith.constant 0 : index
    %c0_387 = arith.constant 0 : index
    %1073 = vector.load %arg7[%c0_386, %c0_387] : memref<1x64xf32, #tpu.memory_space<vmem>>, vector<1x64xf32>
    %1074 = vector.broadcast %1073 : vector<1x64xf32> to vector<8x64xf32>
    %1075 = arith.mulf %1072, %1074 : vector<8x64xf32>
    %cst_388 = arith.constant dense<0.000000e+00> : vector<8xf32>
    %1076 = vector.multi_reduction <add>, %1075, %cst_388 [1] : vector<8x64xf32> to vector<8xf32>
    %1077 = vector.shape_cast %1076 : vector<8xf32> to vector<8x1xf32>
    %c0_389 = arith.constant 0 : index
    %c0_390 = arith.constant 0 : index
    %1078 = vector.load %arg8[%c0_389, %c0_390] : memref<1x1xf32, #tpu.memory_space<vmem>>, vector<1x1xf32>
    %1079 = vector.broadcast %1078 : vector<1x1xf32> to vector<8x1xf32>
    %1080 = arith.addf %1077, %1079 : vector<8x1xf32>
    %c0_391 = arith.constant 0 : index
    %c0_392 = arith.constant 0 : index
    %1081 = vector.load %arg9[%c0_391, %c0_392] : memref<8x1xf32, #tpu.memory_space<vmem>>, vector<8x1xf32>
    tpu.vector_store %arg9[%c0_391, %c0_392], %1080 {strides = array<i32>} : memref<8x1xf32, #tpu.memory_space<vmem>>, vector<8x1xf32>,
    return
  }
}

</mosaic_0001>

<bundles_post_ra>
// kernel: tpu_custom_call.1
= control target key start
LH: loop header
LB: loop body
LE: loop exit
PB: predicated region body
PF: predicated region fallthrough
CT: control target
= control target key end

     0   :  { %s6687_s0 = inlined_call_operand.vmem [shape: bf16[64,3], index: 0, kind: input, shape index: {}]   ;;  %s6688_s1 = inlined_call_operand.hbm [shape: bf16[3,256], index: 1, kind: input, shape index: {}]   ;;  %s6689_s2 = inlined_call_operand.hbm [shape: bf16[64,256], index: 2, kind: input, shape index: {}]   ;;  %s6690_s3 = inlined_call_operand.hbm [shape: bf16[4,128,256], index: 3, kind: input, shape index: {}]   ;;  %s6691_s4 = inlined_call_operand.vmem [shape: f32[5,1,256], index: 4, kind: input, shape index: {}]   ;;  %s6692_s5 = inlined_call_operand.vmem [shape: bf16[64,64], index: 5, kind: input, shape index: {}]   ;;  %s6693_s6 = inlined_call_operand.vmem [shape: f32[1,64], index: 6, kind: input, shape index: {}]   ;;  %s6694_s7 = inlined_call_operand.vmem [shape: f32[1,64], index: 7, kind: input, shape index: {}]   ;;  %s6695_s8 = inlined_call_operand.<no memory space> [shape: f32[1,1], index: 8, kind: input, shape index: {}]   ;;  %s6696_s9 = inlined_call_operand.vmem [shape: f32[8,1], index: 9, kind: output, shape index: {}]  }
   0x1   :  { %v14_v0 = vstv %s6695_s8 }
   0x2   :  { %15 = vst [vmem:[#allocation2] sm:$0x1] %v14_v0 }
   0x3   :  { %16 = vsyncpa [#allocation4], 0 }
   0x4   :  { %17 = vsyncpa [#allocation6], 0  ;;  %s4825_s11 = smov [#allocation5]  }
   0x5   :  { %s35_s12 = sshll.u32 %s4825_s11, 4  ;;  %s36_s12 = int_to_ptr.vmem [resolvable:$true] %s35_s12 }
   0x6   :  { %s4769_s13 = scalar_lea.vmem %s36_s12, 1024  ;;  %p4774_p1 = scmp.lt.s32.totalorder %s36_s12, %s36_s12 }
   0x7   :  { %p4770_p0 = scmp.ne.s32.totalorder %s36_s12, %s4769_s13  ;;  %p4775_p2 = scmp.lt.s32.totalorder %s4769_s13, %s4769_s13 }
   0x9   :  { %p4776_p3 = por %p4775_p2, %p4774_p1 }
   0xb   :  { %p4777_p4 = pnand %p4776_p3, %p4770_p0 }
   0xd   :  { %4780 = shalt.err (!%p4777_p4)
}
   0xe   :  { %s4826_s14 = smov 128   ;;  %s4827_s15 = smov 8  }
   0xf   :  { %41 = dma.hbm_to_vmem [thread:$0]  %s6689_s2, 1024, %s36_s12, [#allocation6], %s4826_s14, %s4826_s14, %s4827_s15  }
  0x10   :  { %s4828_s8 = smov [#allocation3]   ;;  %s4829_s19 = smov [#allocation7]  }
  0x11   :  { %s26_s18 = sshll.u32 %s4828_s8, 4  ;;  %s47_s20 = sshll.u32 %s4829_s19, 4  ;;  %s27_s18 = int_to_ptr.vmem [resolvable:$true] %s26_s18  ;;  %s48_s20 = int_to_ptr.vmem [resolvable:$true] %s47_s20 }
  0x12   :  { %s4789_s21 = scalar_lea.vmem %s27_s18, 64  ;;  %p4794_p6 = scmp.lt.s32.totalorder %s27_s18, %s27_s18 }
  0x13   :  { %p4790_p5 = scmp.ne.s32.totalorder %s27_s18, %s4789_s21  ;;  %p4795_p7 = scmp.lt.s32.totalorder %s4789_s21, %s4789_s21 }
  0x15   :  { %p4796_p8 = por %p4795_p7, %p4794_p6 }
  0x17   :  { %p4797_p9 = pnand %p4796_p8, %p4790_p5 }
  0x19   :  { %4800 = shalt.err (!%p4797_p9)
}
  0x1a   :  { %29 = dma.hbm_to_vmem [thread:$0]  %s6688_s1, 64, %s27_s18, [#allocation4]  }
  0x1b   :  { %s4809_s24 = scalar_lea.vmem %s48_s20, 8192  ;;  %p4814_p11 = scmp.lt.s32.totalorder %s48_s20, %s48_s20 }
  0x1c   :  { %p4810_p10 = scmp.ne.s32.totalorder %s48_s20, %s4809_s24  ;;  %p4815_p12 = scmp.lt.s32.totalorder %s4809_s24, %s4809_s24 }
  0x1e   :  { %p4816_p13 = por %p4815_p12, %p4814_p11 }
  0x20   :  { %p4817_p0 = pnand %p4816_p13, %p4810_p10 }
  0x22   :  { %4820 = shalt.err (!%p4817_p0)
}
  0x23   :  { %53 = dma.hbm_to_vmem [thread:$0]  %s6690_s3, 8192, %s48_s20, [#allocation6], %s4826_s14, %s4826_s14, %s4827_s15  }
  0x24   :  { %4821 = dma.done.wait [#allocation4], 64  }
  0x25   :  { %4822 = vsyncadd [#allocation4], 4294967232 }
  0x26   :  { %4823 = dma.done.wait [#allocation6], 9216  }
  0x27   :  { %4824 = vsyncadd [#allocation6], 4294958080  ;;  %vm137_vm0 = vcmask 1040384   ;;  %v6697_v1 = vmov 0   ;;  %vm138_vm1 = vcmask 1041408   ;;  %v4831_v2 = vmov 65535  }
  0x28   :  { %179 = vmatprep.mubr.bf16.mxu0 %v6697_v1  ;;  %304 = vmatprep.mubr.bf16.mxu1 %v6697_v1  ;;  %v139_v3 = vsel %vm137_vm0, 4294967295, %v4831_v2  ;;  %v4899_v4 = vld [vmem:[#allocation5 + $0x34] ss:$8 sps:$4 sm:$0xff]   ;;  %v4901_v6 = vld [vmem:[#allocation5 + $0x30] ss:$8 sps:$4 sm:$0xff]   ;;  %vm124_vm2 = vcmask 23552   ;;  %v85_v18 = vlaneseq }
  0x29   :  { %v140_v5 = vsel %vm138_vm1, %v139_v3, 0  ;;  %v3886_v7 = vld.sshfl [vmem:[#allocation3] sm:$0x33 pattern:$0x76325410]  ;;  %280 = vmatprep.subr.bf16.mxu1 %v4899_v4  ;;  %s4832_s28 = smov 64  }
  0x2a   :  { %v123_v8 = vcombine.high %v3886_v7, %v3886_v7  ;;  %v4904_v9 = vld [vmem:[#allocation5 + $0x24] ss:$8 sps:$4 sm:$0xff]   ;;  %281 = vmatpush1.bf16.msra.mxu1 %v4901_v6  ;;  %v142_v10 = vand.u32 %v3886_v7, %v140_v5  ;;  %v4907_v11 = vld [vmem:[#allocation5 + $0x20] ss:$8 sps:$4 sm:$0xff]   ;;  %v4910_v13 = vld [vmem:[#allocation5 + $0x14] ss:$8 sps:$4 sm:$0xff]  }
  0x2b   :  { %282 = vmatprep.subr.bf16.mxu1 %v4904_v9  ;;  %v4027_v14 = vld [vmem:[%s6687_s0] sm:$0xff]   ;;  %v4918_v16 = vld [vmem:[#allocation5 + $0x4] ss:$8 sps:$4 sm:$0xff]   ;;  %v86_v19 = vshrl.u32 %v85_v18, 7  ;;  %v4054_v56 = vld [vmem:[%s6687_s0 + $0x18] sm:$0xff]   ;;  %vm268_vm3 = vcmask 523264  }
  0x2c   :  { %v145_v12 = vand.u32 %v140_v5, %v123_v8  ;;  %v4915_v15 = vld [vmem:[#allocation5 + $0x10] ss:$8 sps:$4 sm:$0xff]   ;;  %v4921_v17 = vld [vmem:[#allocation5] ss:$8 sps:$4 sm:$0xff]   ;;  %v4959_v43 = vld [vmem:[#allocation7 + $0x74] ss:$8 sps:$4 sm:$0xff]  }
  0x2d   :  { %v4939_v20 = vsub.s32 0, %v86_v19  ;;  %v83_v21 = vld [vmem:[%s6691_s4] sm:$0x3]  ;;  %v4947_v23 = vsub.s32 1, %v86_v19  ;;  %v4963_v45 = vld [vmem:[#allocation7 + $0x64] ss:$8 sps:$4 sm:$0xff]   ;;  %vm5030_vm4 = vmpackc.low %vm268_vm3, %vm268_vm3 }
  0x2e   :  { %161 = vmatprep.subr.bf16.mxu0 %v145_v12  ;;  %283 = vmatpush1.bf16.msra.mxu1 %v4907_v11  ;;  %v4961_v44 = vld [vmem:[#allocation7 + $0x70] ss:$8 sps:$4 sm:$0xff]   ;;  %v4040_v46 = vld [vmem:[%s6687_s0 + $0x8] sm:$0xff]   ;;  %v4974_v48 = vld [vmem:[#allocation7 + $0x54] ss:$8 sps:$4 sm:$0xff]   ;;  %vm4834_vm5 = vmmov 0  }
  0x2f   :  { %162 = vmatpush1.bf16.msra.mxu0 %v142_v10  ;;  %284 = vmatprep.subr.bf16.mxu1 %v4910_v13  ;;  %v4945_v22 = vrot.slane %v83_v21, %v4939_v20  ;;  %v4951_v26 = vrot.slane %v83_v21, %v4947_v23  ;;  %v4970_v47 = vld [vmem:[#allocation7 + $0x60] ss:$8 sps:$4 sm:$0xff]   ;;  %v4978_v49 = vld [vmem:[#allocation7 + $0x50] ss:$8 sps:$4 sm:$0xff]   ;;  %v4981_v50 = vld [vmem:[#allocation7 + $0x44] ss:$8 sps:$4 sm:$0xff]  }
  0x30   :  { %533 = vmatprep.subr.bf16.mxu0 %v4959_v43  ;;  %v4047_v51 = vld [vmem:[%s6687_s0 + $0x10] sm:$0xff]   ;;  %v4991_v53 = vld [vmem:[#allocation7 + $0x34] ss:$8 sps:$4 sm:$0xff]   ;;  %vm3874_vm6 = vcmask 7168  }
  0x31   :  { %v4987_v52 = vld [vmem:[#allocation7 + $0x40] ss:$8 sps:$4 sm:$0xff]   ;;  %v4995_v54 = vld [vmem:[#allocation7 + $0x30] ss:$8 sps:$4 sm:$0xff]   ;;  %v4998_v55 = vld [vmem:[#allocation7 + $0x24] ss:$8 sps:$4 sm:$0xff]  }
  0x32   :  { %3887 = vmatmul.mubr.msk.bf16.vlgmr.msra.gmra.mxu0 %vm124_vm2, %v4027_v14  ;;  %285 = vmatpush1.bf16.msra.mxu1 %v4915_v15  ;;  %v5004_v57 = vld [vmem:[#allocation7 + $0x20] ss:$8 sps:$4 sm:$0xff]   ;;  %v5008_v58 = vld [vmem:[#allocation7 + $0x14] ss:$8 sps:$4 sm:$0xff]   ;;  %v5012_v59 = vld [vmem:[#allocation7 + $0x10] ss:$8 sps:$4 sm:$0xff]  }
  0x33   :  { %189 = vmatprep.mubr.bf16.mxu0 %v6697_v1  ;;  %286 = vmatprep.subr.bf16.mxu1 %v4918_v16  ;;  %v5018_v63 = vld [vmem:[#allocation7 + $0x4] ss:$8 sps:$4 sm:$0xff]   ;;  %v5021_v0 = vld [vmem:[#allocation7] ss:$8 sps:$4 sm:$0xff]  }
  0x34   :  { %534 = vmatpush1.bf16.msra.mxu0 %v4961_v44 }
  0x35   :  { %535 = vmatprep.subr.bf16.mxu0 %v4963_v45 }
  0x36   :  { %287 = vmatpush1.bf16.msra.mxu1 %v4921_v17 }
  0x37   :  { %357 = vmatprep.subr.bf16.mxu1 %v4899_v4 }
  0x38   :  { %536 = vmatpush1.bf16.msra.mxu0 %v4970_v47 }
  0x39   :  { %305 = vmatmul.mubr.bf16.vlgmr.msra.gmra.mxu1 %v6697_v1  ;;  %537 = vmatprep.subr.bf16.mxu0 %v4974_v48 }
  0x3a   :  { %358 = vmatpush1.bf16.msra.mxu1 %v4901_v6  ;;  %381 = vmatprep.mubr.bf16.mxu1 %v6697_v1 }
  0x3b   :  { %359 = vmatprep.subr.bf16.mxu1 %v4904_v9  ;;  %3888 = vmatmul.mubr.msk.bf16.gmra.mxu0 %vm124_vm2, %v4040_v46 }
  0x3c   :  { %199 = vmatprep.mubr.bf16.mxu0 %v6697_v1  ;;  %538 = vmatpush1.bf16.msra.mxu0 %v4978_v49 }
  0x3d   :  { %539 = vmatprep.subr.bf16.mxu0 %v4981_v50 }
  0x3e   :  { %360 = vmatpush1.bf16.msra.mxu1 %v4907_v11 }
  0x3f   :  { %361 = vmatprep.subr.bf16.mxu1 %v4910_v13 }
  0x40   :  { %540 = vmatpush1.bf16.msra.mxu0 %v4987_v52 }
  0x41   :  { %541 = vmatprep.subr.bf16.mxu0 %v4991_v53 }
  0x42   :  { %362 = vmatpush1.bf16.msra.mxu1 %v4915_v15 }
  0x43   :  { %363 = vmatprep.subr.bf16.mxu1 %v4918_v16  ;;  %3889 = vmatmul.mubr.msk.bf16.gmra.mxu0 %vm124_vm2, %v4047_v51 }
  0x44   :  { %209 = vmatprep.mubr.bf16.mxu0 %v6697_v1  ;;  %542 = vmatpush1.bf16.msra.mxu0 %v4995_v54 }
  0x45   :  { %543 = vmatprep.subr.bf16.mxu0 %v4998_v55 }
  0x46   :  { %364 = vmatpush1.bf16.msra.mxu1 %v4921_v17 }
  0x47   :  { %616 = vmatprep.subr.bf16.mxu1 %v4899_v4 }
  0x48   :  { %544 = vmatpush1.bf16.msra.mxu0 %v5004_v57 }
  0x49   :  { %545 = vmatprep.subr.bf16.mxu0 %v5008_v58 }
  0x4b   :  { %3890 = vmatmul.mubr.msk.bf16.gmra.mxu0 %vm124_vm2, %v4054_v56 }
  0x4c   :  { %565 = vmatprep.mubr.bf16.mxu0 %v6697_v1  ;;  %546 = vmatpush1.bf16.msra.mxu0 %v5012_v59 }
  0x4d   :  { %547 = vmatprep.subr.bf16.mxu0 %v5018_v63 }
  0x50   :  { %548 = vmatpush1.bf16.msra.mxu0 %v5021_v0 }
  0x51   :  { %687 = vmatprep.subr.bf16.mxu0 %v4959_v43 }
  0xf2   :  { %v181_v24 = vpop.f32.mrf.mxu0 }
  0xf3   :  { %v182_v25 = vadd.f32 %v181_v24, %v4945_v22 }
  0xf4   :  { %v183_v27 = vpop.f32.mrf.mxu0 }
  0xf5   :  { %v184_v29 = vadd.f32 %v183_v27, %v4951_v26 }
  0xf6   :  { %v185_v21 = vpop.f32.mrf.mxu0 }
  0xf8   :  { %v187_v24 = vpop.f32.mrf.mxu0 }
  0xf9   :  { %v306_v28 = vpop.f32.mrf.mxu1 }
  0xfa   :  { %v313_v30 = vadd.f32 %v306_v28, %v182_v25 }
  0xfb   :  { %v308_v31 = vpop.f32.mrf.mxu1  ;;  %v5062_v25 = vpop.f32.mrf.mxu0 }
  0xfc   :  { %v4954_v32 = vadd.f32 %v308_v31, %v184_v29  ;;  %v315_v36 = vsub.f32 0.0, %v313_v30 }
  0xfd   :  { %v310_v33 = vpop.f32.mrf.mxu1  ;;  %v5064_v27 = vpop.f32.mrf.mxu0 }
  0xfe   :  { %4137 = vtanh.f32 %v4954_v32  ;;  %v317_v37 = vmul.f32 1.442695, %v315_v36  ;;  %v316_v3 = vsub.f32 0.0, %v4954_v32 }
  0xff   :  { %v311_v34 = vpop.f32.mrf.mxu1  ;;  %v5066_v28 = vpop.f32.mrf.mxu0 }
 0x100   :  { %4139 = vpow2.f32 %v317_v37  ;;  %v319_v5 = vmul.f32 1.442695, %v316_v3  ;;  %v3900_v37 = vld [vmem:[%s6691_s4 + $0x2] sm:$0x3] }
 0x101   :  { %v5068_v29 = vpop.f32.mrf.mxu0 }
 0x103   :  { %v5070_v30 = vpop.f32.mrf.mxu0 }
 0x105   :  { %v5072_v31 = vpop.f32.mrf.mxu0 }
 0x107   :  { %v5074_v32 = vpop.f32.mrf.mxu0 }
 0x108   :  { %6753 = vst [vmem:[#allocation10_spill] sm:$0xff] %v5074_v32  ;;  %v5482_v32 = vld [vmem:[#allocation7 + $0x10] ss:$8 sps:$4 sm:$0xff]  }
 0x109   :  { %v5076_v33 = vpop.f32.mrf.mxu0 }
 0x10a   :  { %6754 = vst [vmem:[#allocation11_spill] sm:$0xff] %v5076_v33  ;;  %v5480_v33 = vld [vmem:[#allocation7 + $0x1e4] ss:$8 sps:$4 sm:$0xff]  }
 0x10b   :  { %v4138_v35 = vpop.eup %4137  ;;  %v5078_v34 = vpop.f32.mrf.mxu0  ;;  %6768 = vst [vmem:[#allocation24_spill] sm:$0xff] %v5480_v33 }
 0x10c   :  { %330 = vrot.lane.b32.xlu0 %v4138_v35, %s4832_s28  ;;  %6755 = vst [vmem:[#allocation12_spill] sm:$0xff] %v5078_v34 }
 0x10d   :  { %v4140_v38 = vpop.eup %4139 }
 0x10e   :  { %v321_v39 = vadd.f32 1.0, %v4140_v38  ;;  %v186_v38 = vadd.f32 %v185_v21, %v4945_v22 }
 0x110   :  { %4141 = vrcp.f32 %v321_v39  ;;  %v5091_v39 = vrot.slane %v3900_v37, %v4947_v23 }
 0x112   :  { %6759 = vst [vmem:[#allocation16_spill] sm:$0xff] %v5091_v39 }
 0x11d   :  { %v4142_v40 = vpop.eup %4141 }
 0x11e   :  { %v328_v60 = vmul.f32 0.0, %v4142_v40 }
 0x17e   :  { %v331_v41 = vpop.permute.xlu0 %330 }
 0x17f   :  { %v333_v42 = vmul.f32 %v4142_v40, %v331_v41 }
 0x181   :  { %335 = vrot.lane.b32.xlu0 %v333_v42, %s4832_s28  ;;  %v188_v42 = vadd.f32 %v187_v24, %v4951_v26 }
 0x1f3   :  { %v336_v61 = vpop.permute.xlu0 %335 }
 0x1f4   :  { %v5016_v62 = vadd.f32 %v336_v61, %v328_v60 }
 0x1f6   :  { %4143 = vtanh.f32 %v5016_v62 }
 0x1f7   :  { %4145 = vpow2.f32 %v319_v5 }
 0x203   :  { %v4144_v2 = vpop.eup %4143 }
 0x204   :  { %341 = vrot.lane.b32.xlu1 %v4144_v2, %s4832_s28  ;;  %v4146_v7 = vpop.eup %4145 }
 0x205   :  { %v322_v8 = vadd.f32 1.0, %v4146_v7 }
 0x207   :  { %4147 = vrcp.f32 %v322_v8 }
 0x214   :  { %v4148_v10 = vpop.eup %4147 }
 0x276   :  { %v342_v12 = vpop.permute.xlu1 %341 }
 0x277   :  { %v344_v14 = vmul.f32 %v4148_v10, %v342_v12  ;;  %v5098_v12 = vrot.slane %v3900_v37, %v4939_v20 }
 0x279   :  { %v345_v19 = vpack.c.bf16 %v344_v14, %v344_v14 }
 0x27b   :  { %3899 = vmatmul.mubr.msk.bf16.vlgmr.msra.gmra.mxu1 %vm268_vm3, %v345_v19  ;;  %3919 = vmatmul.mubr.msk.bf16.vlgmr.msra.gmra.mxu0 %vm5030_vm4, %v345_v19 }
 0x27c   :  { %617 = vmatpush1.bf16.msra.mxu1 %v4901_v6  ;;  %640 = vmatprep.mubr.bf16.mxu1 %v6697_v1 }
 0x27d   :  { %618 = vmatprep.subr.bf16.mxu1 %v4904_v9  ;;  %688 = vmatpush1.bf16.msra.mxu0 %v4961_v44 }
 0x27e   :  { %689 = vmatprep.subr.bf16.mxu0 %v4963_v45  ;;  %719 = vmatprep.mubr.bf16.mxu0 %v6697_v1 }
 0x280   :  { %619 = vmatpush1.bf16.msra.mxu1 %v4907_v11 }
 0x281   :  { %620 = vmatprep.subr.bf16.mxu1 %v4910_v13  ;;  %690 = vmatpush1.bf16.msra.mxu0 %v4970_v47 }
 0x282   :  { %691 = vmatprep.subr.bf16.mxu0 %v4974_v48 }
 0x284   :  { %621 = vmatpush1.bf16.msra.mxu1 %v4915_v15 }
 0x285   :  { %622 = vmatprep.subr.bf16.mxu1 %v4918_v16  ;;  %692 = vmatpush1.bf16.msra.mxu0 %v4978_v49 }
 0x286   :  { %693 = vmatprep.subr.bf16.mxu0 %v4981_v50 }
 0x288   :  { %623 = vmatpush1.bf16.msra.mxu1 %v4921_v17 }
 0x289   :  { %694 = vmatpush1.bf16.msra.mxu0 %v4987_v52 }
 0x28a   :  { %695 = vmatprep.subr.bf16.mxu0 %v4991_v53 }
 0x28d   :  { %696 = vmatpush1.bf16.msra.mxu0 %v4995_v54 }
 0x28e   :  { %697 = vmatprep.subr.bf16.mxu0 %v4998_v55 }
 0x291   :  { %698 = vmatpush1.bf16.msra.mxu0 %v5004_v57 }
 0x292   :  { %699 = vmatprep.subr.bf16.mxu0 %v5008_v58 }
 0x295   :  { %700 = vmatpush1.bf16.msra.mxu0 %v5012_v59 }
 0x296   :  { %701 = vmatprep.subr.bf16.mxu0 %v5018_v63 }
 0x299   :  { %702 = vmatpush1.bf16.msra.mxu0 %v5021_v0 }
 0x29a   :  { %953 = vmatprep.subr.bf16.mxu0 %v4899_v4  ;;  %v5080_v4 = vpop.f32.mrf.mxu0 }
 0x29b   :  { %6756 = vst [vmem:[#allocation13_spill] sm:$0xff] %v5080_v4  ;;  %v5478_v4 = vld [vmem:[#allocation7 + $0x1f0] ss:$8 sps:$4 sm:$0xff]  }
 0x29c   :  { %v5082_v35 = vpop.f32.mrf.mxu0  ;;  %6767 = vst [vmem:[#allocation23_spill] sm:$0xff] %v5478_v4 }
 0x29d   :  { %6757 = vst [vmem:[#allocation14_spill] sm:$0xff] %v5082_v35 }
 0x29e   :  { %v5084_v36 = vpop.f32.mrf.mxu0 }
 0x29f   :  { %6758 = vst [vmem:[#allocation15_spill] sm:$0xff] %v5084_v36 }
 0x33b   :  { %v383_v40 = vpop.f32.mrf.mxu1  ;;  %v567_v41 = vpop.f32.mrf.mxu0 }
 0x33c   :  { %v390_v46 = vadd.f32 %v383_v40, %v186_v38  ;;  %v568_v14 = vadd.f32 %v567_v41, %v5098_v12 }
 0x33d   :  { %v385_v51 = vpop.f32.mrf.mxu1  ;;  %v569_v56 = vpop.f32.mrf.mxu0 }
 0x33e   :  { %v391_v60 = vadd.f32 %v385_v51, %v188_v42  ;;  %v570_v61 = vadd.f32 %v569_v56, %v5091_v39  ;;  %v392_v19 = vsub.f32 0.0, %v390_v46  ;;  %v574_v21 = vsub.f32 0.0, %v568_v14 }
 0x33f   :  { %v387_v2 = vpop.f32.mrf.mxu1  ;;  %v571_v3 = vpop.f32.mrf.mxu0 }
 0x340   :  { %4149 = vtanh.f32 %v391_v60  ;;  %v394_v24 = vmul.f32 1.442695, %v392_v19  ;;  %v576_v38 = vmul.f32 1.442695, %v574_v21 }
 0x341   :  { %4151 = vtanh.f32 %v570_v61  ;;  %v388_v5 = vpop.f32.mrf.mxu1  ;;  %v572_v7 = vpop.f32.mrf.mxu0 }
 0x342   :  { %4153 = vpow2.f32 %v394_v24  ;;  %v5110_v24 = vld [vmem:[#allocation7 + $0xf4] ss:$8 sps:$4 sm:$0xff]  }
 0x343   :  { %4155 = vpow2.f32 %v576_v38  ;;  %870 = vmatprep.subr.bf16.mxu1 %v5110_v24 }
 0x34d   :  { %v4150_v8 = vpop.eup %4149 }
 0x34e   :  { %v4152_v10 = vpop.eup %4151  ;;  %407 = vrot.lane.b32.xlu1 %v4150_v8, %s4832_s28 }
 0x34f   :  { %589 = vrot.lane.b32.xlu0 %v4152_v10, %s4832_s28  ;;  %v4154_v40 = vpop.eup %4153 }
 0x350   :  { %v4156_v42 = vpop.eup %4155  ;;  %v398_v51 = vadd.f32 1.0, %v4154_v40 }
 0x351   :  { %v580_v56 = vadd.f32 1.0, %v4156_v42  ;;  %v575_v42 = vsub.f32 0.0, %v570_v61  ;;  %v5117_v61 = vld [vmem:[#allocation7 + $0xe4] ss:$8 sps:$4 sm:$0xff]  }
 0x352   :  { %4157 = vrcp.f32 %v398_v51 }
 0x353   :  { %4159 = vrcp.f32 %v580_v56  ;;  %v578_v56 = vmul.f32 1.442695, %v575_v42  ;;  %v5129_v42 = vld [vmem:[#allocation7 + $0xd0] ss:$8 sps:$4 sm:$0xff]  }
 0x35f   :  { %v4158_v2 = vpop.eup %4157 }
 0x360   :  { %v4160_v5 = vpop.eup %4159  ;;  %v405_v41 = vmul.f32 %v4158_v2, %v5016_v62  ;;  %v393_v62 = vsub.f32 0.0, %v391_v60 }
 0x361   :  { %v587_v46 = vmul.f32 0.0, %v4160_v5 }
 0x362   :  { %v396_v51 = vmul.f32 1.442695, %v393_v62  ;;  %v5126_v62 = vld [vmem:[#allocation7 + $0xd4] ss:$8 sps:$4 sm:$0xff]  }
 0x3c0   :  { %v408_v3 = vpop.permute.xlu1 %407 }
 0x3c1   :  { %v590_v7 = vpop.permute.xlu0 %589  ;;  %v410_v37 = vmul.f32 %v4158_v2, %v408_v3 }
 0x3c2   :  { %v592_v8 = vmul.f32 %v4160_v5, %v590_v7 }
 0x3c3   :  { %412 = vrot.lane.b32.xlu1 %v410_v37, %s4832_s28 }
 0x3c4   :  { %594 = vrot.lane.b32.xlu0 %v592_v8, %s4832_s28 }
 0x435   :  { %v413_v10 = vpop.permute.xlu1 %412 }
 0x436   :  { %v595_v14 = vpop.permute.xlu0 %594  ;;  %v5104_v19 = vadd.f32 %v413_v10, %v405_v41 }
 0x437   :  { %v5106_v21 = vadd.f32 %v595_v14, %v587_v46 }
 0x438   :  { %4161 = vtanh.f32 %v5104_v19 }
 0x439   :  { %4163 = vtanh.f32 %v5106_v21 }
 0x43a   :  { %4165 = vpow2.f32 %v396_v51  ;;  %v5132_v51 = vld [vmem:[#allocation7 + $0xc4] ss:$8 sps:$4 sm:$0xff]  }
 0x43b   :  { %4167 = vpow2.f32 %v578_v56  ;;  %v5135_v56 = vld [vmem:[#allocation7 + $0xc0] ss:$8 sps:$4 sm:$0xff]  }
 0x445   :  { %v4162_v38 = vpop.eup %4161 }
 0x446   :  { %v4164_v40 = vpop.eup %4163  ;;  %418 = vrot.lane.b32.xlu1 %v4162_v38, %s4832_s28  ;;  %v5115_v38 = vld [vmem:[#allocation7 + $0xf0] ss:$8 sps:$4 sm:$0xff]  }
 0x447   :  { %600 = vrot.lane.b32.xlu0 %v4164_v40, %s4832_s28  ;;  %v4166_v2 = vpop.eup %4165  ;;  %v5122_v40 = vld [vmem:[#allocation7 + $0xe0] ss:$8 sps:$4 sm:$0xff]  }
 0x448   :  { %v4168_v3 = vpop.eup %4167  ;;  %v399_v5 = vadd.f32 1.0, %v4166_v2  ;;  %v5138_v2 = vld [vmem:[#allocation7 + $0xb4] ss:$8 sps:$4 sm:$0xff]  }
 0x449   :  { %v581_v7 = vadd.f32 1.0, %v4168_v3  ;;  %v5141_v3 = vld [vmem:[#allocation7 + $0xb0] ss:$8 sps:$4 sm:$0xff]  }
 0x44a   :  { %4169 = vrcp.f32 %v399_v5  ;;  %v5144_v5 = vld [vmem:[#allocation7 + $0xa4] ss:$8 sps:$4 sm:$0xff]  }
 0x44b   :  { %4171 = vrcp.f32 %v581_v7  ;;  %v5147_v7 = vld [vmem:[#allocation7 + $0xa0] ss:$8 sps:$4 sm:$0xff]  }
 0x457   :  { %v4170_v37 = vpop.eup %4169 }
 0x458   :  { %v4172_v41 = vpop.eup %4171 }
 0x4b8   :  { %v419_v8 = vpop.permute.xlu1 %418 }
 0x4b9   :  { %v601_v46 = vpop.permute.xlu0 %600  ;;  %v421_v10 = vmul.f32 %v4170_v37, %v419_v8  ;;  %v5150_v37 = vld [vmem:[#allocation7 + $0x94] ss:$8 sps:$4 sm:$0xff]   ;;  %v5153_v8 = vld [vmem:[#allocation7 + $0x90] ss:$8 sps:$4 sm:$0xff]  }
 0x4ba   :  { %v603_v14 = vmul.f32 %v4172_v41, %v601_v46  ;;  %v5156_v41 = vld [vmem:[#allocation7 + $0x84] ss:$8 sps:$4 sm:$0xff]   ;;  %v5159_v46 = vld [vmem:[#allocation7 + $0x80] ss:$8 sps:$4 sm:$0xff]  }
 0x4bb   :  { %v604_v60 = vpack.c.bf16 %v421_v10, %v421_v10 }
 0x4bc   :  { %682 = vrot.lane.b32.xlu1 %v603_v14, %s4832_s28 }
 0x4bd   :  { %3920 = vmatmul.mubr.msk.bf16.vlgmr.msra.gmra.mxu1 %vm268_vm3, %v604_v60  ;;  %v3939_v60 = vpack.c.bf16 %v603_v14, %v603_v14 }
 0x4be   :  { %871 = vmatpush1.bf16.msra.mxu1 %v5115_v38  ;;  %902 = vmatprep.mubr.bf16.mxu1 %v6697_v1 }
 0x4bf   :  { %872 = vmatprep.subr.bf16.mxu1 %v5117_v61 }
 0x4c2   :  { %873 = vmatpush1.bf16.msra.mxu1 %v5122_v40 }
 0x4c3   :  { %874 = vmatprep.subr.bf16.mxu1 %v5126_v62 }
 0x4c6   :  { %875 = vmatpush1.bf16.msra.mxu1 %v5129_v42 }
 0x4c7   :  { %876 = vmatprep.subr.bf16.mxu1 %v5132_v51 }
 0x4ca   :  { %877 = vmatpush1.bf16.msra.mxu1 %v5135_v56 }
 0x4cb   :  { %878 = vmatprep.subr.bf16.mxu1 %v5138_v2 }
 0x4ce   :  { %879 = vmatpush1.bf16.msra.mxu1 %v5141_v3 }
 0x4cf   :  { %880 = vmatprep.subr.bf16.mxu1 %v5144_v5 }
 0x4d2   :  { %881 = vmatpush1.bf16.msra.mxu1 %v5147_v7 }
 0x4d3   :  { %882 = vmatprep.subr.bf16.mxu1 %v5150_v37 }
 0x4d6   :  { %883 = vmatpush1.bf16.msra.mxu1 %v5153_v8 }
 0x4d7   :  { %884 = vmatprep.subr.bf16.mxu1 %v5156_v41 }
 0x4da   :  { %885 = vmatpush1.bf16.msra.mxu1 %v5159_v46 }
 0x4db   :  { %1024 = vmatprep.subr.bf16.mxu1 %v4959_v43 }
 0x4dd   :  { %3940 = vmatmul.mubr.msk.bf16.vlgmr.msra.gmra.mxu1 %vm5030_vm4, %v3939_v60 }
 0x4de   :  { %1025 = vmatpush1.bf16.msra.mxu1 %v4961_v44  ;;  %1056 = vmatprep.mubr.bf16.mxu1 %v6697_v1 }
 0x4df   :  { %1026 = vmatprep.subr.bf16.mxu1 %v4963_v45 }
 0x4e2   :  { %1027 = vmatpush1.bf16.msra.mxu1 %v4970_v47 }
 0x4e3   :  { %1028 = vmatprep.subr.bf16.mxu1 %v4974_v48  ;;  %v192_v48 = vadd.f32 %v5062_v25, %v4945_v22 }
 0x4e6   :  { %1029 = vmatpush1.bf16.msra.mxu1 %v4978_v49  ;;  %v194_v49 = vadd.f32 %v5064_v27, %v4951_v26 }
 0x4e7   :  { %1030 = vmatprep.subr.bf16.mxu1 %v4981_v50 }
 0x4ea   :  { %1031 = vmatpush1.bf16.msra.mxu1 %v4987_v52 }
 0x4eb   :  { %1032 = vmatprep.subr.bf16.mxu1 %v4991_v53  ;;  %v3921_v53 = vld [vmem:[%s6691_s4 + $0x4] sm:$0x3] }
 0x4ee   :  { %1033 = vmatpush1.bf16.msra.mxu1 %v4995_v54  ;;  %v5204_v54 = vrot.slane %v3921_v53, %v4947_v23 }
 0x4ef   :  { %1034 = vmatprep.subr.bf16.mxu1 %v4998_v55 }
 0x4f0   :  { %6760 = vst [vmem:[#allocation17_spill] sm:$0xff] %v5204_v54 }
 0x4f2   :  { %1035 = vmatpush1.bf16.msra.mxu1 %v5004_v57 }
 0x4f3   :  { %1036 = vmatprep.subr.bf16.mxu1 %v5008_v58 }
 0x4f6   :  { %1037 = vmatpush1.bf16.msra.mxu1 %v5012_v59 }
 0x4f7   :  { %1038 = vmatprep.subr.bf16.mxu1 %v5018_v63 }
 0x4fa   :  { %1039 = vmatpush1.bf16.msra.mxu1 %v5021_v0 }
 0x52e   :  { %v683_v44 = vpop.permute.xlu1 %682 }
 0x52f   :  { %v685_v45 = vsel %vm268_vm3, %v421_v10, %v683_v44  ;;  %v5212_v10 = vrot.slane %v3921_v53, %v4939_v20 }
 0x530   :  { %v686_v47 = vpack.c.bf16 %v685_v45, %v685_v45 }
 0x531   :  { %6761 = vst [vmem:[#allocation18_spill] sm:$0xff] %v5212_v10 }
 0x532   :  { %720 = vmatmul.mubr.bf16.vlgmr.msra.gmra.mxu0 %v686_v47 }
 0x533   :  { %954 = vmatpush1.bf16.msra.mxu0 %v4901_v6  ;;  %977 = vmatprep.mubr.bf16.mxu0 %v6697_v1 }
 0x534   :  { %955 = vmatprep.subr.bf16.mxu0 %v4904_v9 }
 0x537   :  { %956 = vmatpush1.bf16.msra.mxu0 %v4907_v11 }
 0x538   :  { %957 = vmatprep.subr.bf16.mxu0 %v4910_v13 }
 0x53b   :  { %958 = vmatpush1.bf16.msra.mxu0 %v4915_v15 }
 0x53c   :  { %959 = vmatprep.subr.bf16.mxu0 %v4918_v16 }
 0x53f   :  { %960 = vmatpush1.bf16.msra.mxu0 %v4921_v17 }
 0x540   :  { %1101 = vmatprep.subr.bf16.mxu0 %v5110_v24 }
 0x57d   :  { %v642_v6 = vpop.f32.mrf.mxu1 }
 0x57e   :  { %v649_v9 = vadd.f32 %v642_v6, %v192_v48 }
 0x57f   :  { %v644_v50 = vpop.f32.mrf.mxu1 }
 0x580   :  { %v5196_v11 = vadd.f32 %v644_v50, %v194_v49  ;;  %v651_v25 = vsub.f32 0.0, %v649_v9 }
 0x581   :  { %v646_v13 = vpop.f32.mrf.mxu1 }
 0x582   :  { %4173 = vtanh.f32 %v5196_v11  ;;  %v653_v27 = vmul.f32 1.442695, %v651_v25 }
 0x583   :  { %v647_v15 = vpop.f32.mrf.mxu1 }
 0x58f   :  { %v4174_v52 = vpop.eup %4173 }
 0x590   :  { %666 = vrot.lane.b32.xlu1 %v4174_v52, %s4832_s28 }
 0x59d   :  { %v904_v55 = vpop.f32.mrf.mxu1 }
 0x59e   :  { %v905_v47 = vadd.f32 %v904_v55, %v5212_v10 }
 0x59f   :  { %v906_v57 = vpop.f32.mrf.mxu1 }
 0x5a0   :  { %v5207_v58 = vadd.f32 %v906_v57, %v5204_v54  ;;  %v911_v9 = vsub.f32 0.0, %v905_v47 }
 0x5a1   :  { %v908_v59 = vpop.f32.mrf.mxu1 }
 0x5a2   :  { %4175 = vtanh.f32 %v5207_v58  ;;  %v913_v50 = vmul.f32 1.442695, %v911_v9 }
 0x5a3   :  { %v909_v63 = vpop.f32.mrf.mxu1  ;;  %4177 = vpow2.f32 %v653_v27 }
 0x5af   :  { %v4176_v0 = vpop.eup %4175 }
 0x5b0   :  { %926 = vrot.lane.b32.xlu0 %v4176_v0, %s4832_s28  ;;  %v4178_v14 = vpop.eup %4177 }
 0x5b1   :  { %v657_v45 = vadd.f32 1.0, %v4178_v14 }
 0x5f2   :  { %v721_v60 = vpop.f32.mrf.mxu0 }
 0x5f3   :  { %v722_v25 = vadd.f32 %v721_v60, %v5098_v12 }
 0x5f4   :  { %v723_v44 = vpop.f32.mrf.mxu0 }
 0x5f5   :  { %v5216_v48 = vadd.f32 %v723_v44, %v5091_v39  ;;  %v728_v27 = vsub.f32 0.0, %v722_v25 }
 0x5f6   :  { %v725_v6 = vpop.f32.mrf.mxu0 }
 0x5f7   :  { %4179 = vtanh.f32 %v5216_v48  ;;  %v730_v14 = vmul.f32 1.442695, %v728_v27 }
 0x5f8   :  { %v726_v49 = vpop.f32.mrf.mxu0  ;;  %4181 = vrcp.f32 %v657_v45 }
 0x5f9   :  { %4183 = vpow2.f32 %v913_v50 }
 0x602   :  { %v667_v15 = vpop.permute.xlu1 %666 }
 0x604   :  { %v4180_v13 = vpop.eup %4179 }
 0x605   :  { %743 = vrot.lane.b32.xlu0 %v4180_v13, %s4832_s28  ;;  %v4182_v52 = vpop.eup %4181 }
 0x606   :  { %v669_v53 = vmul.f32 %v4182_v52, %v667_v15  ;;  %v4184_v55 = vpop.eup %4183  ;;  %v664_v9 = vmul.f32 %v4182_v52, %v5104_v19 }
 0x607   :  { %v917_v57 = vadd.f32 1.0, %v4184_v55 }
 0x609   :  { %671 = vrot.lane.b32.xlu0 %v669_v53, %s4832_s28  ;;  %4185 = vrcp.f32 %v917_v57 }
 0x60a   :  { %4187 = vpow2.f32 %v730_v14 }
 0x616   :  { %v4186_v59 = vpop.eup %4185 }
 0x617   :  { %v4188_v44 = vpop.eup %4187  ;;  %v924_v60 = vmul.f32 0.0, %v4186_v59 }
 0x618   :  { %v734_v45 = vadd.f32 1.0, %v4188_v44 }
 0x61a   :  { %4189 = vrcp.f32 %v734_v45 }
 0x622   :  { %v927_v63 = vpop.permute.xlu0 %926 }
 0x623   :  { %v929_v0 = vmul.f32 %v4186_v59, %v927_v63  ;;  %v652_v63 = vsub.f32 0.0, %v5196_v11  ;;  %v912_v59 = vsub.f32 0.0, %v5207_v58 }
 0x625   :  { %931 = vrot.lane.b32.xlu1 %v929_v0, %s4832_s28  ;;  %v655_v19 = vmul.f32 1.442695, %v652_v63  ;;  %v915_v44 = vmul.f32 1.442695, %v912_v59 }
 0x627   :  { %v4190_v47 = vpop.eup %4189 }
 0x628   :  { %v741_v0 = vmul.f32 %v4190_v47, %v5106_v21 }
 0x677   :  { %v744_v6 = vpop.permute.xlu0 %743 }
 0x678   :  { %v746_v49 = vmul.f32 %v4190_v47, %v744_v6 }
 0x67a   :  { %748 = vrot.lane.b32.xlu1 %v746_v49, %s4832_s28 }
 0x67b   :  { %v672_v50 = vpop.permute.xlu0 %671 }
 0x67c   :  { %v5225_v13 = vadd.f32 %v672_v50, %v664_v9 }
 0x67e   :  { %4191 = vtanh.f32 %v5225_v13 }
 0x68b   :  { %v4192_v15 = vpop.eup %4191 }
 0x68c   :  { %677 = vrot.lane.b32.xlu1 %v4192_v15, %s4832_s28 }
 0x697   :  { %v932_v53 = vpop.permute.xlu1 %931 }
 0x698   :  { %v5229_v55 = vadd.f32 %v932_v53, %v924_v60  ;;  %v5265_v60 = vld [vmem:[#allocation5 + $0x34] ss:$8 sps:$4 sm:$0xff]   ;;  %v729_v53 = vsub.f32 0.0, %v5216_v48  ;;  %v5274_v48 = vld [vmem:[#allocation5 + $0x30] ss:$8 sps:$4 sm:$0xff]  }
 0x69a   :  { %4193 = vtanh.f32 %v5229_v55 }
 0x69b   :  { %4195 = vpow2.f32 %v655_v19 }
 0x6a7   :  { %v4194_v57 = vpop.eup %4193 }
 0x6a8   :  { %937 = vrot.lane.b32.xlu0 %v4194_v57, %s4832_s28  ;;  %v4196_v52 = vpop.eup %4195  ;;  %v732_v57 = vmul.f32 1.442695, %v729_v53 }
 0x6a9   :  { %v658_v27 = vadd.f32 1.0, %v4196_v52  ;;  %v5269_v52 = vld [vmem:[#allocation7 + $0x174] ss:$8 sps:$4 sm:$0xff]  }
 0x6aa   :  { %1284 = vmatprep.subr.bf16.mxu1 %v5269_v52 }
 0x6ec   :  { %v749_v25 = vpop.permute.xlu1 %748 }
 0x6ed   :  { %v5235_v14 = vadd.f32 %v749_v25, %v741_v0 }
 0x6ef   :  { %4197 = vtanh.f32 %v5235_v14 }
 0x6f0   :  { %4199 = vrcp.f32 %v658_v27 }
 0x6f1   :  { %4201 = vpow2.f32 %v915_v44 }
 0x6fc   :  { %v4198_v45 = vpop.eup %4197 }
 0x6fd   :  { %754 = vrot.lane.b32.xlu0 %v4198_v45, %s4832_s28  ;;  %v4200_v11 = vpop.eup %4199 }
 0x6fe   :  { %v678_v6 = vpop.permute.xlu1 %677  ;;  %v4202_v58 = vpop.eup %4201 }
 0x6ff   :  { %v5240_v49 = vmul.f32 %v4200_v11, %v678_v6  ;;  %v918_v47 = vadd.f32 1.0, %v4202_v58  ;;  %v5278_v11 = vld [vmem:[#allocation5 + $0x24] ss:$8 sps:$4 sm:$0xff]   ;;  %v5281_v6 = vld [vmem:[#allocation5 + $0x20] ss:$8 sps:$4 sm:$0xff]  }
 0x700   :  { %v5287_v58 = vld [vmem:[#allocation5 + $0x10] ss:$8 sps:$4 sm:$0xff]  }
 0x701   :  { %v941_v21 = vpack.c.bf16 %v5240_v49, %v5240_v49  ;;  %4203 = vrcp.f32 %v918_v47  ;;  %v196_v47 = vadd.f32 %v5066_v28, %v4945_v22  ;;  %v5308_v28 = vld [vmem:[#allocation7 + $0x160] ss:$8 sps:$4 sm:$0xff]  }
 0x702   :  { %4205 = vpow2.f32 %v732_v57 }
 0x703   :  { %3941 = vmatmul.mubr.msk.bf16.vlgmr.msra.gmra.mxu0 %vm268_vm3, %v941_v21  ;;  %v5284_v21 = vld [vmem:[#allocation5 + $0x14] ss:$8 sps:$4 sm:$0xff]  }
 0x704   :  { %1102 = vmatpush1.bf16.msra.mxu0 %v5115_v38  ;;  %1133 = vmatprep.mubr.bf16.mxu0 %v6697_v1 }
 0x705   :  { %1103 = vmatprep.subr.bf16.mxu0 %v5117_v61 }
 0x708   :  { %1104 = vmatpush1.bf16.msra.mxu0 %v5122_v40 }
 0x709   :  { %1105 = vmatprep.subr.bf16.mxu0 %v5126_v62 }
 0x70c   :  { %1106 = vmatpush1.bf16.msra.mxu0 %v5129_v42 }
 0x70d   :  { %1107 = vmatprep.subr.bf16.mxu0 %v5132_v51 }
 0x70e   :  { %v4204_v9 = vpop.eup %4203 }
 0x70f   :  { %v4206_v63 = vpop.eup %4205 }
 0x710   :  { %1108 = vmatpush1.bf16.msra.mxu0 %v5135_v56  ;;  %v735_v19 = vadd.f32 1.0, %v4206_v63 }
 0x711   :  { %1109 = vmatprep.subr.bf16.mxu0 %v5138_v2 }
 0x712   :  { %4207 = vrcp.f32 %v735_v19 }
 0x714   :  { %1110 = vmatpush1.bf16.msra.mxu0 %v5141_v3 }
 0x715   :  { %1111 = vmatprep.subr.bf16.mxu0 %v5144_v5 }
 0x718   :  { %1112 = vmatpush1.bf16.msra.mxu0 %v5147_v7 }
 0x719   :  { %1113 = vmatprep.subr.bf16.mxu0 %v5150_v37 }
 0x71a   :  { %v938_v50 = vpop.permute.xlu0 %937 }
 0x71b   :  { %v5258_v15 = vmul.f32 %v4204_v9, %v938_v50  ;;  %v198_v50 = vadd.f32 %v5068_v29, %v4951_v26  ;;  %v5312_v29 = vld [vmem:[#allocation7 + $0x154] ss:$8 sps:$4 sm:$0xff]  }
 0x71c   :  { %1114 = vmatpush1.bf16.msra.mxu0 %v5153_v8 }
 0x71d   :  { %1096 = vrot.lane.b32.xlu1 %v5258_v15, %s4832_s28  ;;  %1115 = vmatprep.subr.bf16.mxu0 %v5156_v41 }
 0x71f   :  { %v4208_v0 = vpop.eup %4207 }
 0x720   :  { %1116 = vmatpush1.bf16.msra.mxu0 %v5159_v46 }
 0x721   :  { %1367 = vmatprep.subr.bf16.mxu0 %v5265_v60 }
 0x76f   :  { %v755_v25 = vpop.permute.xlu0 %754 }
 0x770   :  { %v757_v27 = vmul.f32 %v4208_v0, %v755_v25 }
 0x772   :  { %1019 = vrot.lane.b32.xlu0 %v757_v27, %s4832_s28 }
 0x78f   :  { %v1097_v59 = vpop.permute.xlu1 %1096 }
 0x790   :  { %v1099_v44 = vsel %vm268_vm3, %v757_v27, %v1097_v59  ;;  %v5305_v27 = vld [vmem:[#allocation7 + $0x164] ss:$8 sps:$4 sm:$0xff]   ;;  %v5315_v59 = vld [vmem:[#allocation7 + $0x150] ss:$8 sps:$4 sm:$0xff]  }
 0x791   :  { %v1100_v45 = vpack.c.bf16 %v1099_v44, %v1099_v44  ;;  %v5321_v44 = vld [vmem:[#allocation7 + $0x140] ss:$8 sps:$4 sm:$0xff]  }
 0x793   :  { %1134 = vmatmul.mubr.bf16.vlgmr.msra.gmra.mxu0 %v1100_v45  ;;  %v5324_v45 = vld [vmem:[#allocation7 + $0x134] ss:$8 sps:$4 sm:$0xff]  }
 0x794   :  { %1368 = vmatpush1.bf16.msra.mxu0 %v5274_v48  ;;  %1391 = vmatprep.mubr.bf16.mxu0 %v6697_v1 }
 0x795   :  { %1369 = vmatprep.subr.bf16.mxu0 %v5278_v11 }
 0x798   :  { %1370 = vmatpush1.bf16.msra.mxu0 %v5281_v6 }
 0x799   :  { %1371 = vmatprep.subr.bf16.mxu0 %v5284_v21 }
 0x79c   :  { %1372 = vmatpush1.bf16.msra.mxu0 %v5287_v58 }
 0x79d   :  { %1373 = vmatprep.subr.bf16.mxu0 %v4918_v16 }
 0x7a0   :  { %1374 = vmatpush1.bf16.msra.mxu0 %v4921_v17  ;;  %v5303_v17 = vld [vmem:[#allocation7 + $0x170] ss:$8 sps:$4 sm:$0xff]  }
 0x7a1   :  { %1438 = vmatprep.subr.bf16.mxu0 %v4959_v43 }
 0x7c3   :  { %v979_v9 = vpop.f32.mrf.mxu0 }
 0x7c4   :  { %v5297_v53 = vadd.f32 %v979_v9, %v196_v47  ;;  %v5327_v47 = vld [vmem:[#allocation7 + $0x130] ss:$8 sps:$4 sm:$0xff]   ;;  %v5330_v9 = vld [vmem:[#allocation7 + $0x124] ss:$8 sps:$4 sm:$0xff]  }
 0x7c5   :  { %v981_v57 = vpop.f32.mrf.mxu0 }
 0x7c6   :  { %v5299_v63 = vadd.f32 %v981_v57, %v198_v50  ;;  %v5333_v50 = vld [vmem:[#allocation7 + $0x120] ss:$8 sps:$4 sm:$0xff]   ;;  %v5336_v57 = vld [vmem:[#allocation7 + $0x114] ss:$8 sps:$4 sm:$0xff]  }
 0x7c7   :  { %v983_v19 = vpop.f32.mrf.mxu0 }
 0x7c8   :  { %v5339_v19 = vld [vmem:[#allocation7 + $0x110] ss:$8 sps:$4 sm:$0xff]  }
 0x7c9   :  { %v984_v0 = vpop.f32.mrf.mxu0 }
 0x7ca   :  { %v5342_v0 = vld [vmem:[#allocation7 + $0x104] ss:$8 sps:$4 sm:$0xff]  }
 0x7e4   :  { %v1020_v25 = vpop.permute.xlu0 %1019 }
 0x7e5   :  { %v1022_v16 = vsel %vm268_vm3, %v5240_v49, %v1020_v25  ;;  %v5318_v49 = vld [vmem:[#allocation7 + $0x144] ss:$8 sps:$4 sm:$0xff]   ;;  %v5345_v25 = vld [vmem:[#allocation7 + $0x100] ss:$8 sps:$4 sm:$0xff]  }
 0x7e6   :  { %v1023_v43 = vpack.c.bf16 %v1022_v16, %v1022_v16  ;;  %v3960_v16 = vpack.c.bf16 %v5258_v15, %v5258_v15 }
 0x7e8   :  { %1057 = vmatmul.mubr.bf16.vlgmr.msra.gmra.mxu1 %v1023_v43 }
 0x7e9   :  { %1285 = vmatpush1.bf16.msra.mxu1 %v5303_v17  ;;  %1316 = vmatprep.mubr.bf16.mxu1 %v6697_v1 }
 0x7ea   :  { %1286 = vmatprep.subr.bf16.mxu1 %v5305_v27 }
 0x7ed   :  { %1287 = vmatpush1.bf16.msra.mxu1 %v5308_v28 }
 0x7ee   :  { %1288 = vmatprep.subr.bf16.mxu1 %v5312_v29 }
 0x7f1   :  { %1289 = vmatpush1.bf16.msra.mxu1 %v5315_v59 }
 0x7f2   :  { %1290 = vmatprep.subr.bf16.mxu1 %v5318_v49 }
 0x7f5   :  { %1291 = vmatpush1.bf16.msra.mxu1 %v5321_v44 }
 0x7f6   :  { %1292 = vmatprep.subr.bf16.mxu1 %v5324_v45 }
 0x7f9   :  { %1293 = vmatpush1.bf16.msra.mxu1 %v5327_v47 }
 0x7fa   :  { %1294 = vmatprep.subr.bf16.mxu1 %v5330_v9 }
 0x7fd   :  { %1295 = vmatpush1.bf16.msra.mxu1 %v5333_v50 }
 0x7fe   :  { %1296 = vmatprep.subr.bf16.mxu1 %v5336_v57 }
 0x801   :  { %1297 = vmatpush1.bf16.msra.mxu1 %v5339_v19 }
 0x802   :  { %1298 = vmatprep.subr.bf16.mxu1 %v5342_v0 }
 0x805   :  { %1299 = vmatpush1.bf16.msra.mxu1 %v5345_v25 }
 0x806   :  { %1515 = vmatprep.subr.bf16.mxu1 %v5110_v24 }
 0x808   :  { %3961 = vmatmul.mubr.msk.bf16.vlgmr.msra.gmra.mxu1 %vm5030_vm4, %v3960_v16  ;;  %v3942_v16 = vld [vmem:[%s6691_s4 + $0x6] sm:$0x3] }
 0x809   :  { %1516 = vmatpush1.bf16.msra.mxu1 %v5115_v38  ;;  %1547 = vmatprep.mubr.bf16.mxu1 %v6697_v1  ;;  %v5398_v36 = vrot.slane %v3942_v16, %v4939_v20 }
 0x80a   :  { %1517 = vmatprep.subr.bf16.mxu1 %v5117_v61 }
 0x80d   :  { %1518 = vmatpush1.bf16.msra.mxu1 %v5122_v40 }
 0x80e   :  { %1519 = vmatprep.subr.bf16.mxu1 %v5126_v62 }
 0x811   :  { %1520 = vmatpush1.bf16.msra.mxu1 %v5129_v42 }
 0x812   :  { %1521 = vmatprep.subr.bf16.mxu1 %v5132_v51 }
 0x815   :  { %1522 = vmatpush1.bf16.msra.mxu1 %v5135_v56 }
 0x816   :  { %1523 = vmatprep.subr.bf16.mxu1 %v5138_v2 }
 0x819   :  { %1524 = vmatpush1.bf16.msra.mxu1 %v5141_v3 }
 0x81a   :  { %1525 = vmatprep.subr.bf16.mxu1 %v5144_v5 }
 0x81d   :  { %1526 = vmatpush1.bf16.msra.mxu1 %v5147_v7 }
 0x81e   :  { %1527 = vmatprep.subr.bf16.mxu1 %v5150_v37 }
 0x821   :  { %1528 = vmatpush1.bf16.msra.mxu1 %v5153_v8 }
 0x822   :  { %1529 = vmatprep.subr.bf16.mxu1 %v5156_v41 }
 0x825   :  { %1530 = vmatpush1.bf16.msra.mxu1 %v5159_v46 }
 0x853   :  { %v1135_v24 = vpop.f32.mrf.mxu0 }
 0x854   :  { %v1136_v2 = vadd.f32 %v1135_v24, %v5212_v10 }
 0x855   :  { %v1137_v38 = vpop.f32.mrf.mxu0 }
 0x856   :  { %v5371_v61 = vadd.f32 %v1137_v38, %v5204_v54  ;;  %v1142_v37 = vsub.f32 0.0, %v1136_v2  ;;  %v5387_v38 = vrot.slane %v3942_v16, %v4947_v23 }
 0x857   :  { %v1139_v40 = vpop.f32.mrf.mxu0 }
 0x858   :  { %4209 = vtanh.f32 %v5371_v61  ;;  %v1144_v8 = vmul.f32 1.442695, %v1142_v37  ;;  %6762 = vst [vmem:[#allocation19_spill] sm:$0xff] %v5387_v38 }
 0x859   :  { %v1140_v62 = vpop.f32.mrf.mxu0 }
 0x865   :  { %v4210_v42 = vpop.eup %4209 }
 0x866   :  { %1157 = vrot.lane.b32.xlu1 %v4210_v42, %s4832_s28 }
 0x8a8   :  { %v1058_v51 = vpop.f32.mrf.mxu1 }
 0x8aa   :  { %v1060_v56 = vpop.f32.mrf.mxu1 }
 0x8ab   :  { %v5377_v3 = vadd.f32 %v1060_v56, %v5091_v39 }
 0x8ac   :  { %v1062_v5 = vpop.f32.mrf.mxu1 }
 0x8ad   :  { %4211 = vtanh.f32 %v5377_v3 }
 0x8ae   :  { %v1063_v7 = vpop.f32.mrf.mxu1  ;;  %4213 = vtanh.f32 %v5299_v63 }
 0x8af   :  { %4215 = vpow2.f32 %v1144_v8  ;;  %v1059_v8 = vadd.f32 %v1058_v51, %v5098_v12 }
 0x8ba   :  { %v4212_v41 = vpop.eup %4211 }
 0x8bb   :  { %1080 = vrot.lane.b32.xlu0 %v4212_v41, %s4832_s28  ;;  %v4214_v46 = vpop.eup %4213  ;;  %v1065_v41 = vsub.f32 0.0, %v1059_v8 }
 0x8bc   :  { %v4216_v15 = vpop.eup %4215 }
 0x8bd   :  { %v1148_v43 = vadd.f32 1.0, %v4216_v15  ;;  %v1067_v15 = vmul.f32 1.442695, %v1065_v41 }
 0x8bf   :  { %1003 = vrot.lane.b32.xlu0 %v4214_v46, %s4832_s28  ;;  %4217 = vrcp.f32 %v1148_v43  ;;  %v988_v46 = vsub.f32 0.0, %v5297_v53 }
 0x8c1   :  { %v990_v43 = vmul.f32 1.442695, %v988_v46 }
 0x8c8   :  { %v1318_v24 = vpop.f32.mrf.mxu1 }
 0x8c9   :  { %v1319_v8 = vadd.f32 %v1318_v24, %v5398_v36 }
 0x8ca   :  { %v1320_v40 = vpop.f32.mrf.mxu1 }
 0x8cb   :  { %v5390_v42 = vadd.f32 %v1320_v40, %v5387_v38  ;;  %v1325_v46 = vsub.f32 0.0, %v1319_v8 }
 0x8cc   :  { %v1322_v62 = vpop.f32.mrf.mxu1  ;;  %v4218_v2 = vpop.eup %4217 }
 0x8cd   :  { %4219 = vtanh.f32 %v5390_v42 }
 0x8ce   :  { %v1323_v56 = vpop.f32.mrf.mxu1  ;;  %4221 = vpow2.f32 %v1067_v15  ;;  %v1327_v15 = vmul.f32 1.442695, %v1325_v46  ;;  %v1143_v46 = vsub.f32 0.0, %v5371_v61 }
 0x8cf   :  { %4223 = vpow2.f32 %v990_v43 }
 0x8d8   :  { %v1158_v5 = vpop.permute.xlu1 %1157 }
 0x8d9   :  { %v1160_v7 = vmul.f32 %v4218_v2, %v1158_v5 }
 0x8da   :  { %v4220_v37 = vpop.eup %4219 }
 0x8db   :  { %1162 = vrot.lane.b32.xlu1 %v1160_v7, %s4832_s28  ;;  %v4222_v40 = vpop.eup %4221 }
 0x8dc   :  { %v1071_v62 = vadd.f32 1.0, %v4222_v40  ;;  %v4224_v56 = vpop.eup %4223 }
 0x8dd   :  { %v994_v1 = vadd.f32 1.0, %v4224_v56 }
 0x8de   :  { %4225 = vrcp.f32 %v1071_v62 }
 0x8df   :  { %1340 = vrot.lane.b32.xlu1 %v4220_v37, %s4832_s28  ;;  %4227 = vrcp.f32 %v994_v1  ;;  %v1155_v1 = vmul.f32 %v4218_v2, %v5229_v55 }
 0x8e0   :  { %4229 = vpow2.f32 %v1327_v15 }
 0x8eb   :  { %v4226_v5 = vpop.eup %4225 }
 0x8ec   :  { %v4228_v51 = vpop.eup %4227 }
 0x8ed   :  { %v4230_v43 = vpop.eup %4229  ;;  %v1001_v55 = vmul.f32 %v4228_v51, %v5225_v13 }
 0x8ee   :  { %v1331_v62 = vadd.f32 1.0, %v4230_v43  ;;  %v1146_v43 = vmul.f32 1.442695, %v1143_v46 }
 0x92d   :  { %v1081_v7 = vpop.permute.xlu0 %1080 }
 0x92e   :  { %v1083_v37 = vmul.f32 %v4226_v5, %v1081_v7 }
 0x930   :  { %1085 = vrot.lane.b32.xlu0 %v1083_v37, %s4832_s28 }
 0x931   :  { %v1004_v53 = vpop.permute.xlu0 %1003 }
 0x932   :  { %v1006_v41 = vmul.f32 %v4228_v51, %v1004_v53  ;;  %v1078_v53 = vmul.f32 %v4226_v5, %v5235_v14 }
 0x934   :  { %1008 = vrot.lane.b32.xlu0 %v1006_v41, %s4832_s28 }
 0x94d   :  { %v1163_v40 = vpop.permute.xlu1 %1162 }
 0x94e   :  { %v5404_v16 = vadd.f32 %v1163_v40, %v1155_v1 }
 0x950   :  { %4231 = vtanh.f32 %v5404_v16 }
 0x951   :  { %4233 = vrcp.f32 %v1331_v62  ;;  %v1341_v7 = vpop.permute.xlu1 %1340  ;;  %v5420_v62 = vld [vmem:[#allocation7 + $0x1f4] ss:$8 sps:$4 sm:$0xff]  }
 0x952   :  { %6764 = vst [vmem:[#allocation21_spill] sm:$0xff] %v5420_v62  ;;  %1775 = vmatprep.subr.bf16.mxu1 %v5420_v62  ;;  %v5485_v62 = vld [vmem:[#allocation7 + $0x4] ss:$8 sps:$4 sm:$0xff]  }
 0x95d   :  { %v4232_v56 = vpop.eup %4231 }
 0x95e   :  { %1168 = vrot.lane.b32.xlu1 %v4232_v56, %s4832_s28  ;;  %v4234_v24 = vpop.eup %4233 }
 0x95f   :  { %v1343_v37 = vmul.f32 %v4234_v24, %v1341_v7  ;;  %v1338_v56 = vmul.f32 0.0, %v4234_v24 }
 0x962   :  { %1345 = vrot.lane.b32.xlu1 %v1343_v37, %s4832_s28 }
 0x9a2   :  { %v1086_v8 = vpop.permute.xlu0 %1085 }
 0x9a3   :  { %v5410_v41 = vadd.f32 %v1086_v8, %v1078_v53  ;;  %v1066_v8 = vsub.f32 0.0, %v5377_v3 }
 0x9a5   :  { %6763 = vst [vmem:[#allocation20_spill] sm:$0xff] %v5410_v41  ;;  %4235 = vtanh.f32 %v5410_v41  ;;  %v5515_v41 = vld [vmem:[#allocation7 + $0x1a4] ss:$8 sps:$4 sm:$0xff]  }
 0x9a6   :  { %v1009_v2 = vpop.permute.xlu0 %1008  ;;  %6775 = vst [vmem:[#allocation31_spill] sm:$0xff] %v5515_v41 }
 0x9a7   :  { %v5415_v15 = vadd.f32 %v1009_v2, %v1001_v55  ;;  %v989_v55 = vsub.f32 0.0, %v5299_v63  ;;  %v1069_v2 = vmul.f32 1.442695, %v1066_v8  ;;  %v6766_v8 = vmov 0  }
 0x9a9   :  { %4237 = vtanh.f32 %v5415_v15  ;;  %v992_v46 = vmul.f32 1.442695, %v989_v55  ;;  %v5444_v55 = vld [vmem:[#allocation7 + $0x64] ss:$8 sps:$4 sm:$0xff]  }
 0x9aa   :  { %4239 = vpow2.f32 %v1146_v43 }
 0x9b2   :  { %v4236_v1 = vpop.eup %4235 }
 0x9b3   :  { %1091 = vrot.lane.b32.xlu0 %v4236_v1, %s4832_s28 }
 0x9b6   :  { %v4238_v14 = vpop.eup %4237 }
 0x9b7   :  { %1014 = vrot.lane.b32.xlu0 %v4238_v14, %s4832_s28  ;;  %v4240_v5 = vpop.eup %4239 }
 0x9b8   :  { %v1149_v40 = vadd.f32 1.0, %v4240_v5 }
 0x9ba   :  { %4241 = vrcp.f32 %v1149_v40 }
 0x9c7   :  { %v4242_v13 = vpop.eup %4241 }
 0x9d0   :  { %v1169_v61 = vpop.permute.xlu1 %1168 }
 0x9d1   :  { %v5423_v51 = vmul.f32 %v4242_v13, %v1169_v61 }
 0x9d3   :  { %1510 = vrot.lane.b32.xlu1 %v5423_v51, %s4832_s28 }
 0x9d4   :  { %v1346_v7 = vpop.permute.xlu1 %1345 }
 0x9d5   :  { %v5427_v37 = vadd.f32 %v1346_v7, %v1338_v56  ;;  %v1326_v7 = vsub.f32 0.0, %v5390_v42  ;;  %v5453_v42 = vld [vmem:[#allocation7 + $0x50] ss:$8 sps:$4 sm:$0xff]  }
 0x9d7   :  { %6765 = vst [vmem:[#allocation22_spill] sm:$0xff] %v5427_v37  ;;  %4243 = vtanh.f32 %v5427_v37 }
 0x9d8   :  { %4245 = vpow2.f32 %v1069_v2  ;;  %v1329_v2 = vmul.f32 1.442695, %v1326_v7 }
 0x9d9   :  { %4247 = vpow2.f32 %v992_v46  ;;  %v5447_v46 = vld [vmem:[#allocation7 + $0x60] ss:$8 sps:$4 sm:$0xff]  }
 0x9e4   :  { %v4244_v53 = vpop.eup %4243 }
 0x9e5   :  { %1351 = vrot.lane.b32.xlu1 %v4244_v53, %s4832_s28  ;;  %v4246_v43 = vpop.eup %4245  ;;  %v5440_v53 = vld [vmem:[#allocation7 + $0x70] ss:$8 sps:$4 sm:$0xff]  }
 0x9e6   :  { %v1072_v1 = vadd.f32 1.0, %v4246_v43  ;;  %v4248_v14 = vpop.eup %4247  ;;  %v5450_v43 = vld [vmem:[#allocation7 + $0x54] ss:$8 sps:$4 sm:$0xff]  }
 0x9e7   :  { %v995_v24 = vadd.f32 1.0, %v4248_v14  ;;  %v5459_v14 = vld [vmem:[#allocation7 + $0x40] ss:$8 sps:$4 sm:$0xff]  }
 0x9e8   :  { %4249 = vrcp.f32 %v1072_v1  ;;  %v5456_v1 = vld [vmem:[#allocation7 + $0x44] ss:$8 sps:$4 sm:$0xff]  }
 0x9e9   :  { %4251 = vrcp.f32 %v995_v24  ;;  %v5462_v24 = vld [vmem:[#allocation7 + $0x34] ss:$8 sps:$4 sm:$0xff]  }
 0x9ea   :  { %4253 = vpow2.f32 %v1329_v2 }
 0x9f5   :  { %v4250_v5 = vpop.eup %4249 }
 0x9f6   :  { %v4252_v61 = vpop.eup %4251 }
 0xa25   :  { %v1092_v40 = vpop.permute.xlu0 %1091 }
 0xa26   :  { %v1094_v13 = vmul.f32 %v4250_v5, %v1092_v40  ;;  %v5465_v5 = vld [vmem:[#allocation7 + $0x30] ss:$8 sps:$4 sm:$0xff]   ;;  %v5468_v40 = vld [vmem:[#allocation7 + $0x24] ss:$8 sps:$4 sm:$0xff]  }
 0xa28   :  { %1433 = vrot.lane.b32.xlu0 %v1094_v13, %s4832_s28 }
 0xa29   :  { %v1015_v56 = vpop.permute.xlu0 %1014 }
 0xa2a   :  { %v5434_v3 = vmul.f32 %v4252_v61, %v1015_v56  ;;  %v4254_v61 = vpop.eup %4253  ;;  %v5471_v56 = vld [vmem:[#allocation7 + $0x20] ss:$8 sps:$4 sm:$0xff]  }
 0xa2b   :  { %v1332_v2 = vadd.f32 1.0, %v4254_v61  ;;  %v5489_v61 = vld [vmem:[#allocation7 + $0x1e0] ss:$8 sps:$4 sm:$0xff]  }
 0xa2c   :  { %v1355_v63 = vpack.c.bf16 %v5434_v3, %v5434_v3  ;;  %6769 = vst [vmem:[#allocation25_spill] sm:$0xff] %v5489_v61 }
 0xa2d   :  { %4255 = vrcp.f32 %v1332_v2  ;;  %v5506_v2 = vld [vmem:[#allocation7 + $0x1c0] ss:$8 sps:$4 sm:$0xff]  }
 0xa2e   :  { %3962 = vmatmul.mubr.msk.bf16.vlgmr.msra.gmra.mxu0 %vm268_vm3, %v1355_v63  ;;  %v5474_v63 = vld [vmem:[#allocation7 + $0x14] ss:$8 sps:$4 sm:$0xff]   ;;  %6773 = vst [vmem:[#allocation29_spill] sm:$0xff] %v5506_v2 }
 0xa2f   :  { %1439 = vmatpush1.bf16.msra.mxu0 %v5440_v53  ;;  %1470 = vmatprep.mubr.bf16.mxu0 %v6766_v8 }
 0xa30   :  { %1440 = vmatprep.subr.bf16.mxu0 %v5444_v55 }
 0xa33   :  { %1441 = vmatpush1.bf16.msra.mxu0 %v5447_v46 }
 0xa34   :  { %1442 = vmatprep.subr.bf16.mxu0 %v5450_v43 }
 0xa37   :  { %1443 = vmatpush1.bf16.msra.mxu0 %v5453_v42 }
 0xa38   :  { %1444 = vmatprep.subr.bf16.mxu0 %v5456_v1 }
 0xa3a   :  { %v4256_v37 = vpop.eup %4255 }
 0xa3b   :  { %1445 = vmatpush1.bf16.msra.mxu0 %v5459_v14 }
 0xa3c   :  { %1446 = vmatprep.subr.bf16.mxu0 %v5462_v24 }
 0xa3f   :  { %1447 = vmatpush1.bf16.msra.mxu0 %v5465_v5 }
 0xa40   :  { %1448 = vmatprep.subr.bf16.mxu0 %v5468_v40 }
 0xa43   :  { %1449 = vmatpush1.bf16.msra.mxu0 %v5471_v56 }
 0xa44   :  { %1450 = vmatprep.subr.bf16.mxu0 %v5474_v63 }
 0xa45   :  { %v1511_v7 = vpop.permute.xlu1 %1510 }
 0xa46   :  { %v1513_v35 = vsel %vm268_vm3, %v1094_v13, %v1511_v7  ;;  %v5495_v13 = vld [vmem:[#allocation7] ss:$8 sps:$4 sm:$0xff]   ;;  %v5503_v7 = vld [vmem:[#allocation7 + $0x1c4] ss:$8 sps:$4 sm:$0xff]  }
 0xa47   :  { %v1514_v34 = vpack.c.bf16 %v1513_v35, %v1513_v35  ;;  %1451 = vmatpush1.bf16.msra.mxu0 %v5482_v32  ;;  %v5493_v35 = vld [vmem:[#allocation7 + $0x1d4] ss:$8 sps:$4 sm:$0xff]   ;;  %6772 = vst [vmem:[#allocation28_spill] sm:$0xff] %v5503_v7 }
 0xa48   :  { %1452 = vmatprep.subr.bf16.mxu0 %v5485_v62  ;;  %6770 = vst [vmem:[#allocation26_spill] sm:$0xff] %v5493_v35 }
 0xa49   :  { %1548 = vmatmul.mubr.bf16.vlgmr.msra.gmra.mxu1 %v1514_v34  ;;  %v5500_v34 = vld [vmem:[#allocation7 + $0x1d0] ss:$8 sps:$4 sm:$0xff]  }
 0xa4a   :  { %1776 = vmatpush1.bf16.msra.mxu1 %v5478_v4  ;;  %1807 = vmatprep.mubr.bf16.mxu1 %v6766_v8  ;;  %6771 = vst [vmem:[#allocation27_spill] sm:$0xff] %v5500_v34  ;;  %v5512_v4 = vld [vmem:[#allocation7 + $0x1b0] ss:$8 sps:$4 sm:$0xff]  }
 0xa4b   :  { %1777 = vmatprep.subr.bf16.mxu1 %v5480_v33  ;;  %1453 = vmatpush1.bf16.msra.mxu0 %v5495_v13  ;;  %v5509_v33 = vld [vmem:[#allocation7 + $0x1b4] ss:$8 sps:$4 sm:$0xff]  }
 0xa4c   :  { %1592 = vmatprep.subr.bf16.mxu0 %v5269_v52  ;;  %6774 = vst [vmem:[#allocation30_spill] sm:$0xff] %v5509_v33 }
 0xa4e   :  { %1778 = vmatpush1.bf16.msra.mxu1 %v5489_v61 }
 0xa4f   :  { %1779 = vmatprep.subr.bf16.mxu1 %v5493_v35 }
 0xa52   :  { %1780 = vmatpush1.bf16.msra.mxu1 %v5500_v34  ;;  %v5519_v34 = vld [vmem:[#allocation7 + $0x1a0] ss:$8 sps:$4 sm:$0xff]  }
 0xa53   :  { %1781 = vmatprep.subr.bf16.mxu1 %v5503_v7  ;;  %v5522_v7 = vld [vmem:[#allocation7 + $0x194] ss:$8 sps:$4 sm:$0xff]  }
 0xa56   :  { %1782 = vmatpush1.bf16.msra.mxu1 %v5506_v2  ;;  %v5525_v2 = vld [vmem:[#allocation7 + $0x190] ss:$8 sps:$4 sm:$0xff]  }
 0xa57   :  { %v1352_v61 = vpop.permute.xlu1 %1351  ;;  %1783 = vmatprep.subr.bf16.mxu1 %v5509_v33  ;;  %v5528_v33 = vld [vmem:[#allocation7 + $0x184] ss:$8 sps:$4 sm:$0xff]  }
 0xa58   :  { %v1354_v35 = vmul.f32 %v4256_v37, %v1352_v61  ;;  %v5531_v37 = vld [vmem:[#allocation7 + $0x180] ss:$8 sps:$4 sm:$0xff]  }
 0xa5a   :  { %1784 = vmatpush1.bf16.msra.mxu1 %v5512_v4  ;;  %1587 = vrot.lane.b32.xlu1 %v1354_v35, %s4832_s28  ;;  %v3981_v61 = vpack.c.bf16 %v1354_v35, %v1354_v35 }
 0xa5b   :  { %1785 = vmatprep.subr.bf16.mxu1 %v5515_v41  ;;  %v5535_v41 = vld [vmem:[#allocation7 + $0x74] ss:$8 sps:$4 sm:$0xff]  }
 0xa5e   :  { %1786 = vmatpush1.bf16.msra.mxu1 %v5519_v34 }
 0xa5f   :  { %1787 = vmatprep.subr.bf16.mxu1 %v5522_v7 }
 0xa62   :  { %1788 = vmatpush1.bf16.msra.mxu1 %v5525_v2 }
 0xa63   :  { %1789 = vmatprep.subr.bf16.mxu1 %v5528_v33 }
 0xa66   :  { %1790 = vmatpush1.bf16.msra.mxu1 %v5531_v37 }
 0xa67   :  { %1929 = vmatprep.subr.bf16.mxu1 %v5535_v41 }
 0xa69   :  { %3982 = vmatmul.mubr.msk.bf16.vlgmr.msra.gmra.mxu1 %vm5030_vm4, %v3981_v61 }
 0xa6a   :  { %1930 = vmatpush1.bf16.msra.mxu1 %v5440_v53  ;;  %1961 = vmatprep.mubr.bf16.mxu1 %v6766_v8 }
 0xa6b   :  { %1931 = vmatprep.subr.bf16.mxu1 %v5444_v55 }
 0xa6e   :  { %1932 = vmatpush1.bf16.msra.mxu1 %v5447_v46 }
 0xa6f   :  { %1933 = vmatprep.subr.bf16.mxu1 %v5450_v43 }
 0xa72   :  { %1934 = vmatpush1.bf16.msra.mxu1 %v5453_v42 }
 0xa73   :  { %1935 = vmatprep.subr.bf16.mxu1 %v5456_v1 }
 0xa76   :  { %1936 = vmatpush1.bf16.msra.mxu1 %v5459_v14 }
 0xa77   :  { %1937 = vmatprep.subr.bf16.mxu1 %v5462_v24 }
 0xa7a   :  { %1938 = vmatpush1.bf16.msra.mxu1 %v5465_v5 }
 0xa7b   :  { %1939 = vmatprep.subr.bf16.mxu1 %v5468_v40 }
 0xa7e   :  { %1940 = vmatpush1.bf16.msra.mxu1 %v5471_v56 }
 0xa7f   :  { %1941 = vmatprep.subr.bf16.mxu1 %v5474_v63 }
 0xa82   :  { %1942 = vmatpush1.bf16.msra.mxu1 %v5482_v32 }
 0xa83   :  { %1943 = vmatprep.subr.bf16.mxu1 %v5485_v62 }
 0xa86   :  { %1944 = vmatpush1.bf16.msra.mxu1 %v5495_v13 }
 0xa87   :  { %2083 = vmatprep.subr.bf16.mxu1 %v5269_v52 }
 0xa9a   :  { %v1434_v18 = vpop.permute.xlu0 %1433 }
 0xa9b   :  { %v1436_v35 = vsel %vm268_vm3, %v5434_v3, %v1434_v18 }
 0xa9c   :  { %v1437_v61 = vpack.c.bf16 %v1436_v35, %v1436_v35 }
 0xa9e   :  { %1471 = vmatmul.mubr.bf16.vlgmr.msra.gmra.mxu0 %v1437_v61 }
 0xa9f   :  { %1593 = vmatpush1.bf16.msra.mxu0 %v5303_v17  ;;  %1624 = vmatprep.mubr.bf16.mxu0 %v6766_v8 }
 0xaa0   :  { %1594 = vmatprep.subr.bf16.mxu0 %v5305_v27 }
 0xaa3   :  { %1595 = vmatpush1.bf16.msra.mxu0 %v5308_v28  ;;  %v5584_v28 = vld [vmem:[#allocation5 + $0x4] ss:$8 sps:$4 sm:$0xff]  }
 0xaa4   :  { %1596 = vmatprep.subr.bf16.mxu0 %v5312_v29  ;;  %v5590_v29 = vld [vmem:[#allocation7 + $0xf4] ss:$8 sps:$4 sm:$0xff]  }
 0xaa7   :  { %1597 = vmatpush1.bf16.msra.mxu0 %v5315_v59 }
 0xaa8   :  { %1598 = vmatprep.subr.bf16.mxu0 %v5318_v49 }
 0xaab   :  { %1599 = vmatpush1.bf16.msra.mxu0 %v5321_v44 }
 0xaac   :  { %1600 = vmatprep.subr.bf16.mxu0 %v5324_v45 }
 0xaaf   :  { %1601 = vmatpush1.bf16.msra.mxu0 %v5327_v47 }
 0xab0   :  { %1602 = vmatprep.subr.bf16.mxu0 %v5330_v9 }
 0xab3   :  { %1603 = vmatpush1.bf16.msra.mxu0 %v5333_v50 }
 0xab4   :  { %1604 = vmatprep.subr.bf16.mxu0 %v5336_v57 }
 0xab7   :  { %1605 = vmatpush1.bf16.msra.mxu0 %v5339_v19  ;;  %v3963_v19 = vld [vmem:[%s6691_s4 + $0x8] sm:$0x3] }
 0xab8   :  { %1606 = vmatprep.subr.bf16.mxu0 %v5342_v0  ;;  %v5610_v0 = vrot.slane %v3963_v19, %v4947_v23 }
 0xaba   :  { %6776 = vst [vmem:[#allocation32_spill] sm:$0xff] %v5610_v0 }
 0xabb   :  { %1607 = vmatpush1.bf16.msra.mxu0 %v5345_v25 }
 0xabc   :  { %1858 = vmatprep.subr.bf16.mxu0 %v5265_v60  ;;  %v5587_v60 = vld [vmem:[#allocation5] ss:$8 sps:$4 sm:$0xff]  }
 0xacc   :  { %v1588_v52 = vpop.permute.xlu1 %1587 }
 0xacd   :  { %v1590_v17 = vsel %vm268_vm3, %v5423_v51, %v1588_v52 }
 0xace   :  { %v1591_v27 = vpack.c.bf16 %v1590_v17, %v1590_v17 }
 0xad0   :  { %1625 = vmatmul.mubr.bf16.vlgmr.msra.gmra.mxu0 %v1591_v27 }
 0xad1   :  { %1859 = vmatpush1.bf16.msra.mxu0 %v5274_v48  ;;  %1882 = vmatprep.mubr.bf16.mxu0 %v6766_v8  ;;  %v202_v48 = vadd.f32 %v5070_v30, %v4945_v22 }
 0xad2   :  { %1860 = vmatprep.subr.bf16.mxu0 %v5278_v11 }
 0xad5   :  { %1861 = vmatpush1.bf16.msra.mxu0 %v5281_v6  ;;  %v204_v6 = vadd.f32 %v5072_v31, %v4951_v26 }
 0xad6   :  { %1862 = vmatprep.subr.bf16.mxu0 %v5284_v21 }
 0xad9   :  { %1863 = vmatpush1.bf16.msra.mxu0 %v5287_v58 }
 0xada   :  { %1864 = vmatprep.subr.bf16.mxu0 %v5584_v28 }
 0xadd   :  { %1865 = vmatpush1.bf16.msra.mxu0 %v5587_v60 }
 0xade   :  { %2006 = vmatprep.subr.bf16.mxu0 %v5590_v29 }
 0xaee   :  { %v1393_v11 = vpop.f32.mrf.mxu0 }
 0xaef   :  { %v1400_v21 = vadd.f32 %v1393_v11, %v202_v48 }
 0xaf0   :  { %v1395_v58 = vpop.f32.mrf.mxu0 }
 0xaf1   :  { %v5597_v59 = vadd.f32 %v1395_v58, %v204_v6  ;;  %v1402_v52 = vsub.f32 0.0, %v1400_v21 }
 0xaf2   :  { %v1397_v49 = vpop.f32.mrf.mxu0 }
 0xaf3   :  { %4257 = vtanh.f32 %v5597_v59  ;;  %v1404_v17 = vmul.f32 1.442695, %v1402_v52 }
 0xaf4   :  { %v1398_v44 = vpop.f32.mrf.mxu0 }
 0xb00   :  { %v4258_v45 = vpop.eup %4257 }
 0xb01   :  { %1417 = vrot.lane.b32.xlu1 %v4258_v45, %s4832_s28 }
 0xb09   :  { %v1549_v47 = vpop.f32.mrf.mxu1 }
 0xb0a   :  { %v1550_v23 = vadd.f32 %v1549_v47, %v5212_v10 }
 0xb0b   :  { %v1551_v9 = vpop.f32.mrf.mxu1 }
 0xb0c   :  { %v5602_v50 = vadd.f32 %v1551_v9, %v5204_v54  ;;  %v1556_v45 = vsub.f32 0.0, %v1550_v23 }
 0xb0d   :  { %v1553_v30 = vpop.f32.mrf.mxu1 }
 0xb0e   :  { %4259 = vtanh.f32 %v5602_v50  ;;  %v1558_v9 = vmul.f32 1.442695, %v1556_v45 }
 0xb0f   :  { %v1554_v31 = vpop.f32.mrf.mxu1 }
 0xb1b   :  { %v4260_v57 = vpop.eup %4259 }
 0xb1c   :  { %1571 = vrot.lane.b32.xlu0 %v4260_v57, %s4832_s28 }
 0xb29   :  { %v1809_v25 = vpop.f32.mrf.mxu1 }
 0xb2b   :  { %v1811_v51 = vpop.f32.mrf.mxu1 }
 0xb2c   :  { %v5613_v3 = vadd.f32 %v1811_v51, %v5610_v0 }
 0xb2d   :  { %v1813_v18 = vpop.f32.mrf.mxu1 }
 0xb2e   :  { %4261 = vtanh.f32 %v5613_v3  ;;  %v5625_v18 = vrot.slane %v3963_v19, %v4939_v20 }
 0xb2f   :  { %v1814_v35 = vpop.f32.mrf.mxu1  ;;  %4263 = vpow2.f32 %v1404_v17 }
 0xb30   :  { %6777 = vst [vmem:[#allocation33_spill] sm:$0xff] %v5625_v18  ;;  %v1810_v35 = vadd.f32 %v1809_v25, %v5625_v18 }
 0xb3b   :  { %v4262_v61 = vpop.eup %4261 }
 0xb3c   :  { %1831 = vrot.lane.b32.xlu0 %v4262_v61, %s4832_s28  ;;  %v4264_v48 = vpop.eup %4263  ;;  %v1816_v61 = vsub.f32 0.0, %v1810_v35 }
 0xb3d   :  { %v1408_v58 = vadd.f32 1.0, %v4264_v48 }
 0xb3e   :  { %v1818_v52 = vmul.f32 1.442695, %v1816_v61 }
 0xb5e   :  { %v1472_v27 = vpop.f32.mrf.mxu0 }
 0xb60   :  { %v1474_v11 = vpop.f32.mrf.mxu0 }
 0xb61   :  { %v5619_v6 = vadd.f32 %v1474_v11, %v5091_v39 }
 0xb62   :  { %v1476_v49 = vpop.f32.mrf.mxu0 }
 0xb63   :  { %4265 = vtanh.f32 %v5619_v6 }
 0xb64   :  { %v1477_v44 = vpop.f32.mrf.mxu0  ;;  %4267 = vrcp.f32 %v1408_v58 }
 0xb65   :  { %4269 = vpow2.f32 %v1558_v9 }
 0xb70   :  { %v4266_v21 = vpop.eup %4265 }
 0xb71   :  { %1494 = vrot.lane.b32.xlu1 %v4266_v21, %s4832_s28  ;;  %v4268_v30 = vpop.eup %4267 }
 0xb72   :  { %v4270_v47 = vpop.eup %4269 }
 0xb73   :  { %v1418_v31 = vpop.permute.xlu1 %1417  ;;  %v1562_v51 = vadd.f32 1.0, %v4270_v47 }
 0xb74   :  { %v1420_v57 = vmul.f32 %v4268_v30, %v1418_v31 }
 0xb75   :  { %4271 = vrcp.f32 %v1562_v51 }
 0xb76   :  { %1422 = vrot.lane.b32.xlu1 %v1420_v57, %s4832_s28  ;;  %4273 = vpow2.f32 %v1818_v52  ;;  %v1473_v57 = vadd.f32 %v1472_v27, %v5098_v12 }
 0xb78   :  { %v1479_v47 = vsub.f32 0.0, %v1473_v57 }
 0xb7a   :  { %v1481_v51 = vmul.f32 1.442695, %v1479_v47 }
 0xb82   :  { %v4272_v17 = vpop.eup %4271 }
 0xb83   :  { %v4274_v19 = vpop.eup %4273 }
 0xb84   :  { %v1822_v45 = vadd.f32 1.0, %v4274_v19 }
 0xb8e   :  { %v1572_v48 = vpop.permute.xlu0 %1571 }
 0xb8f   :  { %v1574_v11 = vmul.f32 %v4272_v17, %v1572_v48 }
 0xb90   :  { %v1626_v23 = vpop.f32.mrf.mxu0 }
 0xb91   :  { %1576 = vrot.lane.b32.xlu0 %v1574_v11, %s4832_s28 }
 0xb92   :  { %v1628_v58 = vpop.f32.mrf.mxu0 }
 0xb93   :  { %v5630_v49 = vadd.f32 %v1628_v58, %v5387_v38  ;;  %v1627_v58 = vadd.f32 %v1626_v23, %v5398_v36 }
 0xb94   :  { %v1630_v44 = vpop.f32.mrf.mxu0 }
 0xb95   :  { %4275 = vtanh.f32 %v5630_v49  ;;  %v1633_v44 = vsub.f32 0.0, %v1627_v58 }
 0xb96   :  { %v1631_v20 = vpop.f32.mrf.mxu0  ;;  %4277 = vrcp.f32 %v1822_v45  ;;  %v1569_v45 = vmul.f32 %v4272_v17, %v5404_v16 }
 0xb97   :  { %4279 = vpow2.f32 %v1481_v51  ;;  %v1635_v20 = vmul.f32 1.442695, %v1633_v44 }
 0xba2   :  { %v4276_v25 = vpop.eup %4275 }
 0xba3   :  { %1648 = vrot.lane.b32.xlu0 %v4276_v25, %s4832_s28  ;;  %v4278_v9 = vpop.eup %4277 }
 0xba4   :  { %v4280_v35 = vpop.eup %4279 }
 0xba5   :  { %v1485_v61 = vadd.f32 1.0, %v4280_v35 }
 0xba7   :  { %4281 = vrcp.f32 %v1485_v61 }
 0xba8   :  { %4283 = vpow2.f32 %v1635_v20 }
 0xbae   :  { %v1832_v21 = vpop.permute.xlu0 %1831 }
 0xbaf   :  { %v1834_v31 = vmul.f32 %v4278_v9, %v1832_v21 }
 0xbb1   :  { %1836 = vrot.lane.b32.xlu1 %v1834_v31, %s4832_s28  ;;  %v1415_v31 = vmul.f32 %v4268_v30, %v5415_v15  ;;  %v1829_v15 = vmul.f32 0.0, %v4278_v9 }
 0xbb4   :  { %v4282_v52 = vpop.eup %4281 }
 0xbb5   :  { %v4284_v19 = vpop.eup %4283 }
 0xbb6   :  { %v1639_v21 = vadd.f32 1.0, %v4284_v19  ;;  %v1557_v19 = vsub.f32 0.0, %v5602_v50 }
 0xbb8   :  { %v1560_v9 = vmul.f32 1.442695, %v1557_v19 }
 0xbe3   :  { %v1495_v48 = vpop.permute.xlu1 %1494 }
 0xbe4   :  { %v1497_v11 = vmul.f32 %v4282_v52, %v1495_v48 }
 0xbe6   :  { %1499 = vrot.lane.b32.xlu0 %v1497_v11, %s4832_s28  ;;  %v6778_v11 = vld [vmem:[#allocation20_spill] sm:$0xff] }
 0xbe7   :  { %v1492_v58 = vmul.f32 %v4282_v52, %v6778_v11 }
 0xbe8   :  { %v1423_v27 = vpop.permute.xlu1 %1422 }
 0xbe9   :  { %v5642_v47 = vadd.f32 %v1423_v27, %v1415_v31 }
 0xc03   :  { %v1577_v25 = vpop.permute.xlu0 %1576 }
 0xc04   :  { %v5640_v57 = vadd.f32 %v1577_v25, %v1569_v45  ;;  %v1403_v45 = vsub.f32 0.0, %v5597_v59 }
 0xc06   :  { %4285 = vtanh.f32 %v5640_v57  ;;  %v1406_v27 = vmul.f32 1.442695, %v1403_v45  ;;  %v5674_v45 = vld [vmem:[#allocation7 + $0xf0] ss:$8 sps:$4 sm:$0xff]  }
 0xc07   :  { %4287 = vrcp.f32 %v1639_v21 }
 0xc08   :  { %4289 = vtanh.f32 %v5642_v47 }
 0xc13   :  { %v4286_v23 = vpop.eup %4285 }
 0xc14   :  { %1582 = vrot.lane.b32.xlu1 %v4286_v23, %s4832_s28  ;;  %v4288_v51 = vpop.eup %4287 }
 0xc15   :  { %v1649_v35 = vpop.permute.xlu0 %1648  ;;  %v4290_v17 = vpop.eup %4289 }
 0xc16   :  { %v1651_v16 = vmul.f32 %v4288_v51, %v1649_v35  ;;  %v1817_v35 = vsub.f32 0.0, %v5613_v3 }
 0xc18   :  { %1653 = vrot.lane.b32.xlu0 %v1651_v16, %s4832_s28  ;;  %1428 = vrot.lane.b32.xlu1 %v4290_v17, %s4832_s28  ;;  %v1820_v16 = vmul.f32 1.442695, %v1817_v35  ;;  %v5694_v35 = vld [vmem:[#allocation7 + $0xc0] ss:$8 sps:$4 sm:$0xff]  }
 0xc19   :  { %6780 = vst [vmem:[#allocation20_spill] sm:$0xff] %v5694_v35 }
 0xc23   :  { %v1837_v30 = vpop.permute.xlu1 %1836 }
 0xc24   :  { %v5649_v61 = vadd.f32 %v1837_v30, %v1829_v15  ;;  %v6779_v15 = vld [vmem:[#allocation22_spill] sm:$0xff] }
 0xc25   :  { %v1646_v30 = vmul.f32 %v4288_v51, %v6779_v15  ;;  %v5678_v51 = vld [vmem:[#allocation7 + $0xe4] ss:$8 sps:$4 sm:$0xff]   ;;  %v5706_v15 = vld [vmem:[#allocation7 + $0xa0] ss:$8 sps:$4 sm:$0xff]  }
 0xc26   :  { %4291 = vtanh.f32 %v5649_v61  ;;  %6784 = vst [vmem:[#allocation36_spill] sm:$0xff] %v5706_v15 }
 0xc33   :  { %v4292_v48 = vpop.eup %4291 }
 0xc34   :  { %1842 = vrot.lane.b32.xlu0 %v4292_v48, %s4832_s28 }
 0xc58   :  { %v1500_v44 = vpop.permute.xlu0 %1499 }
 0xc59   :  { %v5654_v20 = vadd.f32 %v1500_v44, %v1492_v58 }
 0xc5b   :  { %4293 = vtanh.f32 %v5654_v20 }
 0xc5c   :  { %4295 = vpow2.f32 %v1560_v9 }
 0xc5d   :  { %4297 = vpow2.f32 %v1406_v27  ;;  %v5681_v27 = vld [vmem:[#allocation7 + $0xe0] ss:$8 sps:$4 sm:$0xff]  }
 0xc68   :  { %v4294_v25 = vpop.eup %4293 }
 0xc69   :  { %1505 = vrot.lane.b32.xlu1 %v4294_v25, %s4832_s28  ;;  %v4296_v21 = vpop.eup %4295 }
 0xc6a   :  { %v1563_v31 = vadd.f32 1.0, %v4296_v21  ;;  %v4298_v23 = vpop.eup %4297  ;;  %v5684_v21 = vld [vmem:[#allocation7 + $0xd4] ss:$8 sps:$4 sm:$0xff]  }
 0xc6b   :  { %v1409_v52 = vadd.f32 1.0, %v4298_v23  ;;  %v5690_v23 = vld [vmem:[#allocation7 + $0xc4] ss:$8 sps:$4 sm:$0xff]  }
 0xc6c   :  { %4299 = vrcp.f32 %v1563_v31  ;;  %v5687_v31 = vld [vmem:[#allocation7 + $0xd0] ss:$8 sps:$4 sm:$0xff]  }
 0xc6d   :  { %4301 = vrcp.f32 %v1409_v52 }
 0xc6e   :  { %4303 = vpow2.f32 %v1820_v16  ;;  %v5697_v16 = vld [vmem:[#allocation7 + $0xb4] ss:$8 sps:$4 sm:$0xff]  }
 0xc6f   :  { %6781 = vst [vmem:[#allocation22_spill] sm:$0xff] %v5697_v16 }
 0xc79   :  { %v4300_v50 = vpop.eup %4299 }
 0xc7a   :  { %v4302_v48 = vpop.eup %4301 }
 0xc7b   :  { %v4304_v9 = vpop.eup %4303 }
 0xc7c   :  { %v1823_v25 = vadd.f32 1.0, %v4304_v9  ;;  %v5716_v9 = vld [vmem:[#allocation7 + $0x84] ss:$8 sps:$4 sm:$0xff]  }
 0xc7d   :  { %6787 = vst [vmem:[#allocation39_spill] sm:$0xff] %v5716_v9 }
 0xc86   :  { %v1583_v17 = vpop.permute.xlu1 %1582 }
 0xc87   :  { %v5661_v59 = vmul.f32 %v4300_v50, %v1583_v17  ;;  %v5700_v50 = vld [vmem:[#allocation7 + $0xb0] ss:$8 sps:$4 sm:$0xff]   ;;  %v5703_v17 = vld [vmem:[#allocation7 + $0xa4] ss:$8 sps:$4 sm:$0xff]  }
 0xc88   :  { %6782 = vst [vmem:[#allocation34_spill] sm:$0xff] %v5700_v50  ;;  %6783 = vst [vmem:[#allocation35_spill] sm:$0xff] %v5703_v17 }
 0xc89   :  { %2001 = vrot.lane.b32.xlu0 %v5661_v59, %s4832_s28 }
 0xc8a   :  { %v1654_v11 = vpop.permute.xlu0 %1653  ;;  %v1429_v58 = vpop.permute.xlu1 %1428 }
 0xc8b   :  { %v5666_v44 = vadd.f32 %v1654_v11, %v1646_v30  ;;  %v5668_v19 = vmul.f32 %v4302_v48, %v1429_v58  ;;  %v5709_v30 = vld [vmem:[#allocation7 + $0x94] ss:$8 sps:$4 sm:$0xff]  }
 0xc8c   :  { %6785 = vst [vmem:[#allocation37_spill] sm:$0xff] %v5709_v30 }
 0xc8d   :  { %4305 = vtanh.f32 %v5666_v44  ;;  %v1846_v3 = vpack.c.bf16 %v5668_v19, %v5668_v19 }
 0xc8e   :  { %4307 = vrcp.f32 %v1823_v25  ;;  %v5719_v25 = vld [vmem:[#allocation7 + $0x80] ss:$8 sps:$4 sm:$0xff]  }
 0xc8f   :  { %3983 = vmatmul.mubr.msk.bf16.vlgmr.msra.gmra.mxu0 %vm268_vm3, %v1846_v3  ;;  %v5712_v3 = vld [vmem:[#allocation7 + $0x90] ss:$8 sps:$4 sm:$0xff]   ;;  %6788 = vst [vmem:[#allocation40_spill] sm:$0xff] %v5719_v25 }
 0xc90   :  { %2007 = vmatpush1.bf16.msra.mxu0 %v5674_v45  ;;  %2038 = vmatprep.mubr.bf16.mxu0 %v6766_v8  ;;  %6786 = vst [vmem:[#allocation38_spill] sm:$0xff] %v5712_v3 }
 0xc91   :  { %2008 = vmatprep.subr.bf16.mxu0 %v5678_v51 }
 0xc94   :  { %2009 = vmatpush1.bf16.msra.mxu0 %v5681_v27 }
 0xc95   :  { %2010 = vmatprep.subr.bf16.mxu0 %v5684_v21 }
 0xc98   :  { %2011 = vmatpush1.bf16.msra.mxu0 %v5687_v31 }
 0xc99   :  { %2012 = vmatprep.subr.bf16.mxu0 %v5690_v23 }
 0xc9a   :  { %v4306_v52 = vpop.eup %4305 }
 0xc9b   :  { %1659 = vrot.lane.b32.xlu1 %v4306_v52, %s4832_s28  ;;  %v4308_v48 = vpop.eup %4307  ;;  %v6789_v52 = vld [vmem:[#allocation21_spill] sm:$0xff] }
 0xc9c   :  { %2013 = vmatpush1.bf16.msra.mxu0 %v5694_v35 }
 0xc9d   :  { %2014 = vmatprep.subr.bf16.mxu0 %v5697_v16 }
 0xca0   :  { %2015 = vmatpush1.bf16.msra.mxu0 %v5700_v50 }
 0xca1   :  { %2016 = vmatprep.subr.bf16.mxu0 %v5703_v17 }
 0xca4   :  { %2017 = vmatpush1.bf16.msra.mxu0 %v5706_v15 }
 0xca5   :  { %2018 = vmatprep.subr.bf16.mxu0 %v5709_v30  ;;  %v1480_v30 = vsub.f32 0.0, %v5619_v6 }
 0xca6   :  { %v1843_v11 = vpop.permute.xlu0 %1842 }
 0xca7   :  { %v1845_v58 = vmul.f32 %v4308_v48, %v1843_v11  ;;  %v1483_v15 = vmul.f32 1.442695, %v1480_v30  ;;  %v6791_v30 = vld [vmem:[#allocation24_spill] sm:$0xff] }
 0xca8   :  { %2019 = vmatpush1.bf16.msra.mxu0 %v5712_v3 }
 0xca9   :  { %2155 = vrot.lane.b32.xlu0 %v1845_v58, %s4832_s28  ;;  %2020 = vmatprep.subr.bf16.mxu0 %v5716_v9  ;;  %4309 = vpow2.f32 %v1483_v15  ;;  %v1634_v9 = vsub.f32 0.0, %v5630_v49  ;;  %v6790_v15 = vld [vmem:[#allocation23_spill] sm:$0xff] }
 0xcaa   :  { %v6794_v49 = vld [vmem:[#allocation27_spill] sm:$0xff] }
 0xcab   :  { %v1637_v50 = vmul.f32 1.442695, %v1634_v9 }
 0xcac   :  { %2021 = vmatpush1.bf16.msra.mxu0 %v5719_v25 }
 0xcad   :  { %2160 = vmatprep.subr.bf16.mxu0 %v6789_v52 }
 0xcb6   :  { %v4310_v48 = vpop.eup %4309 }
 0xcb7   :  { %v1486_v11 = vadd.f32 1.0, %v4310_v48  ;;  %v6797_v48 = vld [vmem:[#allocation30_spill] sm:$0xff] }
 0xcb9   :  { %4311 = vrcp.f32 %v1486_v11  ;;  %v6798_v11 = vld [vmem:[#allocation31_spill] sm:$0xff] }
 0xcba   :  { %4313 = vpow2.f32 %v1637_v50  ;;  %v6795_v50 = vld [vmem:[#allocation28_spill] sm:$0xff] }
 0xcc6   :  { %v4312_v3 = vpop.eup %4311 }
 0xcc7   :  { %v4314_v16 = vpop.eup %4313 }
 0xcc8   :  { %v1640_v35 = vadd.f32 1.0, %v4314_v16  ;;  %v6796_v16 = vld [vmem:[#allocation29_spill] sm:$0xff] }
 0xcca   :  { %4315 = vrcp.f32 %v1640_v35 }
 0xcd7   :  { %v4316_v9 = vpop.eup %4315 }
 0xcdb   :  { %v1506_v17 = vpop.permute.xlu1 %1505 }
 0xcdc   :  { %v1508_v58 = vmul.f32 %v4312_v3, %v1506_v17  ;;  %v6792_v17 = vld [vmem:[#allocation25_spill] sm:$0xff]  ;;  %v6793_v3 = vld [vmem:[#allocation26_spill] sm:$0xff] }
 0xcde   :  { %1924 = vrot.lane.b32.xlu1 %v1508_v58, %s4832_s28 }
 0xcfb   :  { %v2002_v25 = vpop.permute.xlu0 %2001 }
 0xcfc   :  { %v2004_v52 = vsel %vm268_vm3, %v1508_v58, %v2002_v25 }
 0xcfd   :  { %v2005_v6 = vpack.c.bf16 %v2004_v52, %v2004_v52 }
 0xcff   :  { %2039 = vmatmul.mubr.bf16.vlgmr.msra.gmra.mxu0 %v2005_v6 }
 0xd00   :  { %2161 = vmatpush1.bf16.msra.mxu0 %v6790_v15  ;;  %2192 = vmatprep.mubr.bf16.mxu0 %v6766_v8  ;;  %v5802_v15 = vld [vmem:[#allocation7 + $0x130] ss:$8 sps:$4 sm:$0xff]  }
 0xd01   :  { %2162 = vmatprep.subr.bf16.mxu0 %v6791_v30  ;;  %v5805_v30 = vld [vmem:[#allocation7 + $0x124] ss:$8 sps:$4 sm:$0xff]  }
 0xd04   :  { %2163 = vmatpush1.bf16.msra.mxu0 %v6792_v17  ;;  %v5808_v17 = vld [vmem:[#allocation7 + $0x120] ss:$8 sps:$4 sm:$0xff]  }
 0xd05   :  { %2164 = vmatprep.subr.bf16.mxu0 %v6793_v3  ;;  %v5811_v3 = vld [vmem:[#allocation7 + $0x114] ss:$8 sps:$4 sm:$0xff]  }
 0xd08   :  { %2165 = vmatpush1.bf16.msra.mxu0 %v6794_v49  ;;  %v5814_v49 = vld [vmem:[#allocation7 + $0x110] ss:$8 sps:$4 sm:$0xff]  }
 0xd09   :  { %2166 = vmatprep.subr.bf16.mxu0 %v6795_v50  ;;  %v5817_v50 = vld [vmem:[#allocation7 + $0x104] ss:$8 sps:$4 sm:$0xff]  }
 0xd0c   :  { %2167 = vmatpush1.bf16.msra.mxu0 %v6796_v16  ;;  %v5820_v16 = vld [vmem:[#allocation7 + $0x100] ss:$8 sps:$4 sm:$0xff]  }
 0xd0d   :  { %v1660_v25 = vpop.permute.xlu1 %1659  ;;  %2168 = vmatprep.subr.bf16.mxu0 %v6797_v48 }
 0xd0e   :  { %v1662_v35 = vmul.f32 %v4316_v9, %v1660_v25  ;;  %v5823_v9 = vld [vmem:[#allocation5 + $0x34] ss:$8 sps:$4 sm:$0xff]  }
 0xd10   :  { %2169 = vmatpush1.bf16.msra.mxu0 %v5512_v4  ;;  %2078 = vrot.lane.b32.xlu0 %v1662_v35, %s4832_s28  ;;  %v6799_v4 = vld [vmem:[#allocation10_spill] sm:$0xff] }
 0xd11   :  { %2170 = vmatprep.subr.bf16.mxu0 %v6798_v11  ;;  %v5828_v11 = vld [vmem:[#allocation5 + $0x30] ss:$8 sps:$4 sm:$0xff]  }
 0xd14   :  { %2171 = vmatpush1.bf16.msra.mxu0 %v5519_v34  ;;  %v5789_v34 = vld [vmem:[#allocation7 + $0x150] ss:$8 sps:$4 sm:$0xff]  }
 0xd15   :  { %2172 = vmatprep.subr.bf16.mxu0 %v5522_v7  ;;  %v5792_v7 = vld [vmem:[#allocation7 + $0x144] ss:$8 sps:$4 sm:$0xff]  }
 0xd18   :  { %2173 = vmatpush1.bf16.msra.mxu0 %v5525_v2 }
 0xd19   :  { %2174 = vmatprep.subr.bf16.mxu0 %v5528_v33  ;;  %v5762_v33 = vld [vmem:[#allocation7 + $0x174] ss:$8 sps:$4 sm:$0xff]  }
 0xd1b   :  { %v2156_v58 = vpop.permute.xlu0 %2155 }
 0xd1c   :  { %v2158_v52 = vsel %vm268_vm3, %v1662_v35, %v2156_v58  ;;  %2175 = vmatpush1.bf16.msra.mxu0 %v5531_v37  ;;  %v5795_v37 = vld [vmem:[#allocation7 + $0x140] ss:$8 sps:$4 sm:$0xff]   ;;  %v5832_v58 = vld [vmem:[#allocation5 + $0x24] ss:$8 sps:$4 sm:$0xff]  }
 0xd1d   :  { %v2159_v6 = vpack.c.bf16 %v2158_v52, %v2158_v52  ;;  %2314 = vmatprep.subr.bf16.mxu0 %v5535_v41  ;;  %v206_v41 = vadd.f32 %v6799_v4, %v4945_v22  ;;  %v5835_v52 = vld [vmem:[#allocation5 + $0x20] ss:$8 sps:$4 sm:$0xff]  }
 0xd1f   :  { %2193 = vmatmul.mubr.bf16.vlgmr.msra.gmra.mxu0 %v2159_v6  ;;  %v5838_v6 = vld [vmem:[#allocation5 + $0x14] ss:$8 sps:$4 sm:$0xff]  }
 0xd20   :  { %2315 = vmatpush1.bf16.msra.mxu0 %v5440_v53  ;;  %2346 = vmatprep.mubr.bf16.mxu0 %v6766_v8 }
 0xd21   :  { %2316 = vmatprep.subr.bf16.mxu0 %v5444_v55  ;;  %v6800_v55 = vld [vmem:[#allocation11_spill] sm:$0xff] }
 0xd24   :  { %2317 = vmatpush1.bf16.msra.mxu0 %v5447_v46  ;;  %v208_v46 = vadd.f32 %v6800_v55, %v4951_v26 }
 0xd25   :  { %2318 = vmatprep.subr.bf16.mxu0 %v5450_v43 }
 0xd28   :  { %2319 = vmatpush1.bf16.msra.mxu0 %v5453_v42 }
 0xd29   :  { %2320 = vmatprep.subr.bf16.mxu0 %v5456_v1 }
 0xd2c   :  { %2321 = vmatpush1.bf16.msra.mxu0 %v5459_v14 }
 0xd2d   :  { %2322 = vmatprep.subr.bf16.mxu0 %v5462_v24 }
 0xd30   :  { %2323 = vmatpush1.bf16.msra.mxu0 %v5465_v5 }
 0xd31   :  { %2324 = vmatprep.subr.bf16.mxu0 %v5468_v40  ;;  %v5776_v40 = vld [vmem:[#allocation7 + $0x170] ss:$8 sps:$4 sm:$0xff]  }
 0xd34   :  { %2325 = vmatpush1.bf16.msra.mxu0 %v5471_v56  ;;  %v5780_v56 = vld [vmem:[#allocation7 + $0x164] ss:$8 sps:$4 sm:$0xff]  }
 0xd35   :  { %2326 = vmatprep.subr.bf16.mxu0 %v5474_v63  ;;  %v5783_v63 = vld [vmem:[#allocation7 + $0x160] ss:$8 sps:$4 sm:$0xff]  }
 0xd38   :  { %2327 = vmatpush1.bf16.msra.mxu0 %v5482_v32 }
 0xd39   :  { %2328 = vmatprep.subr.bf16.mxu0 %v5485_v62 }
 0xd3c   :  { %2329 = vmatpush1.bf16.msra.mxu0 %v5495_v13  ;;  %v5786_v13 = vld [vmem:[#allocation7 + $0x154] ss:$8 sps:$4 sm:$0xff]  }
 0xd3d   :  { %2468 = vmatprep.subr.bf16.mxu0 %v5762_v33 }
 0xd4f   :  { %v1884_v53 = vpop.f32.mrf.mxu0 }
 0xd50   :  { %v5769_v43 = vadd.f32 %v1884_v53, %v206_v41  ;;  %v1925_v42 = vpop.permute.xlu1 %1924 }
 0xd51   :  { %v1927_v32 = vsel %vm268_vm3, %v5668_v19, %v1925_v42  ;;  %v1886_v62 = vpop.f32.mrf.mxu0  ;;  %v5799_v19 = vld [vmem:[#allocation7 + $0x134] ss:$8 sps:$4 sm:$0xff]  }
 0xd52   :  { %v1928_v1 = vpack.c.bf16 %v1927_v32, %v1927_v32  ;;  %v5773_v14 = vadd.f32 %v1886_v62, %v208_v46 }
 0xd53   :  { %v1888_v24 = vpop.f32.mrf.mxu0 }
 0xd54   :  { %4317 = vtanh.f32 %v5773_v14  ;;  %1962 = vmatmul.mubr.bf16.vlgmr.msra.gmra.mxu1 %v1928_v1  ;;  %v1893_v24 = vsub.f32 0.0, %v5769_v43 }
 0xd55   :  { %v1889_v5 = vpop.f32.mrf.mxu0  ;;  %2084 = vmatpush1.bf16.msra.mxu1 %v5776_v40  ;;  %2115 = vmatprep.mubr.bf16.mxu1 %v6766_v8 }
 0xd56   :  { %2085 = vmatprep.subr.bf16.mxu1 %v5780_v56  ;;  %v1895_v5 = vmul.f32 1.442695, %v1893_v24 }
 0xd59   :  { %2086 = vmatpush1.bf16.msra.mxu1 %v5783_v63 }
 0xd5a   :  { %2087 = vmatprep.subr.bf16.mxu1 %v5786_v13 }
 0xd5d   :  { %2088 = vmatpush1.bf16.msra.mxu1 %v5789_v34 }
 0xd5e   :  { %2089 = vmatprep.subr.bf16.mxu1 %v5792_v7 }
 0xd61   :  { %v4318_v2 = vpop.eup %4317  ;;  %2090 = vmatpush1.bf16.msra.mxu1 %v5795_v37 }
 0xd62   :  { %1908 = vrot.lane.b32.xlu0 %v4318_v2, %s4832_s28  ;;  %2091 = vmatprep.subr.bf16.mxu1 %v5799_v19 }
 0xd65   :  { %2092 = vmatpush1.bf16.msra.mxu1 %v5802_v15 }
 0xd66   :  { %2093 = vmatprep.subr.bf16.mxu1 %v5805_v30 }
 0xd69   :  { %2094 = vmatpush1.bf16.msra.mxu1 %v5808_v17 }
 0xd6a   :  { %2095 = vmatprep.subr.bf16.mxu1 %v5811_v3 }
 0xd6d   :  { %2096 = vmatpush1.bf16.msra.mxu1 %v5814_v49 }
 0xd6e   :  { %2097 = vmatprep.subr.bf16.mxu1 %v5817_v50 }
 0xd71   :  { %2098 = vmatpush1.bf16.msra.mxu1 %v5820_v16 }
 0xd72   :  { %2243 = vmatprep.subr.bf16.mxu1 %v5823_v9 }
 0xd82   :  { %v2079_v25 = vpop.permute.xlu0 %2078 }
 0xd83   :  { %v2081_v48 = vsel %vm268_vm3, %v5661_v59, %v2079_v25  ;;  %v5841_v59 = vld [vmem:[#allocation5 + $0x10] ss:$8 sps:$4 sm:$0xff]  }
 0xd84   :  { %v2082_v35 = vpack.c.bf16 %v2081_v48, %v2081_v48 }
 0xd86   :  { %2116 = vmatmul.mubr.bf16.vlgmr.msra.gmra.mxu1 %v2082_v35 }
 0xd87   :  { %2244 = vmatpush1.bf16.msra.mxu1 %v5828_v11  ;;  %2267 = vmatprep.mubr.bf16.mxu1 %v6766_v8 }
 0xd88   :  { %2245 = vmatprep.subr.bf16.mxu1 %v5832_v58 }
 0xd8b   :  { %2246 = vmatpush1.bf16.msra.mxu1 %v5835_v52 }
 0xd8c   :  { %2247 = vmatprep.subr.bf16.mxu1 %v5838_v6 }
 0xd8f   :  { %2248 = vmatpush1.bf16.msra.mxu1 %v5841_v59 }
 0xd90   :  { %2249 = vmatprep.subr.bf16.mxu1 %v5584_v28 }
 0xd93   :  { %2250 = vmatpush1.bf16.msra.mxu1 %v5587_v60 }
 0xd94   :  { %2391 = vmatprep.subr.bf16.mxu1 %v5590_v29 }
 0xdbf   :  { %v2040_v4 = vpop.f32.mrf.mxu0 }
 0xdc1   :  { %v2042_v41 = vpop.f32.mrf.mxu0 }
 0xdc2   :  { %v5848_v53 = vadd.f32 %v2042_v41, %v5204_v54  ;;  %v2041_v41 = vadd.f32 %v2040_v4, %v5212_v10 }
 0xdc3   :  { %v2044_v55 = vpop.f32.mrf.mxu0 }
 0xdc4   :  { %4319 = vtanh.f32 %v5848_v53 }
 0xdc5   :  { %v2045_v46 = vpop.f32.mrf.mxu0 }
 0xdd1   :  { %v4320_v42 = vpop.eup %4319 }
 0xdd2   :  { %2062 = vrot.lane.b32.xlu1 %v4320_v42, %s4832_s28 }
 0xddf   :  { %v2194_v32 = vpop.f32.mrf.mxu0 }
 0xde1   :  { %v2196_v62 = vpop.f32.mrf.mxu0 }
 0xde2   :  { %v5853_v28 = vadd.f32 %v2196_v62, %v5610_v0  ;;  %v2047_v62 = vsub.f32 0.0, %v2041_v41 }
 0xde3   :  { %v2198_v60 = vpop.f32.mrf.mxu0 }
 0xde4   :  { %4321 = vtanh.f32 %v5853_v28  ;;  %v2049_v60 = vmul.f32 1.442695, %v2047_v62 }
 0xde5   :  { %v2199_v29 = vpop.f32.mrf.mxu0  ;;  %4323 = vpow2.f32 %v1895_v5 }
 0xde6   :  { %v1909_v29 = vpop.permute.xlu0 %1908 }
 0xdf1   :  { %v4322_v1 = vpop.eup %4321 }
 0xdf2   :  { %2216 = vrot.lane.b32.xlu1 %v4322_v1, %s4832_s28  ;;  %v4324_v2 = vpop.eup %4323 }
 0xdf3   :  { %v1899_v35 = vadd.f32 1.0, %v4324_v2  ;;  %v2195_v2 = vadd.f32 %v2194_v32, %v5625_v18 }
 0xe14   :  { %v1963_v25 = vpop.f32.mrf.mxu1 }
 0xe16   :  { %v1965_v48 = vpop.f32.mrf.mxu1 }
 0xe17   :  { %v5860_v55 = vadd.f32 %v1965_v48, %v5091_v39  ;;  %v2201_v48 = vsub.f32 0.0, %v2195_v2 }
 0xe18   :  { %v1967_v46 = vpop.f32.mrf.mxu1 }
 0xe19   :  { %4325 = vtanh.f32 %v5860_v55  ;;  %v2203_v46 = vmul.f32 1.442695, %v2201_v48 }
 0xe1a   :  { %v1968_v42 = vpop.f32.mrf.mxu1  ;;  %4327 = vrcp.f32 %v1899_v35 }
 0xe1b   :  { %4329 = vpow2.f32 %v2049_v60 }
 0xe26   :  { %v4326_v43 = vpop.eup %4325 }
 0xe27   :  { %1985 = vrot.lane.b32.xlu0 %v4326_v43, %s4832_s28  ;;  %v4328_v1 = vpop.eup %4327 }
 0xe28   :  { %v1911_v24 = vmul.f32 %v4328_v1, %v1909_v29  ;;  %v4330_v4 = vpop.eup %4329 }
 0xe29   :  { %v2053_v5 = vadd.f32 1.0, %v4330_v4 }
 0xe2b   :  { %1913 = vrot.lane.b32.xlu0 %v1911_v24, %s4832_s28  ;;  %4331 = vrcp.f32 %v2053_v5 }
 0xe2c   :  { %4333 = vpow2.f32 %v2203_v46 }
 0xe38   :  { %v4332_v35 = vpop.eup %4331 }
 0xe39   :  { %v4334_v4 = vpop.eup %4333 }
 0xe3a   :  { %v2207_v5 = vadd.f32 1.0, %v4334_v4 }
 0xe44   :  { %v2063_v41 = vpop.permute.xlu1 %2062 }
 0xe45   :  { %v2065_v42 = vmul.f32 %v4332_v35, %v2063_v41  ;;  %v1964_v41 = vadd.f32 %v1963_v25, %v5098_v12 }
 0xe46   :  { %v2117_v62 = vpop.f32.mrf.mxu1 }
 0xe47   :  { %2067 = vrot.lane.b32.xlu1 %v2065_v42, %s4832_s28  ;;  %v1970_v42 = vsub.f32 0.0, %v1964_v41 }
 0xe48   :  { %v2119_v60 = vpop.f32.mrf.mxu1 }
 0xe49   :  { %v5868_v43 = vadd.f32 %v2119_v60, %v5387_v38  ;;  %v1972_v60 = vmul.f32 1.442695, %v1970_v42 }
 0xe4a   :  { %v2121_v29 = vpop.f32.mrf.mxu1 }
 0xe4b   :  { %4335 = vtanh.f32 %v5868_v43 }
 0xe4c   :  { %v2122_v24 = vpop.f32.mrf.mxu1  ;;  %4337 = vrcp.f32 %v2207_v5  ;;  %v2118_v5 = vadd.f32 %v2117_v62, %v5398_v36 }
 0xe4d   :  { %4339 = vpow2.f32 %v1972_v60  ;;  %v1906_v60 = vmul.f32 %v4328_v1, %v5642_v47 }
 0xe58   :  { %v4336_v32 = vpop.eup %4335 }
 0xe59   :  { %2139 = vrot.lane.b32.xlu1 %v4336_v32, %s4832_s28  ;;  %v4338_v2 = vpop.eup %4337  ;;  %v2124_v32 = vsub.f32 0.0, %v2118_v5 }
 0xe5a   :  { %v4340_v29 = vpop.eup %4339  ;;  %v2214_v47 = vmul.f32 %v4338_v2, %v5649_v61 }
 0xe5b   :  { %v1976_v38 = vadd.f32 1.0, %v4340_v29  ;;  %v2126_v39 = vmul.f32 1.442695, %v2124_v32 }
 0xe5d   :  { %4341 = vrcp.f32 %v1976_v38 }
 0xe5e   :  { %4343 = vpow2.f32 %v2126_v39 }
 0xe64   :  { %v2217_v48 = vpop.permute.xlu1 %2216 }
 0xe65   :  { %v2219_v46 = vmul.f32 %v4338_v2, %v2217_v48 }
 0xe67   :  { %2221 = vrot.lane.b32.xlu0 %v2219_v46, %s4832_s28  ;;  %v2060_v46 = vmul.f32 %v4332_v35, %v5640_v57 }
 0xe6a   :  { %v4342_v24 = vpop.eup %4341 }
 0xe6b   :  { %v4344_v48 = vpop.eup %4343  ;;  %v1983_v32 = vmul.f32 %v4342_v24, %v5654_v20 }
 0xe6c   :  { %v2130_v42 = vadd.f32 1.0, %v4344_v48 }
 0xe99   :  { %v1986_v18 = vpop.permute.xlu0 %1985 }
 0xe9a   :  { %v1988_v4 = vmul.f32 %v4342_v24, %v1986_v18  ;;  %v2202_v24 = vsub.f32 0.0, %v5853_v28 }
 0xe9c   :  { %1990 = vrot.lane.b32.xlu1 %v1988_v4, %s4832_s28 }
 0xe9d   :  { %v1914_v25 = vpop.permute.xlu0 %1913 }
 0xe9e   :  { %v5880_v38 = vadd.f32 %v1914_v25, %v1906_v60  ;;  %v2048_v25 = vsub.f32 0.0, %v5848_v53 }
 0xea0   :  { %v2051_v61 = vmul.f32 1.442695, %v2048_v25 }
 0xeb9   :  { %v2068_v41 = vpop.permute.xlu1 %2067 }
 0xeba   :  { %v5878_v29 = vadd.f32 %v2068_v41, %v2060_v46  ;;  %v1894_v41 = vsub.f32 0.0, %v5773_v14 }
 0xebc   :  { %4345 = vtanh.f32 %v5878_v29  ;;  %v1897_v2 = vmul.f32 1.442695, %v1894_v41 }
 0xebd   :  { %4347 = vrcp.f32 %v2130_v42 }
 0xebe   :  { %4349 = vtanh.f32 %v5880_v38 }
 0xec9   :  { %v4346_v18 = vpop.eup %4345 }
 0xeca   :  { %2073 = vrot.lane.b32.xlu0 %v4346_v18, %s4832_s28  ;;  %v4348_v39 = vpop.eup %4347 }
 0xecb   :  { %v2140_v62 = vpop.permute.xlu1 %2139  ;;  %v4350_v35 = vpop.eup %4349 }
 0xecc   :  { %v2142_v57 = vmul.f32 %v4348_v39, %v2140_v62 }
 0xece   :  { %2144 = vrot.lane.b32.xlu1 %v2142_v57, %s4832_s28  ;;  %1919 = vrot.lane.b32.xlu0 %v4350_v35, %s4832_s28  ;;  %v2205_v57 = vmul.f32 1.442695, %v2202_v24  ;;  %v1971_v24 = vsub.f32 0.0, %v5860_v55 }
 0xed9   :  { %v2222_v1 = vpop.permute.xlu0 %2221 }
 0xeda   :  { %v5888_v4 = vadd.f32 %v2222_v1, %v2214_v47  ;;  %v2137_v47 = vmul.f32 %v4348_v39, %v5666_v44 }
 0xedc   :  { %4351 = vtanh.f32 %v5888_v4 }
 0xee9   :  { %v4352_v5 = vpop.eup %4351 }
 0xeea   :  { %2227 = vrot.lane.b32.xlu1 %v4352_v5, %s4832_s28 }
 0xf0e   :  { %v1991_v48 = vpop.permute.xlu1 %1990 }
 0xf0f   :  { %v5893_v46 = vadd.f32 %v1991_v48, %v1983_v32 }
 0xf11   :  { %4353 = vtanh.f32 %v5893_v46 }
 0xf12   :  { %4355 = vpow2.f32 %v2051_v61  ;;  %v6801_v61 = vld [vmem:[#allocation20_spill] sm:$0xff] }
 0xf13   :  { %4357 = vpow2.f32 %v1897_v2  ;;  %v6803_v2 = vld [vmem:[#allocation34_spill] sm:$0xff] }
 0xf1e   :  { %v4354_v42 = vpop.eup %4353 }
 0xf1f   :  { %1996 = vrot.lane.b32.xlu0 %v4354_v42, %s4832_s28  ;;  %v4356_v60 = vpop.eup %4355  ;;  %v6806_v42 = vld [vmem:[#allocation37_spill] sm:$0xff] }
 0xf20   :  { %v2054_v18 = vadd.f32 1.0, %v4356_v60  ;;  %v4358_v62 = vpop.eup %4357 }
 0xf21   :  { %v1900_v20 = vadd.f32 1.0, %v4358_v62  ;;  %v6809_v62 = vld [vmem:[#allocation40_spill] sm:$0xff] }
 0xf22   :  { %4359 = vrcp.f32 %v2054_v18  ;;  %v6807_v18 = vld [vmem:[#allocation38_spill] sm:$0xff] }
 0xf23   :  { %4361 = vrcp.f32 %v1900_v20  ;;  %v5931_v20 = vld [vmem:[#allocation7 + $0x1f4] ss:$8 sps:$4 sm:$0xff]  }
 0xf24   :  { %4363 = vpow2.f32 %v2205_v57  ;;  %v1974_v57 = vmul.f32 1.442695, %v1971_v24  ;;  %v5967_v24 = vld [vmem:[#allocation7 + $0x1a4] ss:$8 sps:$4 sm:$0xff]  }
 0xf2f   :  { %v4360_v53 = vpop.eup %4359 }
 0xf30   :  { %v4362_v1 = vpop.eup %4361 }
 0xf31   :  { %v4364_v44 = vpop.eup %4363 }
 0xf32   :  { %v2208_v39 = vadd.f32 1.0, %v4364_v44 }
 0xf3c   :  { %v2074_v35 = vpop.permute.xlu0 %2073 }
 0xf3d   :  { %v5900_v14 = vmul.f32 %v4360_v53, %v2074_v35 }
 0xf3f   :  { %2386 = vrot.lane.b32.xlu1 %v5900_v14, %s4832_s28 }
 0xf40   :  { %v2145_v5 = vpop.permute.xlu1 %2144  ;;  %v1920_v32 = vpop.permute.xlu0 %1919 }
 0xf41   :  { %v5905_v48 = vadd.f32 %v2145_v5, %v2137_v47  ;;  %v5907_v25 = vmul.f32 %v4362_v1, %v1920_v32  ;;  %v2125_v32 = vsub.f32 0.0, %v5868_v43  ;;  %v5945_v43 = vld [vmem:[#allocation7 + $0x1e0] ss:$8 sps:$4 sm:$0xff]  }
 0xf43   :  { %4365 = vtanh.f32 %v5905_v48  ;;  %v2231_v28 = vpack.c.bf16 %v5907_v25, %v5907_v25 }
 0xf44   :  { %4367 = vrcp.f32 %v2208_v39 }
 0xf45   :  { %3984 = vmatmul.mubr.msk.bf16.vlgmr.msra.gmra.mxu1 %vm268_vm3, %v2231_v28  ;;  %4369 = vpow2.f32 %v1974_v57  ;;  %v2128_v28 = vmul.f32 1.442695, %v2125_v32  ;;  %v5970_v57 = vld [vmem:[#allocation7 + $0x1a0] ss:$8 sps:$4 sm:$0xff]  }
 0xf46   :  { %2392 = vmatpush1.bf16.msra.mxu1 %v5674_v45  ;;  %2423 = vmatprep.mubr.bf16.mxu1 %v6766_v8  ;;  %v6802_v45 = vld [vmem:[#allocation22_spill] sm:$0xff] }
 0xf47   :  { %2393 = vmatprep.subr.bf16.mxu1 %v5678_v51  ;;  %v6804_v51 = vld [vmem:[#allocation35_spill] sm:$0xff] }
 0xf48   :  { %v5983_v32 = vld [vmem:[#allocation7 + $0x180] ss:$8 sps:$4 sm:$0xff]  }
 0xf49   :  { %6811 = vst [vmem:[#allocation23_spill] sm:$0xff] %v5983_v32 }
 0xf4a   :  { %2394 = vmatpush1.bf16.msra.mxu1 %v5681_v27  ;;  %v6805_v27 = vld [vmem:[#allocation36_spill] sm:$0xff] }
 0xf4b   :  { %2395 = vmatprep.subr.bf16.mxu1 %v5684_v21 }
 0xf4e   :  { %2396 = vmatpush1.bf16.msra.mxu1 %v5687_v31 }
 0xf4f   :  { %2397 = vmatprep.subr.bf16.mxu1 %v5690_v23  ;;  %v6808_v23 = vld [vmem:[#allocation39_spill] sm:$0xff] }
 0xf50   :  { %v4366_v41 = vpop.eup %4365 }
 0xf51   :  { %2150 = vrot.lane.b32.xlu0 %v4366_v41, %s4832_s28  ;;  %v4368_v21 = vpop.eup %4367 }
 0xf52   :  { %2398 = vmatpush1.bf16.msra.mxu1 %v6801_v61  ;;  %v4370_v53 = vpop.eup %4369 }
 0xf53   :  { %2399 = vmatprep.subr.bf16.mxu1 %v6802_v45  ;;  %v1977_v35 = vadd.f32 1.0, %v4370_v53  ;;  %v5938_v45 = vld [vmem:[#allocation7 + $0x1f0] ss:$8 sps:$4 sm:$0xff]   ;;  %v5973_v53 = vld [vmem:[#allocation7 + $0x194] ss:$8 sps:$4 sm:$0xff]  }
 0xf55   :  { %4371 = vrcp.f32 %v1977_v35  ;;  %v5976_v35 = vld [vmem:[#allocation7 + $0x190] ss:$8 sps:$4 sm:$0xff]  }
 0xf56   :  { %2400 = vmatpush1.bf16.msra.mxu1 %v6803_v2  ;;  %4373 = vpow2.f32 %v2128_v28  ;;  %v5942_v2 = vld [vmem:[#allocation7 + $0x1e4] ss:$8 sps:$4 sm:$0xff]  }
 0xf57   :  { %2401 = vmatprep.subr.bf16.mxu1 %v6804_v51  ;;  %v5948_v51 = vld [vmem:[#allocation7 + $0x1d4] ss:$8 sps:$4 sm:$0xff]  }
 0xf5a   :  { %2402 = vmatpush1.bf16.msra.mxu1 %v6805_v27  ;;  %v5951_v27 = vld [vmem:[#allocation7 + $0x1d0] ss:$8 sps:$4 sm:$0xff]  }
 0xf5b   :  { %2403 = vmatprep.subr.bf16.mxu1 %v6806_v42  ;;  %v5954_v42 = vld [vmem:[#allocation7 + $0x1c4] ss:$8 sps:$4 sm:$0xff]  }
 0xf5c   :  { %v2228_v31 = vpop.permute.xlu1 %2227 }
 0xf5d   :  { %v2230_v60 = vmul.f32 %v4368_v21, %v2228_v31  ;;  %v5957_v21 = vld [vmem:[#allocation7 + $0x1c0] ss:$8 sps:$4 sm:$0xff]  }
 0xf5e   :  { %2404 = vmatpush1.bf16.msra.mxu1 %v6807_v18  ;;  %v5960_v18 = vld [vmem:[#allocation7 + $0x1b4] ss:$8 sps:$4 sm:$0xff]  }
 0xf5f   :  { %2540 = vrot.lane.b32.xlu1 %v2230_v60, %s4832_s28  ;;  %2405 = vmatprep.subr.bf16.mxu1 %v6808_v23 }
 0xf62   :  { %2406 = vmatpush1.bf16.msra.mxu1 %v6809_v62  ;;  %v4372_v47 = vpop.eup %4371  ;;  %v5963_v62 = vld [vmem:[#allocation7 + $0x1b0] ss:$8 sps:$4 sm:$0xff]  }
 0xf63   :  { %2545 = vmatprep.subr.bf16.mxu1 %v5931_v20  ;;  %v4374_v44 = vpop.eup %4373 }
 0xf64   :  { %v2131_v41 = vadd.f32 1.0, %v4374_v44  ;;  %v5986_v44 = vld [vmem:[#allocation7 + $0x74] ss:$8 sps:$4 sm:$0xff]  }
 0xf65   :  { %6812 = vst [vmem:[#allocation24_spill] sm:$0xff] %v5986_v44 }
 0xf66   :  { %4375 = vrcp.f32 %v2131_v41  ;;  %v5993_v41 = vld [vmem:[#allocation7 + $0x64] ss:$8 sps:$4 sm:$0xff]  }
 0xf67   :  { %6814 = vst [vmem:[#allocation26_spill] sm:$0xff] %v5993_v41 }
 0xf73   :  { %v4376_v31 = vpop.eup %4375 }
 0xf91   :  { %v1997_v1 = vpop.permute.xlu0 %1996 }
 0xf92   :  { %v1999_v5 = vmul.f32 %v4372_v47, %v1997_v1  ;;  %v5979_v47 = vld [vmem:[#allocation7 + $0x184] ss:$8 sps:$4 sm:$0xff]  }
 0xf93   :  { %6810 = vst [vmem:[#allocation21_spill] sm:$0xff] %v5979_v47 }
 0xf94   :  { %2309 = vrot.lane.b32.xlu0 %v1999_v5, %s4832_s28 }
 0xfb1   :  { %v2387_v39 = vpop.permute.xlu1 %2386 }
 0xfb2   :  { %v2389_v61 = vsel %vm268_vm3, %v1999_v5, %v2387_v39  ;;  %v5989_v39 = vld [vmem:[#allocation7 + $0x70] ss:$8 sps:$4 sm:$0xff]  }
 0xfb3   :  { %v2390_v55 = vpack.c.bf16 %v2389_v61, %v2389_v61  ;;  %6813 = vst [vmem:[#allocation25_spill] sm:$0xff] %v5989_v39  ;;  %v5996_v61 = vld [vmem:[#allocation7 + $0x60] ss:$8 sps:$4 sm:$0xff]  }
 0xfb4   :  { %6815 = vst [vmem:[#allocation27_spill] sm:$0xff] %v5996_v61 }
 0xfb5   :  { %2424 = vmatmul.mubr.bf16.vlgmr.msra.gmra.mxu1 %v2390_v55  ;;  %v5999_v55 = vld [vmem:[#allocation7 + $0x54] ss:$8 sps:$4 sm:$0xff]  }
 0xfb6   :  { %2546 = vmatpush1.bf16.msra.mxu1 %v5938_v45  ;;  %2577 = vmatprep.mubr.bf16.mxu1 %v6766_v8  ;;  %6816 = vst [vmem:[#allocation28_spill] sm:$0xff] %v5999_v55 }
 0xfb7   :  { %2547 = vmatprep.subr.bf16.mxu1 %v5942_v2 }
 0xfba   :  { %2548 = vmatpush1.bf16.msra.mxu1 %v5945_v43 }
 0xfbb   :  { %2549 = vmatprep.subr.bf16.mxu1 %v5948_v51 }
 0xfbe   :  { %2550 = vmatpush1.bf16.msra.mxu1 %v5951_v27 }
 0xfbf   :  { %2551 = vmatprep.subr.bf16.mxu1 %v5954_v42 }
 0xfc2   :  { %2552 = vmatpush1.bf16.msra.mxu1 %v5957_v21 }
 0xfc3   :  { %v2151_v60 = vpop.permute.xlu0 %2150  ;;  %2553 = vmatprep.subr.bf16.mxu1 %v5960_v18 }
 0xfc4   :  { %v2153_v23 = vmul.f32 %v4376_v31, %v2151_v60  ;;  %v6002_v31 = vld [vmem:[#allocation7 + $0x50] ss:$8 sps:$4 sm:$0xff]   ;;  %v6005_v60 = vld [vmem:[#allocation7 + $0x44] ss:$8 sps:$4 sm:$0xff]  }
 0xfc5   :  { %6817 = vst [vmem:[#allocation29_spill] sm:$0xff] %v6002_v31  ;;  %6818 = vst [vmem:[#allocation30_spill] sm:$0xff] %v6005_v60 }
 0xfc6   :  { %2554 = vmatpush1.bf16.msra.mxu1 %v5963_v62  ;;  %2463 = vrot.lane.b32.xlu1 %v2153_v23, %s4832_s28 }
 0xfc7   :  { %2555 = vmatprep.subr.bf16.mxu1 %v5967_v24 }
 0xfca   :  { %2556 = vmatpush1.bf16.msra.mxu1 %v5970_v57 }
 0xfcb   :  { %2557 = vmatprep.subr.bf16.mxu1 %v5973_v53 }
 0xfce   :  { %2558 = vmatpush1.bf16.msra.mxu1 %v5976_v35 }
 0xfcf   :  { %2559 = vmatprep.subr.bf16.mxu1 %v5979_v47 }
 0xfd1   :  { %v2541_v1 = vpop.permute.xlu1 %2540 }
 0xfd2   :  { %v2543_v5 = vsel %vm268_vm3, %v2153_v23, %v2541_v1  ;;  %2560 = vmatpush1.bf16.msra.mxu1 %v5983_v32  ;;  %v6008_v23 = vld [vmem:[#allocation7 + $0x40] ss:$8 sps:$4 sm:$0xff]   ;;  %v6011_v1 = vld [vmem:[#allocation7 + $0x34] ss:$8 sps:$4 sm:$0xff]  }
 0xfd3   :  { %v2544_v28 = vpack.c.bf16 %v2543_v5, %v2543_v5  ;;  %2699 = vmatprep.subr.bf16.mxu1 %v5986_v44  ;;  %6819 = vst [vmem:[#allocation31_spill] sm:$0xff] %v6008_v23  ;;  %6820 = vst [vmem:[#allocation10_spill] sm:$0xff] %v6011_v1  ;;  %v6014_v5 = vld [vmem:[#allocation7 + $0x30] ss:$8 sps:$4 sm:$0xff]  }
 0xfd4   :  { %6821 = vst [vmem:[#allocation11_spill] sm:$0xff] %v6014_v5 }
 0xfd5   :  { %2578 = vmatmul.mubr.bf16.vlgmr.msra.gmra.mxu1 %v2544_v28  ;;  %v6017_v28 = vld [vmem:[#allocation7 + $0x24] ss:$8 sps:$4 sm:$0xff]  }
 0xfd6   :  { %2700 = vmatpush1.bf16.msra.mxu1 %v5989_v39  ;;  %2731 = vmatprep.mubr.bf16.mxu1 %v6766_v8  ;;  %6822 = vst [vmem:[#allocation20_spill] sm:$0xff] %v6017_v28 }
 0xfd7   :  { %2701 = vmatprep.subr.bf16.mxu1 %v5993_v41 }
 0xfda   :  { %2702 = vmatpush1.bf16.msra.mxu1 %v5996_v61 }
 0xfdb   :  { %2703 = vmatprep.subr.bf16.mxu1 %v5999_v55 }
 0xfde   :  { %2704 = vmatpush1.bf16.msra.mxu1 %v6002_v31  ;;  %v6020_v31 = vld [vmem:[#allocation7 + $0x20] ss:$8 sps:$4 sm:$0xff]  }
 0xfdf   :  { %2705 = vmatprep.subr.bf16.mxu1 %v6005_v60  ;;  %6823 = vst [vmem:[#allocation22_spill] sm:$0xff] %v6020_v31  ;;  %v6023_v60 = vld [vmem:[#allocation7 + $0x14] ss:$8 sps:$4 sm:$0xff]  }
 0xfe0   :  { %6824 = vst [vmem:[#allocation34_spill] sm:$0xff] %v6023_v60 }
 0xfe2   :  { %2706 = vmatpush1.bf16.msra.mxu1 %v6008_v23  ;;  %v6026_v23 = vld [vmem:[#allocation7 + $0x10] ss:$8 sps:$4 sm:$0xff]  }
 0xfe3   :  { %2707 = vmatprep.subr.bf16.mxu1 %v6011_v1  ;;  %6825 = vst [vmem:[#allocation35_spill] sm:$0xff] %v6026_v23  ;;  %v6029_v1 = vld [vmem:[#allocation7 + $0x4] ss:$8 sps:$4 sm:$0xff]  }
 0xfe4   :  { %6826 = vst [vmem:[#allocation36_spill] sm:$0xff] %v6029_v1 }
 0xfe6   :  { %2708 = vmatpush1.bf16.msra.mxu1 %v6014_v5  ;;  %v6032_v5 = vld [vmem:[#allocation7] ss:$8 sps:$4 sm:$0xff]  }
 0xfe7   :  { %2709 = vmatprep.subr.bf16.mxu1 %v6017_v28 }
 0xfea   :  { %2710 = vmatpush1.bf16.msra.mxu1 %v6020_v31  ;;  %v6827_v31 = vld [vmem:[#allocation12_spill] sm:$0xff] }
 0xfeb   :  { %2711 = vmatprep.subr.bf16.mxu1 %v6023_v60  ;;  %v212_v28 = vadd.f32 %v6827_v31, %v4945_v22  ;;  %v6828_v60 = vld [vmem:[#allocation13_spill] sm:$0xff] }
 0xfec   :  { %v214_v61 = vadd.f32 %v6828_v60, %v4951_v26 }
 0xfee   :  { %2712 = vmatpush1.bf16.msra.mxu1 %v6026_v23 }
 0xfef   :  { %2713 = vmatprep.subr.bf16.mxu1 %v6029_v1 }
 0xff2   :  { %2714 = vmatpush1.bf16.msra.mxu1 %v6032_v5 }
 0xff3   :  { %2853 = vmatprep.subr.bf16.mxu1 %v5762_v33 }
0x1005   :  { %v2269_v55 = vpop.f32.mrf.mxu1 }
0x1006   :  { %v2276_v41 = vadd.f32 %v2269_v55, %v212_v28  ;;  %v2310_v39 = vpop.permute.xlu0 %2309 }
0x1007   :  { %v2312_v23 = vsel %vm268_vm3, %v5907_v25, %v2310_v39  ;;  %v2271_v44 = vpop.f32.mrf.mxu1 }
0x1008   :  { %v2313_v1 = vpack.c.bf16 %v2312_v23, %v2312_v23  ;;  %v6042_v32 = vadd.f32 %v2271_v44, %v214_v61  ;;  %v6829_v61 = vld [vmem:[#allocation16_spill] sm:$0xff] }
0x1009   :  { %v2273_v47 = vpop.f32.mrf.mxu1 }
0x100a   :  { %4377 = vtanh.f32 %v6042_v32  ;;  %2347 = vmatmul.mubr.bf16.vlgmr.msra.gmra.mxu0 %v2313_v1 }
0x100b   :  { %v2274_v33 = vpop.f32.mrf.mxu1  ;;  %2469 = vmatpush1.bf16.msra.mxu0 %v5776_v40  ;;  %2500 = vmatprep.mubr.bf16.mxu0 %v6766_v8 }
0x100c   :  { %2470 = vmatprep.subr.bf16.mxu0 %v5780_v56 }
0x100f   :  { %2471 = vmatpush1.bf16.msra.mxu0 %v5783_v63 }
0x1010   :  { %2472 = vmatprep.subr.bf16.mxu0 %v5786_v13  ;;  %v4711_v13 = vld [vmem:[#allocation5 + $0x4] ss:$8 sps:$4 sm:$0xff]  }
0x1013   :  { %2473 = vmatpush1.bf16.msra.mxu0 %v5789_v34  ;;  %v4712_v34 = vld [vmem:[#allocation5] ss:$8 sps:$4 sm:$0xff]  }
0x1014   :  { %2474 = vmatprep.subr.bf16.mxu0 %v5792_v7  ;;  %v6071_v7 = vld [vmem:[#allocation7 + $0xf4] ss:$8 sps:$4 sm:$0xff]  }
0x1017   :  { %v4378_v25 = vpop.eup %4377  ;;  %2475 = vmatpush1.bf16.msra.mxu0 %v5795_v37 }
0x1018   :  { %2293 = vrot.lane.b32.xlu1 %v4378_v25, %s4832_s28  ;;  %2476 = vmatprep.subr.bf16.mxu0 %v5799_v19 }
0x101b   :  { %2477 = vmatpush1.bf16.msra.mxu0 %v5802_v15 }
0x101c   :  { %2478 = vmatprep.subr.bf16.mxu0 %v5805_v30 }
0x101f   :  { %2479 = vmatpush1.bf16.msra.mxu0 %v5808_v17 }
0x1020   :  { %2480 = vmatprep.subr.bf16.mxu0 %v5811_v3 }
0x1023   :  { %2481 = vmatpush1.bf16.msra.mxu0 %v5814_v49 }
0x1024   :  { %2482 = vmatprep.subr.bf16.mxu0 %v5817_v50 }
0x1027   :  { %2483 = vmatpush1.bf16.msra.mxu0 %v5820_v16 }
0x1028   :  { %2628 = vmatprep.subr.bf16.mxu0 %v5823_v9 }
0x1038   :  { %v2464_v40 = vpop.permute.xlu1 %2463 }
0x1039   :  { %v2466_v56 = vsel %vm268_vm3, %v5900_v14, %v2464_v40 }
0x103a   :  { %v2467_v63 = vpack.c.bf16 %v2466_v56, %v2466_v56 }
0x103c   :  { %2501 = vmatmul.mubr.bf16.vlgmr.msra.gmra.mxu0 %v2467_v63  ;;  %v6830_v63 = vld [vmem:[#allocation33_spill] sm:$0xff] }
0x103d   :  { %2629 = vmatpush1.bf16.msra.mxu0 %v5828_v11  ;;  %2652 = vmatprep.mubr.bf16.mxu0 %v6766_v8 }
0x103e   :  { %2630 = vmatprep.subr.bf16.mxu0 %v5832_v58 }
0x1041   :  { %2631 = vmatpush1.bf16.msra.mxu0 %v5835_v52  ;;  %v2278_v52 = vsub.f32 0.0, %v2276_v41 }
0x1042   :  { %2632 = vmatprep.subr.bf16.mxu0 %v5838_v6 }
0x1043   :  { %v2280_v6 = vmul.f32 1.442695, %v2278_v52 }
0x1045   :  { %2633 = vmatpush1.bf16.msra.mxu0 %v5841_v59 }
0x1046   :  { %2634 = vmatprep.subr.bf16.mxu0 %v4711_v13 }
0x1049   :  { %2635 = vmatpush1.bf16.msra.mxu0 %v4712_v34 }
0x104a   :  { %2776 = vmatprep.subr.bf16.mxu0 %v6071_v7 }
0x1075   :  { %v2425_v37 = vpop.f32.mrf.mxu1 }
0x1076   :  { %v2426_v39 = vadd.f32 %v2425_v37, %v5212_v10 }
0x1077   :  { %v2427_v19 = vpop.f32.mrf.mxu1 }
0x1078   :  { %v6075_v15 = vadd.f32 %v2427_v19, %v5204_v54  ;;  %v2432_v23 = vsub.f32 0.0, %v2426_v39 }
0x1079   :  { %v2429_v30 = vpop.f32.mrf.mxu1 }
0x107a   :  { %4379 = vtanh.f32 %v6075_v15  ;;  %v2434_v1 = vmul.f32 1.442695, %v2432_v23 }
0x107b   :  { %v2430_v17 = vpop.f32.mrf.mxu1 }
0x1087   :  { %v4380_v3 = vpop.eup %4379 }
0x1088   :  { %2447 = vrot.lane.b32.xlu0 %v4380_v3, %s4832_s28 }
0x108a   :  { %v2294_v28 = vpop.permute.xlu1 %2293 }
0x1095   :  { %v2579_v49 = vpop.f32.mrf.mxu1 }
0x1096   :  { %v2580_v13 = vadd.f32 %v2579_v49, %v6830_v63 }
0x1097   :  { %v2581_v50 = vpop.f32.mrf.mxu1 }
0x1098   :  { %v6080_v16 = vadd.f32 %v2581_v50, %v5610_v0  ;;  %v2586_v34 = vsub.f32 0.0, %v2580_v13 }
0x1099   :  { %v2583_v9 = vpop.f32.mrf.mxu1 }
0x109a   :  { %4381 = vtanh.f32 %v6080_v16  ;;  %v2588_v37 = vmul.f32 1.442695, %v2586_v34  ;;  %v6831_v9 = vld [vmem:[#allocation19_spill] sm:$0xff] }
0x109b   :  { %v2584_v11 = vpop.f32.mrf.mxu1  ;;  %4383 = vpow2.f32 %v2280_v6 }
0x10a7   :  { %v4382_v58 = vpop.eup %4381 }
0x10a8   :  { %2601 = vrot.lane.b32.xlu0 %v4382_v58, %s4832_s28  ;;  %v4384_v59 = vpop.eup %4383 }
0x10a9   :  { %v2284_v44 = vadd.f32 1.0, %v4384_v59 }
0x10ca   :  { %v2348_v14 = vpop.f32.mrf.mxu0 }
0x10cc   :  { %v2350_v47 = vpop.f32.mrf.mxu0 }
0x10cd   :  { %v6086_v55 = vadd.f32 %v2350_v47, %v6829_v61 }
0x10ce   :  { %v2352_v31 = vpop.f32.mrf.mxu0 }
0x10cf   :  { %4385 = vtanh.f32 %v6086_v55  ;;  %v2349_v31 = vadd.f32 %v2348_v14, %v5098_v12 }
0x10d0   :  { %v2353_v60 = vpop.f32.mrf.mxu0  ;;  %4387 = vrcp.f32 %v2284_v44 }
0x10d1   :  { %4389 = vpow2.f32 %v2434_v1  ;;  %v2355_v60 = vsub.f32 0.0, %v2349_v31 }
0x10d3   :  { %v2357_v23 = vmul.f32 1.442695, %v2355_v60 }
0x10dc   :  { %v4386_v41 = vpop.eup %4385 }
0x10dd   :  { %2370 = vrot.lane.b32.xlu1 %v4386_v41, %s4832_s28  ;;  %v4388_v33 = vpop.eup %4387 }
0x10de   :  { %v2296_v25 = vmul.f32 %v4388_v33, %v2294_v28  ;;  %v4390_v40 = vpop.eup %4389 }
0x10df   :  { %v2438_v56 = vadd.f32 1.0, %v4390_v40 }
0x10e1   :  { %2298 = vrot.lane.b32.xlu1 %v2296_v25, %s4832_s28  ;;  %4391 = vrcp.f32 %v2438_v56 }
0x10e2   :  { %4393 = vpow2.f32 %v2588_v37 }
0x10ee   :  { %v4392_v19 = vpop.eup %4391 }
0x10ef   :  { %v4394_v6 = vpop.eup %4393 }
0x10f0   :  { %v2592_v59 = vadd.f32 1.0, %v4394_v6 }
0x10fa   :  { %v2448_v30 = vpop.permute.xlu0 %2447 }
0x10fb   :  { %v2450_v17 = vmul.f32 %v4392_v19, %v2448_v30  ;;  %v2445_v30 = vmul.f32 %v4392_v19, %v5878_v29 }
0x10fc   :  { %v2502_v3 = vpop.f32.mrf.mxu0 }
0x10fd   :  { %2452 = vrot.lane.b32.xlu0 %v2450_v17, %s4832_s28  ;;  %v2503_v56 = vadd.f32 %v2502_v3, %v5398_v36 }
0x10fe   :  { %v2504_v50 = vpop.f32.mrf.mxu0 }
0x10ff   :  { %v6094_v11 = vadd.f32 %v2504_v50, %v6831_v9  ;;  %v2509_v13 = vsub.f32 0.0, %v2503_v56 }
0x1100   :  { %v2506_v58 = vpop.f32.mrf.mxu0 }
0x1101   :  { %4395 = vtanh.f32 %v6094_v11  ;;  %v2511_v34 = vmul.f32 1.442695, %v2509_v13  ;;  %v2291_v58 = vmul.f32 %v4388_v33, %v5880_v38 }
0x1102   :  { %v2507_v52 = vpop.f32.mrf.mxu0  ;;  %4397 = vrcp.f32 %v2592_v59 }
0x1103   :  { %4399 = vpow2.f32 %v2357_v23 }
0x110e   :  { %v4396_v49 = vpop.eup %4395 }
0x110f   :  { %2524 = vrot.lane.b32.xlu0 %v4396_v49, %s4832_s28  ;;  %v4398_v47 = vpop.eup %4397 }
0x1110   :  { %v4400_v1 = vpop.eup %4399  ;;  %v2599_v38 = vmul.f32 %v4398_v47, %v5888_v4 }
0x1111   :  { %v2361_v41 = vadd.f32 1.0, %v4400_v1  ;;  %v2433_v1 = vsub.f32 0.0, %v6075_v15 }
0x1113   :  { %4401 = vrcp.f32 %v2361_v41  ;;  %v2279_v41 = vsub.f32 0.0, %v6042_v32  ;;  %v2436_v4 = vmul.f32 1.442695, %v2433_v1  ;;  %v6162_v1 = vld [vmem:[#allocation7 + $0xb4] ss:$8 sps:$4 sm:$0xff]  }
0x1114   :  { %4403 = vpow2.f32 %v2511_v34 }
0x111a   :  { %v2602_v44 = vpop.permute.xlu0 %2601 }
0x111b   :  { %v2604_v39 = vmul.f32 %v4398_v47, %v2602_v44  ;;  %v2282_v47 = vmul.f32 1.442695, %v2279_v41  ;;  %v6165_v41 = vld [vmem:[#allocation7 + $0xb0] ss:$8 sps:$4 sm:$0xff]  }
0x111d   :  { %2606 = vrot.lane.b32.xlu1 %v2604_v39, %s4832_s28 }
0x1120   :  { %v4402_v28 = vpop.eup %4401 }
0x1121   :  { %v4404_v37 = vpop.eup %4403  ;;  %v2368_v31 = vmul.f32 %v4402_v28, %v5893_v46 }
0x1122   :  { %v2515_v50 = vadd.f32 1.0, %v4404_v37 }
0x114f   :  { %v2371_v25 = vpop.permute.xlu1 %2370 }
0x1150   :  { %v2373_v40 = vmul.f32 %v4402_v28, %v2371_v25  ;;  %v2587_v28 = vsub.f32 0.0, %v6080_v16 }
0x1152   :  { %2375 = vrot.lane.b32.xlu0 %v2373_v40, %s4832_s28  ;;  %v2590_v34 = vmul.f32 1.442695, %v2587_v28  ;;  %v6181_v28 = vld [vmem:[#allocation7 + $0x84] ss:$8 sps:$4 sm:$0xff]  }
0x1153   :  { %v2299_v14 = vpop.permute.xlu1 %2298 }
0x1154   :  { %v6106_v6 = vadd.f32 %v2299_v14, %v2291_v58 }
0x116f   :  { %v2453_v17 = vpop.permute.xlu0 %2452 }
0x1170   :  { %v6104_v52 = vadd.f32 %v2453_v17, %v2445_v30 }
0x1172   :  { %4405 = vtanh.f32 %v6104_v52 }
0x1173   :  { %4407 = vrcp.f32 %v2515_v50 }
0x1174   :  { %4409 = vtanh.f32 %v6106_v6 }
0x117f   :  { %v4406_v3 = vpop.eup %4405 }
0x1180   :  { %2458 = vrot.lane.b32.xlu1 %v4406_v3, %s4832_s28  ;;  %v4408_v59 = vpop.eup %4407 }
0x1181   :  { %v2525_v49 = vpop.permute.xlu0 %2524  ;;  %v4410_v19 = vpop.eup %4409  ;;  %v2522_v30 = vmul.f32 %v4408_v59, %v5905_v48  ;;  %v6143_v48 = vld [vmem:[#allocation7 + $0xe4] ss:$8 sps:$4 sm:$0xff]  }
0x1182   :  { %v2527_v29 = vmul.f32 %v4408_v59, %v2525_v49  ;;  %v6139_v49 = vld [vmem:[#allocation7 + $0xf0] ss:$8 sps:$4 sm:$0xff]  }
0x1184   :  { %2304 = vrot.lane.b32.xlu1 %v4410_v19, %s4832_s28  ;;  %2529 = vrot.lane.b32.xlu0 %v2527_v29, %s4832_s28  ;;  %v6146_v29 = vld [vmem:[#allocation7 + $0xe0] ss:$8 sps:$4 sm:$0xff]  }
0x118f   :  { %v2607_v33 = vpop.permute.xlu1 %2606 }
0x1190   :  { %v6114_v44 = vadd.f32 %v2607_v33, %v2599_v38  ;;  %v6149_v38 = vld [vmem:[#allocation7 + $0xd4] ss:$8 sps:$4 sm:$0xff]   ;;  %v6152_v33 = vld [vmem:[#allocation7 + $0xd0] ss:$8 sps:$4 sm:$0xff]  }
0x1192   :  { %4411 = vtanh.f32 %v6114_v44 }
0x119f   :  { %v4412_v39 = vpop.eup %4411 }
0x11a0   :  { %2612 = vrot.lane.b32.xlu0 %v4412_v39, %s4832_s28  ;;  %v6155_v39 = vld [vmem:[#allocation7 + $0xc4] ss:$8 sps:$4 sm:$0xff]  }
0x11c4   :  { %v2376_v60 = vpop.permute.xlu0 %2375 }
0x11c5   :  { %v6119_v23 = vadd.f32 %v2376_v60, %v2368_v31  ;;  %v6159_v60 = vld [vmem:[#allocation7 + $0xc0] ss:$8 sps:$4 sm:$0xff]  }
0x11c7   :  { %4413 = vtanh.f32 %v6119_v23 }
0x11c8   :  { %4415 = vpow2.f32 %v2436_v4  ;;  %v6168_v4 = vld [vmem:[#allocation7 + $0xa4] ss:$8 sps:$4 sm:$0xff]  }
0x11c9   :  { %4417 = vpow2.f32 %v2282_v47  ;;  %v6171_v47 = vld [vmem:[#allocation7 + $0xa0] ss:$8 sps:$4 sm:$0xff]  }
0x11d4   :  { %v4414_v25 = vpop.eup %4413 }
0x11d5   :  { %2381 = vrot.lane.b32.xlu1 %v4414_v25, %s4832_s28  ;;  %v4416_v40 = vpop.eup %4415  ;;  %v6174_v25 = vld [vmem:[#allocation7 + $0x94] ss:$8 sps:$4 sm:$0xff]  }
0x11d6   :  { %v2439_v56 = vadd.f32 1.0, %v4416_v40  ;;  %v4418_v13 = vpop.eup %4417 }
0x11d7   :  { %v2285_v46 = vadd.f32 1.0, %v4418_v13 }
0x11d8   :  { %4419 = vrcp.f32 %v2439_v56 }
0x11d9   :  { %4421 = vrcp.f32 %v2285_v46  ;;  %v6177_v46 = vld [vmem:[#allocation7 + $0x90] ss:$8 sps:$4 sm:$0xff]  }
0x11da   :  { %4423 = vpow2.f32 %v2590_v34  ;;  %v6184_v34 = vld [vmem:[#allocation7 + $0x80] ss:$8 sps:$4 sm:$0xff]  }
0x11e5   :  { %v4420_v15 = vpop.eup %4419 }
0x11e6   :  { %v4422_v14 = vpop.eup %4421 }
0x11e7   :  { %v4424_v59 = vpop.eup %4423 }
0x11e8   :  { %v2593_v19 = vadd.f32 1.0, %v4424_v59  ;;  %v2510_v59 = vsub.f32 0.0, %v6094_v11 }
0x11f2   :  { %v2459_v37 = vpop.permute.xlu1 %2458 }
0x11f3   :  { %v6126_v32 = vmul.f32 %v4420_v15, %v2459_v37  ;;  %v2356_v15 = vsub.f32 0.0, %v6086_v55 }
0x11f5   :  { %2771 = vrot.lane.b32.xlu0 %v6126_v32, %s4832_s28  ;;  %v2359_v37 = vmul.f32 1.442695, %v2356_v15 }
0x11f6   :  { %v2305_v17 = vpop.permute.xlu1 %2304  ;;  %v2530_v50 = vpop.permute.xlu0 %2529 }
0x11f7   :  { %v6131_v58 = vmul.f32 %v4422_v14, %v2305_v17  ;;  %v6133_v3 = vadd.f32 %v2530_v50, %v2522_v30 }
0x11f9   :  { %v2616_v16 = vpack.c.bf16 %v6131_v58, %v6131_v58  ;;  %4425 = vtanh.f32 %v6133_v3 }
0x11fa   :  { %4427 = vrcp.f32 %v2593_v19  ;;  %v2513_v19 = vmul.f32 1.442695, %v2510_v59  ;;  %v6255_v59 = vld [vmem:[#allocation7 + $0x140] ss:$8 sps:$4 sm:$0xff]  }
0x11fb   :  { %3985 = vmatmul.mubr.msk.bf16.vlgmr.msra.gmra.mxu0 %vm268_vm3, %v2616_v16  ;;  %4429 = vpow2.f32 %v2359_v37 }
0x11fc   :  { %2777 = vmatpush1.bf16.msra.mxu0 %v6139_v49  ;;  %2808 = vmatprep.mubr.bf16.mxu0 %v6766_v8 }
0x11fd   :  { %2778 = vmatprep.subr.bf16.mxu0 %v6143_v48 }
0x1200   :  { %2779 = vmatpush1.bf16.msra.mxu0 %v6146_v29 }
0x1201   :  { %2780 = vmatprep.subr.bf16.mxu0 %v6149_v38 }
0x1204   :  { %2781 = vmatpush1.bf16.msra.mxu0 %v6152_v33 }
0x1205   :  { %2782 = vmatprep.subr.bf16.mxu0 %v6155_v39 }
0x1206   :  { %v4426_v31 = vpop.eup %4425 }
0x1207   :  { %2535 = vrot.lane.b32.xlu1 %v4426_v31, %s4832_s28  ;;  %v4428_v40 = vpop.eup %4427 }
0x1208   :  { %2783 = vmatpush1.bf16.msra.mxu0 %v6159_v60  ;;  %v4430_v30 = vpop.eup %4429 }
0x1209   :  { %2784 = vmatprep.subr.bf16.mxu0 %v6162_v1  ;;  %v2362_v14 = vadd.f32 1.0, %v4430_v30 }
0x120b   :  { %4431 = vrcp.f32 %v2362_v14 }
0x120c   :  { %2785 = vmatpush1.bf16.msra.mxu0 %v6165_v41  ;;  %4433 = vpow2.f32 %v2513_v19  ;;  %v6258_v19 = vld [vmem:[#allocation7 + $0x134] ss:$8 sps:$4 sm:$0xff]  }
0x120d   :  { %2786 = vmatprep.subr.bf16.mxu0 %v6168_v4 }
0x1210   :  { %2787 = vmatpush1.bf16.msra.mxu0 %v6171_v47 }
0x1211   :  { %2788 = vmatprep.subr.bf16.mxu0 %v6174_v25 }
0x1212   :  { %v2613_v56 = vpop.permute.xlu0 %2612 }
0x1213   :  { %v2615_v13 = vmul.f32 %v4428_v40, %v2613_v56 }
0x1214   :  { %2789 = vmatpush1.bf16.msra.mxu0 %v6177_v46 }
0x1215   :  { %2925 = vrot.lane.b32.xlu0 %v2615_v13, %s4832_s28  ;;  %2790 = vmatprep.subr.bf16.mxu0 %v6181_v28 }
0x1218   :  { %2791 = vmatpush1.bf16.msra.mxu0 %v6184_v34  ;;  %v4432_v17 = vpop.eup %4431 }
0x1219   :  { %2930 = vmatprep.subr.bf16.mxu0 %v5931_v20  ;;  %v4434_v31 = vpop.eup %4433 }
0x121a   :  { %v2516_v56 = vadd.f32 1.0, %v4434_v31  ;;  %v6261_v31 = vld [vmem:[#allocation7 + $0x130] ss:$8 sps:$4 sm:$0xff]  }
0x121c   :  { %4435 = vrcp.f32 %v2516_v56  ;;  %v6267_v56 = vld [vmem:[#allocation7 + $0x120] ss:$8 sps:$4 sm:$0xff]  }
0x1229   :  { %v4436_v11 = vpop.eup %4435 }
0x1247   :  { %v2382_v50 = vpop.permute.xlu1 %2381 }
0x1248   :  { %v2384_v16 = vmul.f32 %v4432_v17, %v2382_v50  ;;  %v6236_v17 = vld [vmem:[#allocation7 + $0x170] ss:$8 sps:$4 sm:$0xff]  }
0x1249   :  { %v6249_v50 = vld [vmem:[#allocation7 + $0x150] ss:$8 sps:$4 sm:$0xff]  }
0x124a   :  { %2694 = vrot.lane.b32.xlu1 %v2384_v16, %s4832_s28 }
0x1267   :  { %v2772_v40 = vpop.permute.xlu0 %2771 }
0x1268   :  { %v2774_v13 = vsel %vm268_vm3, %v2384_v16, %v2772_v40  ;;  %v6252_v16 = vld [vmem:[#allocation7 + $0x144] ss:$8 sps:$4 sm:$0xff]  }
0x1269   :  { %v2775_v55 = vpack.c.bf16 %v2774_v13, %v2774_v13  ;;  %v6264_v40 = vld [vmem:[#allocation7 + $0x124] ss:$8 sps:$4 sm:$0xff]   ;;  %v6270_v13 = vld [vmem:[#allocation7 + $0x114] ss:$8 sps:$4 sm:$0xff]  }
0x126b   :  { %2809 = vmatmul.mubr.bf16.vlgmr.msra.gmra.mxu0 %v2775_v55  ;;  %v6273_v55 = vld [vmem:[#allocation7 + $0x110] ss:$8 sps:$4 sm:$0xff]  }
0x126c   :  { %2931 = vmatpush1.bf16.msra.mxu0 %v5938_v45  ;;  %2962 = vmatprep.mubr.bf16.mxu0 %v6766_v8  ;;  %v6832_v45 = vld [vmem:[#allocation21_spill] sm:$0xff] }
0x126d   :  { %2932 = vmatprep.subr.bf16.mxu0 %v5942_v2 }
0x1270   :  { %2933 = vmatpush1.bf16.msra.mxu0 %v5945_v43 }
0x1271   :  { %2934 = vmatprep.subr.bf16.mxu0 %v5948_v51  ;;  %v6833_v51 = vld [vmem:[#allocation23_spill] sm:$0xff] }
0x1274   :  { %2935 = vmatpush1.bf16.msra.mxu0 %v5951_v27 }
0x1275   :  { %2936 = vmatprep.subr.bf16.mxu0 %v5954_v42  ;;  %v6834_v42 = vld [vmem:[#allocation14_spill] sm:$0xff] }
0x1278   :  { %2937 = vmatpush1.bf16.msra.mxu0 %v5957_v21  ;;  %v216_v21 = vadd.f32 %v6834_v42, %v4945_v22  ;;  %v6240_v22 = vld [vmem:[#allocation7 + $0x164] ss:$8 sps:$4 sm:$0xff]  }
0x1279   :  { %v2536_v15 = vpop.permute.xlu1 %2535  ;;  %2938 = vmatprep.subr.bf16.mxu0 %v5960_v18  ;;  %v6838_v42 = vld [vmem:[#allocation27_spill] sm:$0xff] }
0x127a   :  { %v2538_v37 = vmul.f32 %v4436_v11, %v2536_v15  ;;  %v6276_v11 = vld [vmem:[#allocation7 + $0x104] ss:$8 sps:$4 sm:$0xff]   ;;  %v6279_v15 = vld [vmem:[#allocation7 + $0x100] ss:$8 sps:$4 sm:$0xff]  }
0x127c   :  { %2939 = vmatpush1.bf16.msra.mxu0 %v5963_v62  ;;  %2848 = vrot.lane.b32.xlu0 %v2538_v37, %s4832_s28 }
0x127d   :  { %2940 = vmatprep.subr.bf16.mxu0 %v5967_v24 }
0x1280   :  { %2941 = vmatpush1.bf16.msra.mxu0 %v5970_v57 }
0x1281   :  { %2942 = vmatprep.subr.bf16.mxu0 %v5973_v53 }
0x1284   :  { %2943 = vmatpush1.bf16.msra.mxu0 %v5976_v35 }
0x1285   :  { %2944 = vmatprep.subr.bf16.mxu0 %v6832_v45 }
0x1287   :  { %v2926_v2 = vpop.permute.xlu0 %2925 }
0x1288   :  { %v2928_v43 = vsel %vm268_vm3, %v2538_v37, %v2926_v2  ;;  %2945 = vmatpush1.bf16.msra.mxu0 %v6833_v51  ;;  %v6835_v37 = vld [vmem:[#allocation24_spill] sm:$0xff]  ;;  %v6836_v51 = vld [vmem:[#allocation25_spill] sm:$0xff] }
0x1289   :  { %v2929_v27 = vpack.c.bf16 %v2928_v43, %v2928_v43  ;;  %3084 = vmatprep.subr.bf16.mxu0 %v6071_v7 }
0x128b   :  { %2963 = vmatmul.mubr.bf16.vlgmr.msra.gmra.mxu0 %v2929_v27  ;;  %v6837_v27 = vld [vmem:[#allocation26_spill] sm:$0xff] }
0x128c   :  { %3085 = vmatpush1.bf16.msra.mxu0 %v6139_v49  ;;  %3116 = vmatprep.mubr.bf16.mxu0 %v6766_v8 }
0x128d   :  { %3086 = vmatprep.subr.bf16.mxu0 %v6143_v48 }
0x1290   :  { %3087 = vmatpush1.bf16.msra.mxu0 %v6146_v29 }
0x1291   :  { %3088 = vmatprep.subr.bf16.mxu0 %v6149_v38 }
0x1294   :  { %3089 = vmatpush1.bf16.msra.mxu0 %v6152_v33 }
0x1295   :  { %3090 = vmatprep.subr.bf16.mxu0 %v6155_v39 }
0x1298   :  { %3091 = vmatpush1.bf16.msra.mxu0 %v6159_v60 }
0x1299   :  { %3092 = vmatprep.subr.bf16.mxu0 %v6162_v1 }
0x129c   :  { %3093 = vmatpush1.bf16.msra.mxu0 %v6165_v41 }
0x129d   :  { %3094 = vmatprep.subr.bf16.mxu0 %v6168_v4 }
0x12a0   :  { %3095 = vmatpush1.bf16.msra.mxu0 %v6171_v47 }
0x12a1   :  { %3096 = vmatprep.subr.bf16.mxu0 %v6174_v25 }
0x12a4   :  { %3097 = vmatpush1.bf16.msra.mxu0 %v6177_v46 }
0x12a5   :  { %3098 = vmatprep.subr.bf16.mxu0 %v6181_v28 }
0x12a8   :  { %3099 = vmatpush1.bf16.msra.mxu0 %v6184_v34 }
0x12a9   :  { %3238 = vmatprep.subr.bf16.mxu0 %v5931_v20  ;;  %v6243_v20 = vld [vmem:[#allocation7 + $0x160] ss:$8 sps:$4 sm:$0xff]  }
0x12bb   :  { %v2654_v18 = vpop.f32.mrf.mxu0 }
0x12bc   :  { %v6230_v62 = vadd.f32 %v2654_v18, %v216_v21  ;;  %v2695_v24 = vpop.permute.xlu1 %2694  ;;  %v6839_v21 = vld [vmem:[#allocation28_spill] sm:$0xff]  ;;  %v6840_v18 = vld [vmem:[#allocation29_spill] sm:$0xff] }
0x12bd   :  { %v2697_v57 = vsel %vm268_vm3, %v6131_v58, %v2695_v24  ;;  %v6234_v53 = vpop.f32.mrf.mxu0  ;;  %v6246_v58 = vld [vmem:[#allocation7 + $0x154] ss:$8 sps:$4 sm:$0xff]   ;;  %v6841_v24 = vld [vmem:[#allocation30_spill] sm:$0xff] }
0x12be   :  { %v2698_v35 = vpack.c.bf16 %v2697_v57, %v2697_v57  ;;  %v6842_v57 = vld [vmem:[#allocation31_spill] sm:$0xff] }
0x12bf   :  { %v2658_v30 = vpop.f32.mrf.mxu0 }
0x12c0   :  { %2732 = vmatmul.mubr.bf16.vlgmr.msra.gmra.mxu1 %v2698_v35  ;;  %v6843_v35 = vld [vmem:[#allocation10_spill] sm:$0xff]  ;;  %v6845_v30 = vld [vmem:[#allocation20_spill] sm:$0xff] }
0x12c1   :  { %v2659_v14 = vpop.f32.mrf.mxu0  ;;  %2854 = vmatpush1.bf16.msra.mxu1 %v6236_v17  ;;  %2885 = vmatprep.mubr.bf16.mxu1 %v6766_v8 }
0x12c2   :  { %2855 = vmatprep.subr.bf16.mxu1 %v6240_v22  ;;  %v6846_v14 = vld [vmem:[#allocation22_spill] sm:$0xff] }
0x12c5   :  { %2856 = vmatpush1.bf16.msra.mxu1 %v6243_v20 }
0x12c6   :  { %2857 = vmatprep.subr.bf16.mxu1 %v6246_v58 }
0x12c9   :  { %2858 = vmatpush1.bf16.msra.mxu1 %v6249_v50 }
0x12ca   :  { %2859 = vmatprep.subr.bf16.mxu1 %v6252_v16 }
0x12cd   :  { %2860 = vmatpush1.bf16.msra.mxu1 %v6255_v59 }
0x12ce   :  { %2861 = vmatprep.subr.bf16.mxu1 %v6258_v19 }
0x12d1   :  { %2862 = vmatpush1.bf16.msra.mxu1 %v6261_v31 }
0x12d2   :  { %2863 = vmatprep.subr.bf16.mxu1 %v6264_v40 }
0x12d5   :  { %2864 = vmatpush1.bf16.msra.mxu1 %v6267_v56 }
0x12d6   :  { %2865 = vmatprep.subr.bf16.mxu1 %v6270_v13 }
0x12d9   :  { %2866 = vmatpush1.bf16.msra.mxu1 %v6273_v55 }
0x12da   :  { %2867 = vmatprep.subr.bf16.mxu1 %v6276_v11 }
0x12dd   :  { %2868 = vmatpush1.bf16.msra.mxu1 %v6279_v15 }
0x12de   :  { %3007 = vmatprep.subr.bf16.mxu1 %v6835_v37  ;;  %v6847_v37 = vld [vmem:[#allocation34_spill] sm:$0xff] }
0x12ee   :  { %v2849_v45 = vpop.permute.xlu0 %2848 }
0x12ef   :  { %v2851_v2 = vsel %vm268_vm3, %v6126_v32, %v2849_v45  ;;  %v6844_v32 = vld [vmem:[#allocation11_spill] sm:$0xff] }
0x12f0   :  { %v2852_v43 = vpack.c.bf16 %v2851_v2, %v2851_v2  ;;  %v6848_v45 = vld [vmem:[#allocation35_spill] sm:$0xff]  ;;  %v6849_v2 = vld [vmem:[#allocation36_spill] sm:$0xff] }
0x12f2   :  { %2886 = vmatmul.mubr.bf16.vlgmr.msra.gmra.mxu1 %v2852_v43  ;;  %v6301_v43 = vld [vmem:[#allocation7 + $0x174] ss:$8 sps:$4 sm:$0xff]  }
0x12f3   :  { %3008 = vmatpush1.bf16.msra.mxu1 %v6836_v51  ;;  %3039 = vmatprep.mubr.bf16.mxu1 %v6766_v8 }
0x12f4   :  { %3009 = vmatprep.subr.bf16.mxu1 %v6837_v27 }
0x12f7   :  { %3010 = vmatpush1.bf16.msra.mxu1 %v6838_v42 }
0x12f8   :  { %3011 = vmatprep.subr.bf16.mxu1 %v6839_v21 }
0x12fb   :  { %3012 = vmatpush1.bf16.msra.mxu1 %v6840_v18 }
0x12fc   :  { %3013 = vmatprep.subr.bf16.mxu1 %v6841_v24 }
0x12ff   :  { %3014 = vmatpush1.bf16.msra.mxu1 %v6842_v57 }
0x1300   :  { %3015 = vmatprep.subr.bf16.mxu1 %v6843_v35 }
0x1303   :  { %3016 = vmatpush1.bf16.msra.mxu1 %v6844_v32 }
0x1304   :  { %3017 = vmatprep.subr.bf16.mxu1 %v6845_v30 }
0x1307   :  { %3018 = vmatpush1.bf16.msra.mxu1 %v6846_v14 }
0x1308   :  { %3019 = vmatprep.subr.bf16.mxu1 %v6847_v37 }
0x130b   :  { %3020 = vmatpush1.bf16.msra.mxu1 %v6848_v45 }
0x130c   :  { %3021 = vmatprep.subr.bf16.mxu1 %v6849_v2 }
0x130f   :  { %3022 = vmatpush1.bf16.msra.mxu1 %v6032_v5 }
0x1310   :  { %3161 = vmatprep.subr.bf16.mxu1 %v6301_v43 }
0x132b   :  { %v2810_v51 = vpop.f32.mrf.mxu0 }
0x132c   :  { %v2811_v2 = vadd.f32 %v2810_v51, %v5212_v10 }
0x132d   :  { %v2812_v27 = vpop.f32.mrf.mxu0 }
0x132e   :  { %v6305_v42 = vadd.f32 %v2812_v27, %v5204_v54 }
0x132f   :  { %v2814_v21 = vpop.f32.mrf.mxu0 }
0x1330   :  { %4437 = vtanh.f32 %v6305_v42 }
0x1331   :  { %v2815_v18 = vpop.f32.mrf.mxu0 }
0x133d   :  { %v4438_v24 = vpop.eup %4437 }
0x133e   :  { %2832 = vrot.lane.b32.xlu1 %v4438_v24, %s4832_s28  ;;  %v2817_v24 = vsub.f32 0.0, %v2811_v2 }
0x134b   :  { %v2964_v57 = vpop.f32.mrf.mxu0 }
0x134d   :  { %v2966_v35 = vpop.f32.mrf.mxu0 }
0x134e   :  { %v6310_v5 = vadd.f32 %v2966_v35, %v5610_v0  ;;  %v2819_v35 = vmul.f32 1.442695, %v2817_v24 }
0x134f   :  { %v2968_v32 = vpop.f32.mrf.mxu0 }
0x1350   :  { %4439 = vtanh.f32 %v6310_v5 }
0x1351   :  { %v2969_v30 = vpop.f32.mrf.mxu0 }
0x135d   :  { %v4440_v14 = vpop.eup %4439 }
0x135e   :  { %2986 = vrot.lane.b32.xlu0 %v4440_v14, %s4832_s28  ;;  %v2965_v14 = vadd.f32 %v2964_v57, %v6830_v63 }
0x1360   :  { %v2971_v54 = vsub.f32 0.0, %v2965_v14 }
0x1362   :  { %v2973_v51 = vmul.f32 1.442695, %v2971_v54 }
0x1380   :  { %v2733_v37 = vpop.f32.mrf.mxu1 }
0x1382   :  { %v2735_v45 = vpop.f32.mrf.mxu1 }
0x1383   :  { %v6316_v27 = vadd.f32 %v2735_v45, %v6829_v61 }
0x1384   :  { %v2737_v21 = vpop.f32.mrf.mxu1 }
0x1385   :  { %4441 = vtanh.f32 %v6316_v27 }
0x1386   :  { %v2738_v18 = vpop.f32.mrf.mxu1  ;;  %4443 = vpow2.f32 %v2819_v35 }
0x1387   :  { %v6850_v18 = vld [vmem:[#allocation15_spill] sm:$0xff] }
0x1388   :  { %v218_v24 = vadd.f32 %v6850_v18, %v4951_v26 }
0x1392   :  { %v4442_v32 = vpop.eup %4441 }
0x1393   :  { %2755 = vrot.lane.b32.xlu1 %v4442_v32, %s4832_s28  ;;  %v4444_v30 = vpop.eup %4443 }
0x1394   :  { %v2823_v0 = vadd.f32 1.0, %v4444_v30 }
0x1396   :  { %4445 = vrcp.f32 %v2823_v0  ;;  %v6328_v0 = vadd.f32 %v6234_v53, %v218_v24  ;;  %v2734_v53 = vadd.f32 %v2733_v37, %v5098_v12 }
0x1397   :  { %4447 = vpow2.f32 %v2973_v51 }
0x13a3   :  { %v4446_v45 = vpop.eup %4445 }
0x13b0   :  { %v2833_v61 = vpop.permute.xlu1 %2832 }
0x13b1   :  { %v2835_v21 = vmul.f32 %v4446_v45, %v2833_v61  ;;  %v4448_v61 = vpop.eup %4447 }
0x13b2   :  { %v2887_v10 = vpop.f32.mrf.mxu1  ;;  %v2977_v57 = vadd.f32 1.0, %v4448_v61 }
0x13b3   :  { %2837 = vrot.lane.b32.xlu0 %v2835_v21, %s4832_s28 }
0x13b4   :  { %v2889_v2 = vpop.f32.mrf.mxu1 }
0x13b5   :  { %v6325_v35 = vadd.f32 %v2889_v2, %v6831_v9  ;;  %v2740_v2 = vsub.f32 0.0, %v2734_v53  ;;  %v2830_v53 = vmul.f32 %v4446_v45, %v6104_v52 }
0x13b6   :  { %v2891_v32 = vpop.f32.mrf.mxu1 }
0x13b7   :  { %4449 = vtanh.f32 %v6325_v35  ;;  %v2742_v18 = vmul.f32 1.442695, %v2740_v2 }
0x13b8   :  { %v2892_v54 = vpop.f32.mrf.mxu1  ;;  %4451 = vtanh.f32 %v6328_v0 }
0x13b9   :  { %4453 = vrcp.f32 %v2977_v57 }
0x13ba   :  { %4455 = vpow2.f32 %v2742_v18 }
0x13c4   :  { %v4450_v30 = vpop.eup %4449 }
0x13c5   :  { %2909 = vrot.lane.b32.xlu1 %v4450_v30, %s4832_s28  ;;  %v4452_v14 = vpop.eup %4451  ;;  %v2888_v30 = vadd.f32 %v2887_v10, %v5398_v36 }
0x13c6   :  { %v4454_v26 = vpop.eup %4453 }
0x13c7   :  { %v4456_v24 = vpop.eup %4455 }
0x13c8   :  { %v2746_v32 = vadd.f32 1.0, %v4456_v24 }
0x13c9   :  { %2678 = vrot.lane.b32.xlu1 %v4452_v14, %s4832_s28  ;;  %v2894_v14 = vsub.f32 0.0, %v2888_v30 }
0x13ca   :  { %4457 = vrcp.f32 %v2746_v32 }
0x13cb   :  { %v2896_v9 = vmul.f32 1.442695, %v2894_v14  ;;  %v2984_v14 = vmul.f32 %v4454_v26, %v6114_v44 }
0x13cd   :  { %4459 = vpow2.f32 %v2896_v9 }
0x13d0   :  { %v2987_v51 = vpop.permute.xlu0 %2986 }
0x13d1   :  { %v2989_v21 = vmul.f32 %v4454_v26, %v2987_v51  ;;  %v2663_v51 = vsub.f32 0.0, %v6230_v62 }
0x13d3   :  { %2991 = vrot.lane.b32.xlu0 %v2989_v21, %s4832_s28  ;;  %v2665_v21 = vmul.f32 1.442695, %v2663_v51 }
0x13d5   :  { %4461 = vpow2.f32 %v2665_v21 }
0x13d7   :  { %v4458_v54 = vpop.eup %4457 }
0x13da   :  { %v4460_v37 = vpop.eup %4459 }
0x13db   :  { %v2900_v18 = vadd.f32 1.0, %v4460_v37 }
0x13e2   :  { %v4462_v32 = vpop.eup %4461 }
0x1405   :  { %v2756_v61 = vpop.permute.xlu1 %2755 }
0x1406   :  { %v2758_v57 = vmul.f32 %v4458_v54, %v2756_v61  ;;  %v2669_v61 = vadd.f32 1.0, %v4462_v32  ;;  %v2818_v32 = vsub.f32 0.0, %v6305_v42 }
0x1408   :  { %2760 = vrot.lane.b32.xlu0 %v2758_v57, %s4832_s28 }
0x1425   :  { %v2838_v2 = vpop.permute.xlu0 %2837 }
0x1426   :  { %v6340_v24 = vadd.f32 %v2838_v2, %v2830_v53  ;;  %v2753_v53 = vmul.f32 %v4458_v54, %v6119_v23 }
0x1428   :  { %4463 = vtanh.f32 %v6340_v24 }
0x1429   :  { %4465 = vrcp.f32 %v2900_v18 }
0x142a   :  { %4467 = vrcp.f32 %v2669_v61  ;;  %v2821_v61 = vmul.f32 1.442695, %v2818_v32 }
0x1435   :  { %v4464_v10 = vpop.eup %4463 }
0x1436   :  { %2843 = vrot.lane.b32.xlu1 %v4464_v10, %s4832_s28  ;;  %v4466_v62 = vpop.eup %4465 }
0x1437   :  { %v2910_v57 = vpop.permute.xlu1 %2909  ;;  %v4468_v30 = vpop.eup %4467  ;;  %v2907_v42 = vmul.f32 %v4466_v62, %v6133_v3 }
0x1438   :  { %v2912_v9 = vmul.f32 %v4466_v62, %v2910_v57  ;;  %v2972_v57 = vsub.f32 0.0, %v6310_v5 }
0x143a   :  { %2914 = vrot.lane.b32.xlu0 %v2912_v9, %s4832_s28  ;;  %v2975_v9 = vmul.f32 1.442695, %v2972_v57 }
0x143b   :  { %v2679_v52 = vpop.permute.xlu1 %2678 }
0x143c   :  { %v2681_v45 = vmul.f32 %v4468_v30, %v2679_v52 }
0x143e   :  { %2683 = vrot.lane.b32.xlu0 %v2681_v45, %s4832_s28 }
0x1445   :  { %v2992_v51 = vpop.permute.xlu0 %2991 }
0x1446   :  { %v6347_v21 = vadd.f32 %v2992_v51, %v2984_v14  ;;  %v2676_v51 = vmul.f32 %v4468_v30, %v6106_v6 }
0x1448   :  { %4469 = vtanh.f32 %v6347_v21 }
0x1455   :  { %v4470_v37 = vpop.eup %4469 }
0x1456   :  { %2997 = vrot.lane.b32.xlu1 %v4470_v37, %s4832_s28 }
0x147a   :  { %v2761_v2 = vpop.permute.xlu0 %2760 }
0x147b   :  { %v6352_v18 = vadd.f32 %v2761_v2, %v2753_v53 }
0x147d   :  { %4471 = vtanh.f32 %v6352_v18 }
0x147e   :  { %4473 = vpow2.f32 %v2821_v61 }
0x148a   :  { %v4472_v44 = vpop.eup %4471 }
0x148b   :  { %2766 = vrot.lane.b32.xlu1 %v4472_v44, %s4832_s28  ;;  %v4474_v26 = vpop.eup %4473 }
0x148c   :  { %v2824_v10 = vadd.f32 1.0, %v4474_v26  ;;  %v2741_v26 = vsub.f32 0.0, %v6316_v27 }
0x148e   :  { %4475 = vrcp.f32 %v2824_v10  ;;  %v2744_v6 = vmul.f32 1.442695, %v2741_v26 }
0x148f   :  { %4477 = vpow2.f32 %v2975_v9 }
0x149b   :  { %v4476_v23 = vpop.eup %4475 }
0x149c   :  { %v4478_v53 = vpop.eup %4477 }
0x149d   :  { %v2978_v2 = vadd.f32 1.0, %v4478_v53  ;;  %v6374_v53 = vld [vmem:[#allocation7 + $0x1f0] ss:$8 sps:$4 sm:$0xff]  }
0x14a8   :  { %v2844_v54 = vpop.permute.xlu1 %2843 }
0x14a9   :  { %v6358_v52 = vmul.f32 %v4476_v23, %v2844_v54  ;;  %v2895_v54 = vsub.f32 0.0, %v6325_v35  ;;  %v6381_v35 = vld [vmem:[#allocation7 + $0x1e0] ss:$8 sps:$4 sm:$0xff]  }
0x14ab   :  { %3079 = vrot.lane.b32.xlu0 %v6358_v52, %s4832_s28 }
0x14ac   :  { %v2915_v45 = vpop.permute.xlu0 %2914 }
0x14ad   :  { %v6363_v14 = vadd.f32 %v2915_v45, %v2907_v42  ;;  %v2898_v42 = vmul.f32 1.442695, %v2895_v54  ;;  %v6412_v54 = vld [vmem:[#allocation7 + $0x190] ss:$8 sps:$4 sm:$0xff]  }
0x14af   :  { %4479 = vtanh.f32 %v6363_v14 }
0x14b0   :  { %v2684_v37 = vpop.permute.xlu0 %2683 }
0x14b1   :  { %v2686_v5 = vadd.f32 %v2684_v37, %v2676_v51 }
0x14b3   :  { %4481 = vtanh.f32 %v2686_v5 }
0x14b4   :  { %4483 = vrcp.f32 %v2978_v2  ;;  %v6378_v2 = vld [vmem:[#allocation7 + $0x1e4] ss:$8 sps:$4 sm:$0xff]  }
0x14b5   :  { %4485 = vpow2.f32 %v2744_v6  ;;  %v6396_v6 = vld [vmem:[#allocation7 + $0x1b4] ss:$8 sps:$4 sm:$0xff]  }
0x14bc   :  { %v4480_v32 = vpop.eup %4479 }
0x14bd   :  { %2920 = vrot.lane.b32.xlu1 %v4480_v32, %s4832_s28  ;;  %v6384_v32 = vld [vmem:[#allocation7 + $0x1d4] ss:$8 sps:$4 sm:$0xff]  }
0x14c0   :  { %v4482_v61 = vpop.eup %4481 }
0x14c1   :  { %2689 = vrot.lane.b32.xlu1 %v4482_v61, %s4832_s28  ;;  %v4484_v3 = vpop.eup %4483  ;;  %v6387_v61 = vld [vmem:[#allocation7 + $0x1d0] ss:$8 sps:$4 sm:$0xff]  }
0x14c2   :  { %v4486_v30 = vpop.eup %4485 }
0x14c3   :  { %v2747_v10 = vadd.f32 1.0, %v4486_v30 }
0x14c5   :  { %4487 = vrcp.f32 %v2747_v10  ;;  %v6399_v10 = vld [vmem:[#allocation7 + $0x1b0] ss:$8 sps:$4 sm:$0xff]  }
0x14c6   :  { %4489 = vpow2.f32 %v2898_v42  ;;  %v6415_v42 = vld [vmem:[#allocation7 + $0x184] ss:$8 sps:$4 sm:$0xff]  }
0x14c8   :  { %v2998_v62 = vpop.permute.xlu1 %2997 }
0x14c9   :  { %v3000_v44 = vmul.f32 %v4484_v3, %v2998_v62  ;;  %v6390_v3 = vld [vmem:[#allocation7 + $0x1c4] ss:$8 sps:$4 sm:$0xff]   ;;  %v6393_v62 = vld [vmem:[#allocation7 + $0x1c0] ss:$8 sps:$4 sm:$0xff]  }
0x14cb   :  { %3233 = vrot.lane.b32.xlu0 %v3000_v44, %s4832_s28 }
0x14d2   :  { %v4488_v57 = vpop.eup %4487 }
0x14d3   :  { %v4490_v45 = vpop.eup %4489 }
0x14d4   :  { %v2901_v37 = vadd.f32 1.0, %v4490_v45 }
0x14d6   :  { %4491 = vrcp.f32 %v2901_v37  ;;  %v6419_v37 = vld [vmem:[#allocation7 + $0x180] ss:$8 sps:$4 sm:$0xff]  }
0x14e3   :  { %v4492_v44 = vpop.eup %4491 }
0x14fd   :  { %v2767_v9 = vpop.permute.xlu1 %2766 }
0x14fe   :  { %v2769_v23 = vmul.f32 %v4488_v57, %v2767_v9  ;;  %v6403_v57 = vld [vmem:[#allocation7 + $0x1a4] ss:$8 sps:$4 sm:$0xff]   ;;  %v6406_v9 = vld [vmem:[#allocation7 + $0x1a0] ss:$8 sps:$4 sm:$0xff]  }
0x1500   :  { %3002 = vrot.lane.b32.xlu0 %v2769_v23, %s4832_s28 }
0x151d   :  { %v3080_v51 = vpop.permute.xlu0 %3079 }
0x151e   :  { %v3082_v5 = vsel %vm268_vm3, %v2769_v23, %v3080_v51  ;;  %v6409_v23 = vld [vmem:[#allocation7 + $0x194] ss:$8 sps:$4 sm:$0xff]  }
0x151f   :  { %v3083_v27 = vpack.c.bf16 %v3082_v5, %v3082_v5 }
0x1521   :  { %3117 = vmatmul.mubr.bf16.vlgmr.msra.gmra.mxu0 %v3083_v27  ;;  %v2664_v27 = vsub.f32 0.0, %v6328_v0 }
0x1522   :  { %3239 = vmatpush1.bf16.msra.mxu0 %v6374_v53  ;;  %3270 = vmatprep.mubr.bf16.mxu0 %v6766_v8 }
0x1523   :  { %3240 = vmatprep.subr.bf16.mxu0 %v6378_v2 }
0x1526   :  { %3241 = vmatpush1.bf16.msra.mxu0 %v6381_v35 }
0x1527   :  { %3242 = vmatprep.subr.bf16.mxu0 %v6384_v32 }
0x152a   :  { %3243 = vmatpush1.bf16.msra.mxu0 %v6387_v61 }
0x152b   :  { %3244 = vmatprep.subr.bf16.mxu0 %v6390_v3 }
0x152e   :  { %3245 = vmatpush1.bf16.msra.mxu0 %v6393_v62 }
0x152f   :  { %v2921_v26 = vpop.permute.xlu1 %2920  ;;  %3246 = vmatprep.subr.bf16.mxu0 %v6396_v6 }
0x1530   :  { %v2923_v30 = vmul.f32 %v4492_v44, %v2921_v26  ;;  %v2667_v44 = vmul.f32 1.442695, %v2664_v27 }
0x1532   :  { %3247 = vmatpush1.bf16.msra.mxu0 %v6399_v10  ;;  %3156 = vrot.lane.b32.xlu1 %v2923_v30, %s4832_s28  ;;  %4493 = vpow2.f32 %v2667_v44 }
0x1533   :  { %3248 = vmatprep.subr.bf16.mxu0 %v6403_v57 }
0x1536   :  { %3249 = vmatpush1.bf16.msra.mxu0 %v6406_v9 }
0x1537   :  { %3250 = vmatprep.subr.bf16.mxu0 %v6409_v23 }
0x153a   :  { %3251 = vmatpush1.bf16.msra.mxu0 %v6412_v54 }
0x153b   :  { %3252 = vmatprep.subr.bf16.mxu0 %v6415_v42 }
0x153d   :  { %v3234_v45 = vpop.permute.xlu0 %3233 }
0x153e   :  { %v3236_v51 = vsel %vm268_vm3, %v2923_v30, %v3234_v45  ;;  %3253 = vmatpush1.bf16.msra.mxu0 %v6419_v37  ;;  %v2690_v30 = vpop.permute.xlu1 %2689 }
0x153f   :  { %v3237_v5 = vpack.c.bf16 %v3236_v51, %v3236_v51  ;;  %3392 = vmatprep.subr.bf16.mxu0 %v6301_v43  ;;  %v4494_v0 = vpop.eup %4493 }
0x1540   :  { %v2670_v26 = vadd.f32 1.0, %v4494_v0 }
0x1541   :  { %3271 = vmatmul.mubr.bf16.vlgmr.msra.gmra.mxu0 %v3237_v5 }
0x1542   :  { %3393 = vmatpush1.bf16.msra.mxu0 %v6236_v17  ;;  %3424 = vmatprep.mubr.bf16.mxu0 %v6766_v8  ;;  %4495 = vrcp.f32 %v2670_v26 }
0x1543   :  { %3394 = vmatprep.subr.bf16.mxu0 %v6240_v22 }
0x1546   :  { %3395 = vmatpush1.bf16.msra.mxu0 %v6243_v20 }
0x1547   :  { %3396 = vmatprep.subr.bf16.mxu0 %v6246_v58 }
0x154a   :  { %3397 = vmatpush1.bf16.msra.mxu0 %v6249_v50 }
0x154b   :  { %3398 = vmatprep.subr.bf16.mxu0 %v6252_v16 }
0x154e   :  { %3399 = vmatpush1.bf16.msra.mxu0 %v6255_v59 }
0x154f   :  { %3400 = vmatprep.subr.bf16.mxu0 %v6258_v19  ;;  %v4496_v45 = vpop.eup %4495 }
0x1550   :  { %v2692_v51 = vmul.f32 %v4496_v45, %v2690_v30  ;;  %v6853_v30 = vld [vmem:[#allocation18_spill] sm:$0xff] }
0x1552   :  { %3401 = vmatpush1.bf16.msra.mxu0 %v6261_v31 }
0x1553   :  { %3402 = vmatprep.subr.bf16.mxu0 %v6264_v40 }
0x1556   :  { %3403 = vmatpush1.bf16.msra.mxu0 %v6267_v56 }
0x1557   :  { %3404 = vmatprep.subr.bf16.mxu0 %v6270_v13 }
0x155a   :  { %3405 = vmatpush1.bf16.msra.mxu0 %v6273_v55 }
0x155b   :  { %3406 = vmatprep.subr.bf16.mxu0 %v6276_v11 }
0x155e   :  { %3407 = vmatpush1.bf16.msra.mxu0 %v6279_v15 }
0x155f   :  { %3546 = vmatprep.subr.bf16.mxu0 %v6301_v43 }
0x1572   :  { %v3003_v5 = vpop.permute.xlu0 %3002 }
0x1573   :  { %v3005_v27 = vsel %vm268_vm3, %v2692_v51, %v3003_v5  ;;  %v6854_v51 = vld [vmem:[#allocation16_spill] sm:$0xff] }
0x1574   :  { %v3006_v44 = vpack.c.bf16 %v3005_v27, %v3005_v27 }
0x1576   :  { %3040 = vmatmul.mubr.bf16.vlgmr.msra.gmra.mxu1 %v3006_v44 }
0x1577   :  { %3162 = vmatpush1.bf16.msra.mxu1 %v6236_v17  ;;  %3193 = vmatprep.mubr.bf16.mxu1 %v6766_v8 }
0x1578   :  { %3163 = vmatprep.subr.bf16.mxu1 %v6240_v22 }
0x157b   :  { %3164 = vmatpush1.bf16.msra.mxu1 %v6243_v20 }
0x157c   :  { %3165 = vmatprep.subr.bf16.mxu1 %v6246_v58 }
0x157f   :  { %3166 = vmatpush1.bf16.msra.mxu1 %v6249_v50 }
0x1580   :  { %3167 = vmatprep.subr.bf16.mxu1 %v6252_v16 }
0x1583   :  { %3168 = vmatpush1.bf16.msra.mxu1 %v6255_v59 }
0x1584   :  { %3169 = vmatprep.subr.bf16.mxu1 %v6258_v19 }
0x1587   :  { %3170 = vmatpush1.bf16.msra.mxu1 %v6261_v31 }
0x1588   :  { %3171 = vmatprep.subr.bf16.mxu1 %v6264_v40 }
0x158b   :  { %3172 = vmatpush1.bf16.msra.mxu1 %v6267_v56 }
0x158c   :  { %3173 = vmatprep.subr.bf16.mxu1 %v6270_v13 }
0x158f   :  { %3174 = vmatpush1.bf16.msra.mxu1 %v6273_v55 }
0x1590   :  { %3175 = vmatprep.subr.bf16.mxu1 %v6276_v11 }
0x1593   :  { %3176 = vmatpush1.bf16.msra.mxu1 %v6279_v15 }
0x1594   :  { %3315 = vmatprep.subr.bf16.mxu1 %v6071_v7  ;;  %v6477_v7 = vld [vmem:[#allocation7 + $0x1f4] ss:$8 sps:$4 sm:$0xff]  }
0x15a4   :  { %v3157_v43 = vpop.permute.xlu1 %3156 }
0x15a5   :  { %v3159_v0 = vsel %vm268_vm3, %v6358_v52, %v3157_v43 }
0x15a6   :  { %v3160_v26 = vpack.c.bf16 %v3159_v0, %v3159_v0 }
0x15a8   :  { %3194 = vmatmul.mubr.bf16.vlgmr.msra.gmra.mxu1 %v3160_v26 }
0x15a9   :  { %3316 = vmatpush1.bf16.msra.mxu1 %v6139_v49  ;;  %3347 = vmatprep.mubr.bf16.mxu1 %v6766_v8 }
0x15aa   :  { %3317 = vmatprep.subr.bf16.mxu1 %v6143_v48 }
0x15ad   :  { %3318 = vmatpush1.bf16.msra.mxu1 %v6146_v29  ;;  %v6851_v29 = vld [vmem:[#allocation17_spill] sm:$0xff] }
0x15ae   :  { %3319 = vmatprep.subr.bf16.mxu1 %v6149_v38 }
0x15b1   :  { %3320 = vmatpush1.bf16.msra.mxu1 %v6152_v33 }
0x15b2   :  { %3321 = vmatprep.subr.bf16.mxu1 %v6155_v39 }
0x15b5   :  { %3322 = vmatpush1.bf16.msra.mxu1 %v6159_v60 }
0x15b6   :  { %3323 = vmatprep.subr.bf16.mxu1 %v6162_v1 }
0x15b9   :  { %3324 = vmatpush1.bf16.msra.mxu1 %v6165_v41 }
0x15ba   :  { %3325 = vmatprep.subr.bf16.mxu1 %v6168_v4  ;;  %v6852_v4 = vld [vmem:[#allocation32_spill] sm:$0xff] }
0x15bd   :  { %3326 = vmatpush1.bf16.msra.mxu1 %v6171_v47 }
0x15be   :  { %3327 = vmatprep.subr.bf16.mxu1 %v6174_v25 }
0x15c1   :  { %3328 = vmatpush1.bf16.msra.mxu1 %v6177_v46 }
0x15c2   :  { %3329 = vmatprep.subr.bf16.mxu1 %v6181_v28 }
0x15c5   :  { %3330 = vmatpush1.bf16.msra.mxu1 %v6184_v34 }
0x15c6   :  { %3469 = vmatprep.subr.bf16.mxu1 %v6477_v7 }
0x15e1   :  { %v3118_v49 = vpop.f32.mrf.mxu0 }
0x15e2   :  { %v3119_v45 = vadd.f32 %v3118_v49, %v6853_v30 }
0x15e3   :  { %v3120_v48 = vpop.f32.mrf.mxu0 }
0x15e4   :  { %v6481_v38 = vadd.f32 %v3120_v48, %v6851_v29  ;;  %v3125_v43 = vsub.f32 0.0, %v3119_v45  ;;  %v6855_v45 = vld [vmem:[#allocation19_spill] sm:$0xff] }
0x15e5   :  { %v3122_v33 = vpop.f32.mrf.mxu0 }
0x15e6   :  { %4497 = vtanh.f32 %v6481_v38  ;;  %v3127_v0 = vmul.f32 1.442695, %v3125_v43 }
0x15e7   :  { %v3123_v39 = vpop.f32.mrf.mxu0 }
0x15f3   :  { %v4498_v60 = vpop.eup %4497 }
0x15f4   :  { %3140 = vrot.lane.b32.xlu0 %v4498_v60, %s4832_s28 }
0x1601   :  { %v3272_v1 = vpop.f32.mrf.mxu0 }
0x1602   :  { %v3273_v39 = vadd.f32 %v3272_v1, %v6830_v63 }
0x1603   :  { %v3274_v41 = vpop.f32.mrf.mxu0 }
0x1604   :  { %v6486_v47 = vadd.f32 %v3274_v41, %v6852_v4  ;;  %v3279_v60 = vsub.f32 0.0, %v3273_v39 }
0x1605   :  { %v3276_v25 = vpop.f32.mrf.mxu0 }
0x1606   :  { %4499 = vtanh.f32 %v6486_v47  ;;  %v3281_v49 = vmul.f32 1.442695, %v3279_v60 }
0x1607   :  { %v3277_v46 = vpop.f32.mrf.mxu0 }
0x1613   :  { %v4500_v28 = vpop.eup %4499 }
0x1614   :  { %3294 = vrot.lane.b32.xlu1 %v4500_v28, %s4832_s28 }
0x1636   :  { %v3041_v34 = vpop.f32.mrf.mxu1 }
0x1637   :  { %v3042_v39 = vadd.f32 %v3041_v34, %v5098_v12 }
0x1638   :  { %v3043_v52 = vpop.f32.mrf.mxu1 }
0x1639   :  { %v6492_v5 = vadd.f32 %v3043_v52, %v6854_v51  ;;  %v3048_v60 = vsub.f32 0.0, %v3042_v39 }
0x163a   :  { %v3045_v27 = vpop.f32.mrf.mxu1 }
0x163b   :  { %4501 = vtanh.f32 %v6492_v5 }
0x163c   :  { %v3046_v44 = vpop.f32.mrf.mxu1  ;;  %4503 = vpow2.f32 %v3127_v0 }
0x1648   :  { %v4502_v26 = vpop.eup %4501 }
0x1649   :  { %3063 = vrot.lane.b32.xlu0 %v4502_v26, %s4832_s28  ;;  %v4504_v48 = vpop.eup %4503 }
0x164a   :  { %v3131_v33 = vadd.f32 1.0, %v4504_v48 }
0x164c   :  { %4505 = vrcp.f32 %v3131_v33 }
0x164d   :  { %4507 = vpow2.f32 %v3281_v49  ;;  %v3050_v49 = vmul.f32 1.442695, %v3048_v60 }
0x1659   :  { %v4506_v41 = vpop.eup %4505 }
0x165a   :  { %v4508_v43 = vpop.eup %4507 }
0x165b   :  { %v3285_v0 = vadd.f32 1.0, %v4508_v43 }
0x1666   :  { %v3141_v25 = vpop.permute.xlu0 %3140 }
0x1667   :  { %v3143_v46 = vmul.f32 %v4506_v41, %v3141_v25 }
0x1668   :  { %v3195_v28 = vpop.f32.mrf.mxu1 }
0x1669   :  { %3145 = vrot.lane.b32.xlu1 %v3143_v46, %s4832_s28  ;;  %v3196_v43 = vadd.f32 %v3195_v28, %v5398_v36 }
0x166a   :  { %v3197_v52 = vpop.f32.mrf.mxu1 }
0x166b   :  { %v6499_v51 = vadd.f32 %v3197_v52, %v6855_v45 }
0x166c   :  { %v3199_v27 = vpop.f32.mrf.mxu1 }
0x166d   :  { %4509 = vtanh.f32 %v6499_v51 }
0x166e   :  { %v3200_v44 = vpop.f32.mrf.mxu1  ;;  %4511 = vrcp.f32 %v3285_v0  ;;  %v3202_v0 = vsub.f32 0.0, %v3196_v43 }
0x166f   :  { %4513 = vpow2.f32 %v3050_v49 }
0x167a   :  { %v4510_v1 = vpop.eup %4509 }
0x167b   :  { %3217 = vrot.lane.b32.xlu0 %v4510_v1, %s4832_s28  ;;  %v4512_v26 = vpop.eup %4511  ;;  %v3204_v1 = vmul.f32 1.442695, %v3202_v0 }
0x167c   :  { %v4514_v25 = vpop.eup %4513  ;;  %v3292_v28 = vmul.f32 %v4512_v26, %v6347_v21 }
0x167d   :  { %v3054_v46 = vadd.f32 1.0, %v4514_v25 }
0x167f   :  { %4515 = vrcp.f32 %v3054_v46 }
0x1680   :  { %4517 = vpow2.f32 %v3204_v1  ;;  %v3126_v1 = vsub.f32 0.0, %v6481_v38 }
0x1686   :  { %v3295_v48 = vpop.permute.xlu1 %3294 }
0x1687   :  { %v3297_v33 = vmul.f32 %v4512_v26, %v3295_v48 }
0x1689   :  { %3299 = vrot.lane.b32.xlu1 %v3297_v33, %s4832_s28  ;;  %v3138_v33 = vmul.f32 %v4506_v41, %v6340_v24 }
0x168c   :  { %v4516_v52 = vpop.eup %4515 }
0x168d   :  { %v4518_v48 = vpop.eup %4517  ;;  %v3061_v41 = vmul.f32 %v4516_v52, %v6352_v18 }
0x168e   :  { %v3208_v34 = vadd.f32 1.0, %v4518_v48  ;;  %v3129_v48 = vmul.f32 1.442695, %v3126_v1 }
0x16bb   :  { %v3064_v27 = vpop.permute.xlu0 %3063 }
0x16bc   :  { %v3066_v44 = vmul.f32 %v4516_v52, %v3064_v27 }
0x16be   :  { %3068 = vrot.lane.b32.xlu0 %v3066_v44, %s4832_s28 }
0x16db   :  { %v3146_v12 = vpop.permute.xlu1 %3145 }
0x16dc   :  { %v6508_v39 = vadd.f32 %v3146_v12, %v3138_v33  ;;  %v3280_v12 = vsub.f32 0.0, %v6486_v47 }
0x16de   :  { %4519 = vtanh.f32 %v6508_v39 }
0x16df   :  { %4521 = vrcp.f32 %v3208_v34  ;;  %v3283_v34 = vmul.f32 1.442695, %v3280_v12 }
0x16eb   :  { %v4520_v60 = vpop.eup %4519 }
0x16ec   :  { %3151 = vrot.lane.b32.xlu1 %v4520_v60, %s4832_s28  ;;  %v4522_v49 = vpop.eup %4521 }
0x16ed   :  { %v3218_v25 = vpop.permute.xlu0 %3217  ;;  %v3215_v38 = vmul.f32 %v4522_v49, %v6363_v14 }
0x16ee   :  { %v3220_v46 = vmul.f32 %v4522_v49, %v3218_v25  ;;  %v3203_v49 = vsub.f32 0.0, %v6499_v51 }
0x16f0   :  { %3222 = vrot.lane.b32.xlu0 %v3220_v46, %s4832_s28 }
0x16fb   :  { %v3300_v27 = vpop.permute.xlu1 %3299 }
0x16fc   :  { %v6514_v44 = vadd.f32 %v3300_v27, %v3292_v28 }
0x16fe   :  { %4523 = vtanh.f32 %v6514_v44 }
0x170b   :  { %v4524_v24 = vpop.eup %4523 }
0x170c   :  { %3305 = vrot.lane.b32.xlu1 %v4524_v24, %s4832_s28 }
0x1730   :  { %v3069_v43 = vpop.permute.xlu0 %3068 }
0x1731   :  { %v3071_v0 = vadd.f32 %v3069_v43, %v3061_v41 }
0x1733   :  { %4525 = vtanh.f32 %v3071_v0  ;;  %v3049_v0 = vsub.f32 0.0, %v6492_v5 }
0x1734   :  { %4527 = vpow2.f32 %v3129_v48 }
0x1735   :  { %v3052_v1 = vmul.f32 1.442695, %v3049_v0 }
0x1740   :  { %v4526_v33 = vpop.eup %4525 }
0x1741   :  { %3074 = vrot.lane.b32.xlu0 %v4526_v33, %s4832_s28  ;;  %v4528_v21 = vpop.eup %4527  ;;  %v3206_v33 = vmul.f32 1.442695, %v3203_v49 }
0x1742   :  { %v3132_v26 = vadd.f32 1.0, %v4528_v21 }
0x1744   :  { %4529 = vrcp.f32 %v3132_v26 }
0x1745   :  { %4531 = vpow2.f32 %v3283_v34 }
0x1751   :  { %v4530_v60 = vpop.eup %4529 }
0x1752   :  { %v4532_v28 = vpop.eup %4531 }
0x1753   :  { %v3286_v27 = vadd.f32 1.0, %v4532_v28 }
0x175e   :  { %v3152_v25 = vpop.permute.xlu1 %3151 }
0x175f   :  { %v6522_v18 = vmul.f32 %v4530_v60, %v3152_v25 }
0x1761   :  { %3310 = vrot.lane.b32.xlu1 %v6522_v18, %s4832_s28 }
0x1762   :  { %v3223_v52 = vpop.permute.xlu0 %3222 }
0x1763   :  { %v6527_v46 = vadd.f32 %v3223_v52, %v3215_v38 }
0x1765   :  { %4533 = vtanh.f32 %v6527_v46 }
0x1766   :  { %4535 = vrcp.f32 %v3286_v27 }
0x1767   :  { %4537 = vpow2.f32 %v3052_v1 }
0x1772   :  { %v4534_v47 = vpop.eup %4533 }
0x1773   :  { %3228 = vrot.lane.b32.xlu0 %v4534_v47, %s4832_s28  ;;  %v4536_v24 = vpop.eup %4535 }
0x1774   :  { %v4538_v14 = vpop.eup %4537 }
0x1775   :  { %v3055_v48 = vadd.f32 1.0, %v4538_v14 }
0x1777   :  { %4539 = vrcp.f32 %v3055_v48 }
0x1778   :  { %4541 = vpow2.f32 %v3206_v33 }
0x177e   :  { %v3306_v41 = vpop.permute.xlu1 %3305 }
0x177f   :  { %v3308_v43 = vmul.f32 %v4536_v24, %v3306_v41 }
0x1781   :  { %3464 = vrot.lane.b32.xlu1 %v3308_v43, %s4832_s28 }
0x1784   :  { %v4540_v26 = vpop.eup %4539 }
0x1785   :  { %v4542_v12 = vpop.eup %4541 }
0x1786   :  { %v3209_v25 = vadd.f32 1.0, %v4542_v12 }
0x1788   :  { %4543 = vrcp.f32 %v3209_v25 }
0x1795   :  { %v4544_v5 = vpop.eup %4543 }
0x17b3   :  { %v3075_v21 = vpop.permute.xlu0 %3074 }
0x17b4   :  { %v3077_v34 = vmul.f32 %v4540_v26, %v3075_v21 }
0x17d3   :  { %v3311_v60 = vpop.permute.xlu1 %3310 }
0x17d4   :  { %v3313_v38 = vsel %vm268_vm3, %v3077_v34, %v3311_v60 }
0x17d5   :  { %v3314_v52 = vpack.c.bf16 %v3313_v38, %v3313_v38 }
0x17d7   :  { %3348 = vmatmul.mubr.bf16.vlgmr.msra.gmra.mxu1 %v3314_v52 }
0x17d8   :  { %3470 = vmatpush1.bf16.msra.mxu1 %v6374_v53  ;;  %3501 = vmatprep.mubr.bf16.mxu1 %v6766_v8 }
0x17d9   :  { %3471 = vmatprep.subr.bf16.mxu1 %v6378_v2 }
0x17dc   :  { %3472 = vmatpush1.bf16.msra.mxu1 %v6381_v35 }
0x17dd   :  { %3473 = vmatprep.subr.bf16.mxu1 %v6384_v32 }
0x17e0   :  { %3474 = vmatpush1.bf16.msra.mxu1 %v6387_v61 }
0x17e1   :  { %3475 = vmatprep.subr.bf16.mxu1 %v6390_v3 }
0x17e4   :  { %3476 = vmatpush1.bf16.msra.mxu1 %v6393_v62 }
0x17e5   :  { %v3229_v51 = vpop.permute.xlu0 %3228  ;;  %3477 = vmatprep.subr.bf16.mxu1 %v6396_v6 }
0x17e6   :  { %v3231_v28 = vmul.f32 %v4544_v5, %v3229_v51 }
0x17e8   :  { %3478 = vmatpush1.bf16.msra.mxu1 %v6399_v10  ;;  %3387 = vrot.lane.b32.xlu0 %v3231_v28, %s4832_s28 }
0x17e9   :  { %3479 = vmatprep.subr.bf16.mxu1 %v6403_v57 }
0x17ec   :  { %3480 = vmatpush1.bf16.msra.mxu1 %v6406_v9 }
0x17ed   :  { %3481 = vmatprep.subr.bf16.mxu1 %v6409_v23 }
0x17f0   :  { %3482 = vmatpush1.bf16.msra.mxu1 %v6412_v54 }
0x17f1   :  { %3483 = vmatprep.subr.bf16.mxu1 %v6415_v42 }
0x17f3   :  { %v3465_v27 = vpop.permute.xlu1 %3464 }
0x17f4   :  { %v3467_v47 = vsel %vm268_vm3, %v3231_v28, %v3465_v27  ;;  %3484 = vmatpush1.bf16.msra.mxu1 %v6419_v37 }
0x17f5   :  { %v3468_v24 = vpack.c.bf16 %v3467_v47, %v3467_v47  ;;  %3623 = vmatprep.subr.bf16.mxu1 %v6477_v7 }
0x17f7   :  { %3502 = vmatmul.mubr.bf16.vlgmr.msra.gmra.mxu1 %v3468_v24 }
0x17f8   :  { %3624 = vmatpush1.bf16.msra.mxu1 %v6374_v53  ;;  %3655 = vmatprep.mubr.bf16.mxu1 %v6766_v8 }
0x17f9   :  { %3625 = vmatprep.subr.bf16.mxu1 %v6378_v2 }
0x17fc   :  { %3626 = vmatpush1.bf16.msra.mxu1 %v6381_v35 }
0x17fd   :  { %3627 = vmatprep.subr.bf16.mxu1 %v6384_v32 }
0x1800   :  { %3628 = vmatpush1.bf16.msra.mxu1 %v6387_v61 }
0x1801   :  { %3629 = vmatprep.subr.bf16.mxu1 %v6390_v3 }
0x1804   :  { %3630 = vmatpush1.bf16.msra.mxu1 %v6393_v62 }
0x1805   :  { %3631 = vmatprep.subr.bf16.mxu1 %v6396_v6 }
0x1808   :  { %3632 = vmatpush1.bf16.msra.mxu1 %v6399_v10 }
0x1809   :  { %3633 = vmatprep.subr.bf16.mxu1 %v6403_v57 }
0x180c   :  { %3634 = vmatpush1.bf16.msra.mxu1 %v6406_v9 }
0x180d   :  { %3635 = vmatprep.subr.bf16.mxu1 %v6409_v23 }
0x1810   :  { %3636 = vmatpush1.bf16.msra.mxu1 %v6412_v54 }
0x1811   :  { %3637 = vmatprep.subr.bf16.mxu1 %v6415_v42 }
0x1814   :  { %3638 = vmatpush1.bf16.msra.mxu1 %v6419_v37 }
0x185a   :  { %v3388_v41 = vpop.permute.xlu0 %3387 }
0x185b   :  { %v3390_v43 = vsel %vm268_vm3, %v6522_v18, %v3388_v41 }
0x185c   :  { %v3391_v0 = vpack.c.bf16 %v3390_v43, %v3390_v43 }
0x185e   :  { %3425 = vmatmul.mubr.bf16.vlgmr.msra.gmra.mxu0 %v3391_v0 }
0x185f   :  { %3547 = vmatpush1.bf16.msra.mxu0 %v6236_v17  ;;  %3578 = vmatprep.mubr.bf16.mxu0 %v6766_v8 }
0x1860   :  { %3548 = vmatprep.subr.bf16.mxu0 %v6240_v22 }
0x1863   :  { %3549 = vmatpush1.bf16.msra.mxu0 %v6243_v20 }
0x1864   :  { %3550 = vmatprep.subr.bf16.mxu0 %v6246_v58 }
0x1867   :  { %3551 = vmatpush1.bf16.msra.mxu0 %v6249_v50 }
0x1868   :  { %3552 = vmatprep.subr.bf16.mxu0 %v6252_v16 }
0x186b   :  { %3553 = vmatpush1.bf16.msra.mxu0 %v6255_v59 }
0x186c   :  { %3554 = vmatprep.subr.bf16.mxu0 %v6258_v19 }
0x186f   :  { %3555 = vmatpush1.bf16.msra.mxu0 %v6261_v31 }
0x1870   :  { %3556 = vmatprep.subr.bf16.mxu0 %v6264_v40 }
0x1873   :  { %3557 = vmatpush1.bf16.msra.mxu0 %v6267_v56 }
0x1874   :  { %3558 = vmatprep.subr.bf16.mxu0 %v6270_v13 }
0x1877   :  { %3559 = vmatpush1.bf16.msra.mxu0 %v6273_v55 }
0x1878   :  { %3560 = vmatprep.subr.bf16.mxu0 %v6276_v11 }
0x187b   :  { %3561 = vmatpush1.bf16.msra.mxu0 %v6279_v15 }
0x187c   :  { %3700 = vmatprep.subr.bf16.mxu0 %v6477_v7 }
0x1897   :  { %v3349_v17 = vpop.f32.mrf.mxu1 }
0x1898   :  { %v3350_v60 = vadd.f32 %v3349_v17, %v6853_v30 }
0x1899   :  { %v3351_v22 = vpop.f32.mrf.mxu1 }
0x189a   :  { %v6596_v1 = vadd.f32 %v3351_v22, %v6851_v29  ;;  %v3356_v38 = vsub.f32 0.0, %v3350_v60 }
0x189b   :  { %v3353_v20 = vpop.f32.mrf.mxu1 }
0x189c   :  { %v3358_v5 = vmul.f32 1.442695, %v3356_v38  ;;  %v3357_v38 = vsub.f32 0.0, %v6596_v1 }
0x189d   :  { %v3354_v58 = vpop.f32.mrf.mxu1 }
0x18b7   :  { %v3503_v50 = vpop.f32.mrf.mxu1 }
0x18b8   :  { %v3504_v56 = vadd.f32 %v3503_v50, %v6830_v63 }
0x18b9   :  { %v3505_v16 = vpop.f32.mrf.mxu1 }
0x18ba   :  { %v3506_v59 = vadd.f32 %v3505_v16, %v6852_v4  ;;  %v3510_v13 = vsub.f32 0.0, %v3504_v56 }
0x18bb   :  { %v3507_v19 = vpop.f32.mrf.mxu1 }
0x18bc   :  { %4545 = vtanh.f32 %v3506_v59  ;;  %v3512_v55 = vmul.f32 1.442695, %v3510_v13  ;;  %v3511_v16 = vsub.f32 0.0, %v3506_v59 }
0x18bd   :  { %v3508_v31 = vpop.f32.mrf.mxu1 }
0x18be   :  { %4547 = vpow2.f32 %v3512_v55  ;;  %v3514_v19 = vmul.f32 1.442695, %v3511_v16 }
0x18c9   :  { %v4546_v40 = vpop.eup %4545 }
0x18ca   :  { %3525 = vrot.lane.b32.xlu1 %v4546_v40, %s4832_s28 }
0x18cb   :  { %v4548_v49 = vpop.eup %4547 }
0x18cc   :  { %v3516_v48 = vadd.f32 1.0, %v4548_v49 }
0x191e   :  { %v3426_v11 = vpop.f32.mrf.mxu0 }
0x191f   :  { %v3427_v29 = vadd.f32 %v3426_v11, %v5398_v36 }
0x1920   :  { %v3428_v15 = vpop.f32.mrf.mxu0 }
0x1921   :  { %v6593_v7 = vadd.f32 %v3428_v15, %v6855_v45  ;;  %v3433_v25 = vsub.f32 0.0, %v3427_v29 }
0x1922   :  { %v3430_v18 = vpop.f32.mrf.mxu0 }
0x1923   :  { %4549 = vtanh.f32 %v6593_v7  ;;  %v3435_v52 = vmul.f32 1.442695, %v3433_v25 }
0x1924   :  { %v3431_v14 = vpop.f32.mrf.mxu0  ;;  %4551 = vtanh.f32 %v6596_v1 }
0x1925   :  { %4553 = vrcp.f32 %v3516_v48  ;;  %v3434_v48 = vsub.f32 0.0, %v6593_v7 }
0x1926   :  { %4555 = vpow2.f32 %v3435_v52  ;;  %v3360_v52 = vmul.f32 1.442695, %v3357_v38 }
0x1927   :  { %4557 = vpow2.f32 %v3358_v5 }
0x1930   :  { %v4550_v33 = vpop.eup %4549 }
0x1931   :  { %3448 = vrot.lane.b32.xlu0 %v4550_v33, %s4832_s28  ;;  %v4552_v21 = vpop.eup %4551 }
0x1932   :  { %v4554_v26 = vpop.eup %4553 }
0x1933   :  { %v4556_v51 = vpop.eup %4555  ;;  %v3523_v17 = vmul.f32 %v4554_v26, %v6514_v44 }
0x1934   :  { %v3439_v28 = vadd.f32 1.0, %v4556_v51  ;;  %v4558_v27 = vpop.eup %4557 }
0x1935   :  { %3371 = vrot.lane.b32.xlu0 %v4552_v21, %s4832_s28  ;;  %v3362_v47 = vadd.f32 1.0, %v4558_v27 }
0x1936   :  { %4559 = vrcp.f32 %v3439_v28 }
0x1937   :  { %4561 = vrcp.f32 %v3362_v47 }
0x193c   :  { %v3526_v12 = vpop.permute.xlu1 %3525 }
0x193d   :  { %v3528_v34 = vmul.f32 %v4554_v26, %v3526_v12 }
0x193f   :  { %3530 = vrot.lane.b32.xlu1 %v3528_v34, %s4832_s28 }
0x1943   :  { %v4560_v24 = vpop.eup %4559 }
0x1944   :  { %v4562_v0 = vpop.eup %4561  ;;  %v3446_v31 = vmul.f32 %v4560_v24, %v6527_v46 }
0x1945   :  { %v3369_v44 = vmul.f32 %v4562_v0, %v6508_v39  ;;  %v3437_v39 = vmul.f32 1.442695, %v3434_v48 }
0x19a3   :  { %v3449_v41 = vpop.permute.xlu0 %3448 }
0x19a4   :  { %v3451_v43 = vmul.f32 %v4560_v24, %v3449_v41 }
0x19a6   :  { %3453 = vrot.lane.b32.xlu1 %v3451_v43, %s4832_s28 }
0x19a7   :  { %v3372_v22 = vpop.permute.xlu0 %3371 }
0x19a8   :  { %v3374_v30 = vmul.f32 %v4562_v0, %v3372_v22 }
0x19aa   :  { %3376 = vrot.lane.b32.xlu1 %v3374_v30, %s4832_s28 }
0x19b1   :  { %v3531_v20 = vpop.permute.xlu1 %3530 }
0x19b2   :  { %v6608_v58 = vadd.f32 %v3531_v20, %v3523_v17 }
0x19b4   :  { %4563 = vtanh.f32 %v6608_v58 }
0x19b5   :  { %4565 = vpow2.f32 %v3514_v19 }
0x19c1   :  { %v4564_v50 = vpop.eup %4563 }
0x19c2   :  { %3536 = vrot.lane.b32.xlu0 %v4564_v50, %s4832_s28  ;;  %v4566_v11 = vpop.eup %4565 }
0x19c3   :  { %v3517_v15 = vadd.f32 1.0, %v4566_v11 }
0x1a18   :  { %v3454_v40 = vpop.permute.xlu1 %3453 }
0x1a19   :  { %v6613_v56 = vadd.f32 %v3454_v40, %v3446_v31 }
0x1a1b   :  { %4567 = vtanh.f32 %v6613_v56 }
0x1a1c   :  { %v3377_v13 = vpop.permute.xlu1 %3376 }
0x1a1d   :  { %v3379_v55 = vadd.f32 %v3377_v13, %v3369_v44 }
0x1a1f   :  { %4569 = vtanh.f32 %v3379_v55 }
0x1a20   :  { %4571 = vrcp.f32 %v3517_v15 }
0x1a21   :  { %4573 = vpow2.f32 %v3437_v39 }
0x1a28   :  { %v4568_v18 = vpop.eup %4567 }
0x1a29   :  { %3459 = vrot.lane.b32.xlu0 %v4568_v18, %s4832_s28 }
0x1a2c   :  { %v4570_v59 = vpop.eup %4569 }
0x1a2d   :  { %3382 = vrot.lane.b32.xlu0 %v4570_v59, %s4832_s28  ;;  %v4572_v46 = vpop.eup %4571 }
0x1a2e   :  { %v4574_v33 = vpop.eup %4573 }
0x1a2f   :  { %v3440_v21 = vadd.f32 1.0, %v4574_v33 }
0x1a31   :  { %4575 = vrcp.f32 %v3440_v21 }
0x1a32   :  { %4577 = vpow2.f32 %v3360_v52 }
0x1a34   :  { %v3537_v14 = vpop.permute.xlu0 %3536 }
0x1a35   :  { %v3539_v49 = vmul.f32 %v4572_v46, %v3537_v14 }
0x1a37   :  { %3618 = vrot.lane.b32.xlu1 %v3539_v49, %s4832_s28 }
0x1a3e   :  { %v4576_v26 = vpop.eup %4575 }
0x1a3f   :  { %v4578_v7 = vpop.eup %4577 }
0x1a40   :  { %v3363_v5 = vadd.f32 1.0, %v4578_v7 }
0x1a42   :  { %4579 = vrcp.f32 %v3363_v5 }
0x1a4f   :  { %v4580_v28 = vpop.eup %4579 }
0x1a9b   :  { %v3460_v12 = vpop.permute.xlu0 %3459 }
0x1a9c   :  { %v3462_v34 = vmul.f32 %v4576_v26, %v3460_v12 }
0x1a9e   :  { %3541 = vrot.lane.b32.xlu1 %v3462_v34, %s4832_s28 }
0x1a9f   :  { %v3383_v51 = vpop.permute.xlu0 %3382 }
0x1aa0   :  { %v3385_v27 = vmul.f32 %v4580_v28, %v3383_v51 }
0x1aa9   :  { %v3619_v29 = vpop.permute.xlu1 %3618 }
0x1aaa   :  { %v3621_v60 = vsel %vm268_vm3, %v3462_v34, %v3619_v29 }
0x1aab   :  { %v3622_v25 = vpack.c.bf16 %v3621_v60, %v3621_v60 }
0x1aad   :  { %3656 = vmatmul.mubr.bf16.vlgmr.msra.gmra.mxu1 %v3622_v25 }
0x1b10   :  { %v3542_v47 = vpop.permute.xlu1 %3541 }
0x1b11   :  { %v3544_v24 = vsel %vm268_vm3, %v3385_v27, %v3542_v47 }
0x1b12   :  { %v3545_v41 = vpack.c.bf16 %v3544_v24, %v3544_v24 }
0x1b14   :  { %3579 = vmatmul.mubr.bf16.vlgmr.msra.gmra.mxu0 %v3545_v41 }
0x1b15   :  { %3701 = vmatpush1.bf16.msra.mxu0 %v6374_v53  ;;  %3732 = vmatprep.mubr.bf16.mxu0 %v6766_v8 }
0x1b16   :  { %3702 = vmatprep.subr.bf16.mxu0 %v6378_v2 }
0x1b19   :  { %3703 = vmatpush1.bf16.msra.mxu0 %v6381_v35 }
0x1b1a   :  { %3704 = vmatprep.subr.bf16.mxu0 %v6384_v32 }
0x1b1d   :  { %3705 = vmatpush1.bf16.msra.mxu0 %v6387_v61 }
0x1b1e   :  { %3706 = vmatprep.subr.bf16.mxu0 %v6390_v3 }
0x1b21   :  { %3707 = vmatpush1.bf16.msra.mxu0 %v6393_v62 }
0x1b22   :  { %3708 = vmatprep.subr.bf16.mxu0 %v6396_v6 }
0x1b25   :  { %3709 = vmatpush1.bf16.msra.mxu0 %v6399_v10 }
0x1b26   :  { %3710 = vmatprep.subr.bf16.mxu0 %v6403_v57 }
0x1b29   :  { %3711 = vmatpush1.bf16.msra.mxu0 %v6406_v9 }
0x1b2a   :  { %3712 = vmatprep.subr.bf16.mxu0 %v6409_v23 }
0x1b2d   :  { %3713 = vmatpush1.bf16.msra.mxu0 %v6412_v54 }
0x1b2e   :  { %3714 = vmatprep.subr.bf16.mxu0 %v6415_v42 }
0x1b31   :  { %3715 = vmatpush1.bf16.msra.mxu0 %v6419_v37 }
0x1b6d   :  { %v3657_v8 = vpop.f32.mrf.mxu1 }
0x1b6e   :  { %v3658_v3 = vadd.f32 %v3657_v8, %v6830_v63 }
0x1b6f   :  { %v3659_v53 = vpop.f32.mrf.mxu1 }
0x1b70   :  { %v3660_v2 = vadd.f32 %v3659_v53, %v6852_v4  ;;  %v3664_v62 = vsub.f32 0.0, %v3658_v3  ;;  %v4135_v3 = vld [vmem:[%s6692_s5 + $0x8] sm:$0xff]  }
0x1b71   :  { %v3661_v35 = vpop.f32.mrf.mxu1 }
0x1b72   :  { %4581 = vtanh.f32 %v3660_v2  ;;  %v3666_v6 = vmul.f32 1.442695, %v3664_v62 }
0x1b73   :  { %v3662_v32 = vpop.f32.mrf.mxu1 }
0x1b74   :  { %4583 = vpow2.f32 %v3666_v6 }
0x1b7f   :  { %v4582_v61 = vpop.eup %4581 }
0x1b80   :  { %3679 = vrot.lane.b32.xlu0 %v4582_v61, %s4832_s28  ;;  %v4833_v61 = vmov 0.0  }
0x1b81   :  { %v4584_v42 = vpop.eup %4583  ;;  %3999 = vmatprep.subr.bf16.mxu1 %v4833_v61  ;;  %4007 = vmatprep.mubr.msk.bf16.mxu1 %vm4834_vm5, %v4833_v61 }
0x1b82   :  { %v3670_v37 = vadd.f32 1.0, %v4584_v42 }
0x1bd4   :  { %v3580_v10 = vpop.f32.mrf.mxu0 }
0x1bd5   :  { %v3581_v30 = vadd.f32 %v3580_v10, %v5398_v36  ;;  %v3665_v36 = vsub.f32 0.0, %v3660_v2 }
0x1bd6   :  { %v3582_v57 = vpop.f32.mrf.mxu0 }
0x1bd7   :  { %v3583_v9 = vadd.f32 %v3582_v57, %v6855_v45  ;;  %v3587_v17 = vsub.f32 0.0, %v3581_v30  ;;  %v3668_v11 = vmul.f32 1.442695, %v3665_v36  ;;  %v4136_v57 = vld [vmem:[%s6692_s5] sm:$0xff]  }
0x1bd8   :  { %v3584_v23 = vpop.f32.mrf.mxu0  ;;  %v3986_v30 = vld [vmem:[%s6693_s6] ss:$0 sm:$0xff] }
0x1bd9   :  { %4585 = vtanh.f32 %v3583_v9  ;;  %v3589_v20 = vmul.f32 1.442695, %v3587_v17  ;;  %v3588_v33 = vsub.f32 0.0, %v3583_v9 }
0x1bda   :  { %v3585_v54 = vpop.f32.mrf.mxu0  ;;  %4587 = vrcp.f32 %v3670_v37 }
0x1bdb   :  { %4589 = vpow2.f32 %v3589_v20  ;;  %v3591_v21 = vmul.f32 1.442695, %v3588_v33 }
0x1be6   :  { %v4586_v1 = vpop.eup %4585 }
0x1be7   :  { %3602 = vrot.lane.b32.xlu1 %v4586_v1, %s4832_s28  ;;  %v4588_v43 = vpop.eup %4587 }
0x1be8   :  { %v4590_v45 = vpop.eup %4589  ;;  %v3677_v40 = vmul.f32 %v4588_v43, %v6608_v58 }
0x1be9   :  { %v3593_v50 = vadd.f32 1.0, %v4590_v45  ;;  %v3992_v45 = vld [vmem:[%s6694_s7] ss:$0 sm:$0xff] }
0x1beb   :  { %4591 = vrcp.f32 %v3593_v50 }
0x1bf2   :  { %v3680_v0 = vpop.permute.xlu0 %3679 }
0x1bf3   :  { %v3682_v22 = vmul.f32 %v4588_v43, %v3680_v0 }
0x1bf5   :  { %3684 = vrot.lane.b32.xlu0 %v3682_v22, %s4832_s28 }
0x1bf8   :  { %v4592_v16 = vpop.eup %4591 }
0x1bf9   :  { %v3600_v15 = vmul.f32 %v4592_v16, %v6613_v56 }
0x1c59   :  { %v3603_v19 = vpop.permute.xlu1 %3602 }
0x1c5a   :  { %v3605_v31 = vmul.f32 %v4592_v16, %v3603_v19 }
0x1c5c   :  { %3607 = vrot.lane.b32.xlu1 %v3605_v31, %s4832_s28 }
0x1c67   :  { %v3685_v44 = vpop.permute.xlu0 %3684 }
0x1c68   :  { %v6650_v13 = vadd.f32 %v3685_v44, %v3677_v40 }
0x1c6a   :  { %4593 = vtanh.f32 %v6650_v13 }
0x1c6b   :  { %4595 = vpow2.f32 %v3668_v11 }
0x1c77   :  { %v4594_v55 = vpop.eup %4593 }
0x1c78   :  { %3690 = vrot.lane.b32.xlu0 %v4594_v55, %s4832_s28  ;;  %v4596_v46 = vpop.eup %4595 }
0x1c79   :  { %v3671_v14 = vadd.f32 1.0, %v4596_v46 }
0x1cce   :  { %v3608_v18 = vpop.permute.xlu1 %3607 }
0x1ccf   :  { %v3610_v59 = vadd.f32 %v3608_v18, %v3600_v15 }
0x1cd1   :  { %4597 = vtanh.f32 %v3610_v59 }
0x1cd2   :  { %4599 = vrcp.f32 %v3671_v14 }
0x1cd3   :  { %4601 = vpow2.f32 %v3591_v21 }
0x1cde   :  { %v4598_v58 = vpop.eup %4597 }
0x1cdf   :  { %3613 = vrot.lane.b32.xlu1 %v4598_v58, %s4832_s28  ;;  %v4600_v49 = vpop.eup %4599 }
0x1ce0   :  { %v4602_v26 = vpop.eup %4601 }
0x1ce1   :  { %v3594_v12 = vadd.f32 1.0, %v4602_v26 }
0x1ce3   :  { %4603 = vrcp.f32 %v3594_v12 }
0x1cea   :  { %v3691_v48 = vpop.permute.xlu0 %3690 }
0x1ceb   :  { %v3693_v39 = vmul.f32 %v4600_v49, %v3691_v48 }
0x1ced   :  { %3695 = vrot.lane.b32.xlu0 %v3693_v39, %s4832_s28 }
0x1cf0   :  { %v4604_v34 = vpop.eup %4603 }
0x1d51   :  { %v3614_v56 = vpop.permute.xlu1 %3613 }
0x1d52   :  { %v3616_v29 = vmul.f32 %v4604_v34, %v3614_v56 }
0x1d5f   :  { %v3696_v60 = vpop.permute.xlu0 %3695 }
0x1d60   :  { %v3698_v25 = vsel %vm268_vm3, %v3616_v29, %v3696_v60 }
0x1d61   :  { %v3699_v38 = vpack.c.bf16 %v3698_v25, %v3698_v25 }
0x1d63   :  { %3733 = vmatmul.mubr.bf16.vlgmr.msra.gmra.mxu0 %v3699_v38 }
0x1e23   :  { %v3734_v52 = vpop.f32.mrf.mxu0 }
0x1e24   :  { %v3735_v47 = vadd.f32 %v3734_v52, %v6830_v63  ;;  %v4134_v63 = vld [vmem:[%s6692_s5 + $0x10] sm:$0xff]  }
0x1e25   :  { %v3736_v7 = vpop.f32.mrf.mxu0 }
0x1e26   :  { %v3737_v5 = vadd.f32 %v3736_v7, %v6852_v4  ;;  %v3741_v24 = vsub.f32 0.0, %v3735_v47  ;;  %v4133_v4 = vld [vmem:[%s6692_s5 + $0x18] sm:$0xff]  }
0x1e27   :  { %v3738_v51 = vpop.f32.mrf.mxu0  ;;  %4000 = vmatpush3.bf16.msra.mxu1 %v4133_v4 }
0x1e28   :  { %4605 = vtanh.f32 %v3737_v5  ;;  %v3743_v41 = vmul.f32 1.442695, %v3741_v24  ;;  %4001 = vmatprep.subr.bf16.mxu1 %v4833_v61  ;;  %v3742_v23 = vsub.f32 0.0, %v3737_v5 }
0x1e29   :  { %v3739_v28 = vpop.f32.mrf.mxu0 }
0x1e2a   :  { %4607 = vpow2.f32 %v3743_v41  ;;  %v3745_v54 = vmul.f32 1.442695, %v3742_v23 }
0x1e2b   :  { %4002 = vmatpush3.bf16.msra.mxu1 %v4134_v63 }
0x1e2c   :  { %4003 = vmatprep.subr.bf16.mxu1 %v4833_v61 }
0x1e2f   :  { %4004 = vmatpush3.bf16.msra.mxu1 %v4135_v3 }
0x1e30   :  { %4005 = vmatprep.subr.bf16.mxu1 %v4833_v61 }
0x1e33   :  { %4006 = vmatpush3.bf16.msra.mxu1 %v4136_v57 }
0x1e35   :  { %v4606_v27 = vpop.eup %4605 }
0x1e36   :  { %3756 = vrot.lane.b32.xlu1 %v4606_v27, %s4832_s28 }
0x1e37   :  { %v4608_v8 = vpop.eup %4607 }
0x1e38   :  { %v3747_v53 = vadd.f32 1.0, %v4608_v8 }
0x1e3a   :  { %4609 = vrcp.f32 %v3747_v53 }
0x1e47   :  { %v4610_v2 = vpop.eup %4609 }
0x1e48   :  { %v3754_v62 = vmul.f32 %v4610_v2, %v6650_v13  ;;  %v3993_v13 = vld [vmem:[#allocation2] ss:$0 sm:$0xff] }
0x1ea8   :  { %v3757_v35 = vpop.permute.xlu1 %3756 }
0x1ea9   :  { %v3759_v32 = vmul.f32 %v4610_v2, %v3757_v35 }
0x1eab   :  { %3761 = vrot.lane.b32.xlu0 %v3759_v32, %s4832_s28 }
0x1f1d   :  { %v3762_v6 = vpop.permute.xlu0 %3761 }
0x1f1e   :  { %v3764_v10 = vadd.f32 %v3762_v6, %v3754_v62 }
0x1f20   :  { %4611 = vtanh.f32 %v3764_v10 }
0x1f21   :  { %4613 = vpow2.f32 %v3745_v54 }
0x1f2d   :  { %v4612_v9 = vpop.eup %4611 }
0x1f2e   :  { %3767 = vrot.lane.b32.xlu1 %v4612_v9, %s4832_s28  ;;  %v4614_v42 = vpop.eup %4613 }
0x1f2f   :  { %v3748_v37 = vadd.f32 1.0, %v4614_v42 }
0x1f31   :  { %4615 = vrcp.f32 %v3748_v37 }
0x1f3e   :  { %v4616_v1 = vpop.eup %4615 }
0x1fa0   :  { %v3768_v43 = vpop.permute.xlu1 %3767 }
0x1fa1   :  { %v3770_v0 = vmul.f32 %v4616_v1, %v3768_v43 }
0x1fa3   :  { %v3771_v22 = vpack.c.bf16 %v3770_v0, %v3770_v0 }
0x1fa5   :  { %4008 = vmatmul.mubr.msk.bf16.vlgmr.msra.gmra.mxu1 %vm268_vm3, %v3771_v22 }
0x2065   :  { %v3848_v17 = vpop.f32.mrf.mxu1 }
0x2066   :  { %v3849_v20 = vadd.f32 %v3986_v30, %v3848_v17 }
0x2067   :  { %v4009_v50 = vpop.f32.mrf.mxu1 }
0x2068   :  { %v3854_v16 = vmax.f32 %v3849_v20, 0.0 }
0x2069   :  { %v3851_v19 = vpop.f32.mrf.mxu1 }
0x206a   :  { %v3862_v31 = vmul.f32 %v3992_v45, %v3854_v16 }
0x206b   :  { %v4010_v40 = vpop.f32.mrf.mxu1 }
0x206c   :  { %v3863_v44 = vsel %vm268_vm3, %v3862_v31, 0.0 }
0x206d   :  { %3864 = vadd.xlane.f32.xlu0 %v3863_v44 }
0x20f6   :  { %v3865_v55 = vpop.xlane.xlu0 %3864 }
0x20f7   :  { %v3873_v36 = vadd.f32 %v3993_v13, %v3865_v55 }
0x20f9   :  { %3875 = vst.msk [vmem:[%s6696_s9] sm:$0xff] %vm3874_vm6, %v3873_v36 }
0x20fa   :  { %3880 = vsyncpa [#allocation4], 1 }
0x20fb   :  { %3881 = vsyncpa [#allocation6], 1 }

</bundles_post_ra>
